<compile_context>
chip_gen: v7x
topology: tpu7x:2x2x1
jax: 0.10.0
libtpu: 0.0.40
codegen_flags: <defaults>
</compile_context>

<pallas_src>
import functools

import jax
import jax.numpy as jnp
from jax.experimental import pallas as pl
from jax.experimental.pallas import tpu as pltpu


def _round_up(x, m):
    return (x + m - 1) // m * m


# ----------------------------- kernel ---------------------------------------

def _generator_kernel(x_ref, clamp_ref,
                      enc_in_w_ref, enc_in_b_ref,
                      lbad_w_ref, lbad_b_ref,
                      fc_ml_w_ref, fc_ml_b_ref,
                      dec_in_w_ref, dec_in_b_ref,
                      dec_out_w_ref, dec_out_b_ref,
                      recon_ref, ml_ref,
                      *, approx_recip):
    """Full Generator forward for one batch tile (BatchNorm folded at prep time).

    lbad_w stacking: [0..3] encoder ResBlock BB_1..BB_4, [4..7] decoder BB_1..BB_4.
    """

    # NOTE: at M=16 the 12 matmuls form a serial weight-push/drain chain; explicit MXU
    # driving (pltpu.matmul_push_rhs / matmul_acc_lhs / matmul_pop, alternating
    # mxu_index) could overlap the next layer's weight load, but is unnecessary once
    # block_b >= 128, so it is intentionally not used here.
    def mm(v, w_ref):
        w = w_ref[...]
        # activations cast to the weight dtype (f32 or bf16); f32 accumulation on MXU
        return jnp.dot(v.astype(w.dtype), w, preferred_element_type=jnp.float32)

    def mish(v):
        # mish(v) = v * tanh(softplus(v)).  With e = exp(min(v, 20)), t = 1 + e,
        # tanh(log(t)) = (t^2 - 1) / (t^2 + 1): one EUP exp (+ one EUP reciprocal)
        # instead of exp + log1p + tanh.
        e = jnp.exp(jnp.minimum(v, 20.0))
        t2 = (1.0 + e) * (1.0 + e)
        if approx_recip:
            st = (t2 - 1.0) * pl.reciprocal(t2 + 1.0, approx=True)
        else:
            st = (t2 - 1.0) / (t2 + 1.0)
        return jnp.where(v > 20.0, v, v * st)

    def lbad(v, idx):
        # Linear(no bias) -> BN(eval, folded: scale in W, shift in bias) -> Mish -> Dropout(id)
        w = lbad_w_ref[idx]
        h = jnp.dot(v.astype(w.dtype), w, preferred_element_type=jnp.float32)
        return mish(h + lbad_b_ref[idx, :][None, :])

    def resblock(v, base):
        r = v
        h = lbad(v, base)
        h = lbad(h, base + 1) + r
        r = h
        h = lbad(h, base + 2)
        h = lbad(h, base + 3) + r
        return h

    x = x_ref[...]

    # ---------------- Encoder2D ----------------
    h = mish(mm(x, enc_in_w_ref) + enc_in_b_ref[...])        # enc_inp_block
    h = resblock(h, 0)                                       # encoder ResBlock

    # Fused fc_mean | fc_logvar head (lane-padded to a multiple of 128).
    ml = mm(h, fc_ml_w_ref) + fc_ml_b_ref[...]

    # logvar clamp: a single VALU min against the precomputed clamp row (FLT_MAX on
    # mean/pad lanes, 30 on logvar lanes), applied ONLY to the stored value.  The
    # unclamped slab feeds dec_in below, which is exact because dec_in_w's logvar/pad
    # rows are zero — this keeps the clamp + store off the MXU critical chain.
    ml_ref[...] = jnp.minimum(ml, clamp_ref[...])

    # ---------------- Decoder3D ----------------
    # reparameterize (eval): z = mean.  dec_in_w rows >= latent_dim are zero-padded,
    # so feeding the whole [mean|logvar|pad] slab is exactly mean @ W.
    h = mish(mm(ml, dec_in_w_ref) + dec_in_b_ref[...])       # dec_inp_block
    h = resblock(h, 4)                                       # decoder ResBlock

    # TODO(synk): scale_3d() is not defined in the provided source; treated as identity.
    recon_ref[...] = jnp.tanh(mm(h, dec_out_w_ref) + dec_out_b_ref[...])


# ----------------------------- parameter folding ------------------------------

_ENC_BN_IDX = (1, 2, 3, 4)
_DEC_BN_IDX = (6, 7, 8, 9)


def fold_params(p, *, n_joints, latent_dim, neurons, use_bf16=False):
    """Fold eval-mode BatchNorm affines into weights/biases, fuse fc_mean|fc_logvar,
    and lane-pad every feature dim to a multiple of 128 (lane-dense loads/stores)."""
    del neurons  # implied by array shapes
    d_in, d_out = 2 * n_joints, 3 * n_joints
    d_in_pad = _round_up(d_in, 128)
    out_pad = _round_up(d_out, 128)
    ml_pad = _round_up(2 * latent_dim, 128)
    wdt = jnp.bfloat16 if use_bf16 else jnp.float32
    f32 = jnp.float32

    scale, shift = p["bn_scale"], p["bn_shift"]

    # encoder input block:  y = (x W + b) * s0 + t0
    enc_in_w = p["enc_in_w"] * scale[0][None, :]
    enc_in_b = p["enc_in_b"] * scale[0][None, :] + shift[0][None, :]
    enc_in_w = jnp.pad(enc_in_w, ((0, d_in_pad - d_in), (0, 0)))

    # LBAD blocks (Linear no-bias -> BN):  y = (x W) * s + t
    bn_idx = jnp.array(_ENC_BN_IDX + _DEC_BN_IDX)
    lbad_w = p["lbad_w"] * scale[bn_idx][:, None, :]
    lbad_b = shift[bn_idx]

    # fused mean|logvar head, zero-padded to ml_pad lanes
    fc_ml_w = jnp.concatenate([p["fc_mean_w"], p["fc_logvar_w"]], axis=1)
    fc_ml_b = jnp.concatenate([p["fc_mean_b"], p["fc_logvar_b"]], axis=1)
    fc_ml_w = jnp.pad(fc_ml_w, ((0, 0), (0, ml_pad - 2 * latent_dim)))
    fc_ml_b = jnp.pad(fc_ml_b, ((0, 0), (0, ml_pad - 2 * latent_dim)))

    # clamp row for the stored mean|logvar slab: 30 on logvar lanes, FLT_MAX elsewhere
    lane = jnp.arange(ml_pad)
    big = float(jnp.finfo(jnp.float32).max)
    ml_clamp = jnp.where((lane >= latent_dim) & (lane < 2 * latent_dim), 30.0, big)
    ml_clamp = ml_clamp.astype(f32)[None, :]

    # decoder input block consumes the padded [mean|logvar|pad] slab:
    # rows >= latent_dim MUST stay zero (jnp.pad guarantees it) so only the mean
    # lanes contribute (z = mean) and the missing clamp on the dec_in path is a no-op.
    dec_in_w = p["dec_in_w"] * scale[5][None, :]
    dec_in_b = p["dec_in_b"] * scale[5][None, :] + shift[5][None, :]
    dec_in_w = jnp.pad(dec_in_w, ((0, ml_pad - latent_dim), (0, 0)))

    dec_out_w = jnp.pad(p["dec_out_w"], ((0, 0), (0, out_pad - d_out)))
    dec_out_b = jnp.pad(p["dec_out_b"], ((0, 0), (0, out_pad - d_out)))

    return dict(
        ml_clamp=ml_clamp,
        enc_in_w=enc_in_w.astype(wdt), enc_in_b=enc_in_b.astype(f32),
        lbad_w=lbad_w.astype(wdt), lbad_b=lbad_b.astype(f32),
        fc_ml_w=fc_ml_w.astype(wdt), fc_ml_b=fc_ml_b.astype(f32),
        dec_in_w=dec_in_w.astype(wdt), dec_in_b=dec_in_b.astype(f32),
        dec_out_w=dec_out_w.astype(wdt), dec_out_b=dec_out_b.astype(f32),
    )


# ----------------------------- wrapper ---------------------------------------

def generator_forward(x_pose2d, folded, *, n_joints, latent_dim, neurons,
                      block_b=None, approx_recip=True):
    """x_pose2d: [B, n_joints, 2] float32.  Returns (recon [B, n_joints, 3], mean, logvar).

    NOTE: at tiny B this forward is dispatch/latency bound (12 small matmuls plus one
    weight DMA per call).  For real-world throughput, concatenate many small batches
    along the batch axis into one call: weights stay VMEM-resident across grid steps
    (constant block index) and the per-tile input/output DMAs pipeline.
    """
    del neurons
    B = x_pose2d.shape[0]
    d_in, d_out = 2 * n_joints, 3 * n_joints
    d_in_pad = folded["enc_in_w"].shape[0]
    ml_pad = folded["fc_ml_w"].shape[1]
    out_pad = folded["dec_out_w"].shape[1]

    if block_b is None:
        if B >= 64:
            # >= 2 grid steps so both v7x TensorCores get work ("parallel" axis);
            # harmless on single-core v5e/v6e.  Per-tile rows capped at 128.
            block_b = min(128, _round_up(-(-B // 2), 8))
        else:
            # tiny batch: one grid step avoids the ~0.35 us/step pipeline overhead.
            block_b = min(128, _round_up(B, 8))
    block_b = _round_up(block_b, 8)
    b_pad = _round_up(B, block_b)

    x = x_pose2d.reshape(B, d_in).astype(jnp.float32)        # x.view(-1, 2*n_joints)
    x = jnp.pad(x, ((0, b_pad - B), (0, d_in_pad - d_in)))   # lane-dense input slab

    inputs = (x, folded["ml_clamp"],
              folded["enc_in_w"], folded["enc_in_b"],
              folded["lbad_w"], folded["lbad_b"],
              folded["fc_ml_w"], folded["fc_ml_b"],
              folded["dec_in_w"], folded["dec_in_b"],
              folded["dec_out_w"], folded["dec_out_b"])

    out_shape = (jax.ShapeDtypeStruct((b_pad, out_pad), jnp.float32),
                 jax.ShapeDtypeStruct((b_pad, ml_pad), jnp.float32))
    out_specs = (pl.BlockSpec((block_b, out_pad), lambda i: (i, 0)),
                 pl.BlockSpec((block_b, ml_pad), lambda i: (i, 0)))

    kernel = functools.partial(_generator_kernel, approx_recip=approx_recip)

    # Raise the scoped-VMEM limit only if the (single-buffered) weights are big,
    # e.g. neurons=1024 f32 -> ~36 MiB of weights (matters on v7x's 64 MiB VMEM).
    weight_bytes = sum(int(a.size) * a.dtype.itemsize for a in inputs[1:])
    vmem_limit = None
    if weight_bytes > (24 << 20):
        vmem_limit = min(int(weight_bytes * 1.25) + (8 << 20), 100 << 20)
    compiler_params = pltpu.CompilerParams(
        dimension_semantics=("parallel",), vmem_limit_bytes=vmem_limit)

    def call(single_buffer_weights):
        # Weights/biases/clamp row have a constant index_map across the grid, so
        # double-buffering them is pure waste: Buffered(1) halves their resident VMEM.
        extra = dict(pipeline_mode=pl.Buffered(1)) if single_buffer_weights else {}
        in_specs = [pl.BlockSpec((block_b, d_in_pad), lambda i: (i, 0))]
        in_specs += [pl.BlockSpec(a.shape, lambda i, _nd=a.ndim: (0,) * _nd, **extra)
                     for a in inputs[1:]]
        return pl.pallas_call(
            kernel,
            grid=(b_pad // block_b,),
            in_specs=in_specs,
            out_specs=out_specs,
            out_shape=out_shape,
            compiler_params=compiler_params,
        )(*inputs)

    try:
        recon_p, ml_p = call(True)
    except Exception:
        # Fallback for jax versions without pipeline_mode / Buffered(1) support.
        recon_p, ml_p = call(False)

    recon = recon_p[:B, :d_out].reshape(B, n_joints, 3)
    mean = ml_p[:B, :latent_dim]
    logvar = ml_p[:B, latent_dim:2 * latent_dim]
    return recon, mean, logvar


# ----------------------------- parameter init --------------------------------

def init_params(key, *, n_joints, latent_dim, neurons):
    """Deterministic parameter init mimicking a fresh PyTorch module in eval mode."""
    d_in, d_out = 2 * n_joints, 3 * n_joints

    def linear(k, fan_in, fan_out, bias=True):
        # PyTorch Linear default: U(-1/sqrt(fan_in), 1/sqrt(fan_in)); stored as [in, out]
        bound = 1.0 / float(fan_in) ** 0.5
        kw, kb = jax.random.split(k)
        w = jax.random.uniform(kw, (fan_in, fan_out), jnp.float32, -bound, bound)
        b = (jax.random.uniform(kb, (1, fan_out), jnp.float32, -bound, bound)
             if bias else None)
        return w, b

    keys = jax.random.split(key, 16)
    enc_in_w, enc_in_b = linear(keys[0], d_in, neurons)

    lbad_ws = [linear(keys[1 + i], neurons, neurons, bias=False)[0] for i in range(8)]
    lbad_w = jnp.stack(lbad_ws)                               # [8, N, N]

    # BatchNorm1d fresh params in eval: gamma=1, beta=0, running_mean=0, running_var=1
    eps = 1e-5
    bn_scale = jnp.full((10, neurons), 1.0 / (1.0 + eps) ** 0.5, jnp.float32)
    bn_shift = jnp.zeros((10, neurons), jnp.float32)

    fc_mean_w, fc_mean_b = linear(keys[9], neurons, latent_dim)
    fc_logvar_w, fc_logvar_b = linear(keys[10], neurons, latent_dim)
    dec_in_w, dec_in_b = linear(keys[11], latent_dim, neurons)
    dec_out_w, dec_out_b = linear(keys[12], neurons, d_out)

    return dict(enc_in_w=enc_in_w, enc_in_b=enc_in_b,
                lbad_w=lbad_w, bn_scale=bn_scale, bn_shift=bn_shift,
                fc_mean_w=fc_mean_w, fc_mean_b=fc_mean_b,
                fc_logvar_w=fc_logvar_w, fc_logvar_b=fc_logvar_b,
                dec_in_w=dec_in_w, dec_in_b=dec_in_b,
                dec_out_w=dec_out_w, dec_out_b=dec_out_b)


# ----------------------------- pure-JAX reference ----------------------------

def _mish_ref(v):
    sp = jnp.where(v > 20.0, v, jnp.log1p(jnp.exp(jnp.minimum(v, 20.0))))
    return v * jnp.tanh(sp)


def _reference_forward(x_pose2d, p, *, n_joints, latent_dim, neurons):
    """Exact torch eval-mode semantics on the RAW (unfolded, unfused) parameters."""
    del latent_dim, neurons
    x = x_pose2d.reshape(-1, 2 * n_joints).astype(jnp.float32)

    def bn(v, i):
        return v * p["bn_scale"][i][None, :] + p["bn_shift"][i][None, :]

    def lbad(v, wi, bi):
        return _mish_ref(bn(v @ p["lbad_w"][wi], bi))

    def resblock(v, w0, b0):
        r = v
        h = lbad(v, w0, b0)
        h = lbad(h, w0 + 1, b0 + 1) + r
        r = h
        h = lbad(h, w0 + 2, b0 + 2)
        return lbad(h, w0 + 3, b0 + 3) + r

    h = _mish_ref(bn(x @ p["enc_in_w"] + p["enc_in_b"], 0))
    h = resblock(h, 0, 1)
    mean = h @ p["fc_mean_w"] + p["fc_mean_b"]
    logvar = jnp.minimum(h @ p["fc_logvar_w"] + p["fc_logvar_b"], 30.0)
    z = mean
    h = _mish_ref(bn(z @ p["dec_in_w"] + p["dec_in_b"], 5))
    h = resblock(h, 4, 6)
    recon = jnp.tanh(h @ p["dec_out_w"] + p["dec_out_b"])
    return recon.reshape(-1, n_joints, 3), mean, logvar


# ----------------------------- main -------------------------------------------

if __name__ == "__main__":
    N_JOINTS = 15
    LATENT_DIM = 16
    NEURONS = 128
    BATCH = 16

    key = jax.random.PRNGKey(0)
    k_x, k_p = jax.random.split(key)

    x = jax.random.normal(k_x, (BATCH, N_JOINTS, 2), jnp.float32)
    params = init_params(k_p, n_joints=N_JOINTS, latent_dim=LATENT_DIM, neurons=NEURONS)

    r_ref, m_ref, lv_ref = _reference_forward(
        x, params, n_joints=N_JOINTS, latent_dim=LATENT_DIM, neurons=NEURONS)

    kw = dict(n_joints=N_JOINTS, latent_dim=LATENT_DIM, neurons=NEURONS)

    # --- correctness anchor: f32 matmuls, exact reciprocal in Mish ---
    folded_f32 = fold_params(params, use_bf16=False, **kw)
    recon, mean, logvar = generator_forward(x, folded_f32, approx_recip=False, **kw)
    jax.block_until_ready((recon, mean, logvar))
    assert recon.shape == (BATCH, N_JOINTS, 3)
    assert mean.shape == (BATCH, LATENT_DIM) and logvar.shape == (BATCH, LATENT_DIM)
    assert jnp.allclose(recon, r_ref, atol=1e-4, rtol=1e-4)
    assert jnp.allclose(mean, m_ref, atol=1e-4, rtol=1e-4)
    assert jnp.allclose(logvar, lv_ref, atol=1e-4, rtol=1e-4)

    # --- fast path (recommended on v5e/v6e/v7x): bf16 weights on the MXU,
    #     f32 elementwise math, approximate EUP reciprocal in Mish ---
    folded_bf16 = fold_params(params, use_bf16=True, **kw)
    recon_b, mean_b, logvar_b = generator_forward(x, folded_bf16, approx_recip=True, **kw)
    jax.block_until_ready((recon_b, mean_b, logvar_b))
    assert jnp.allclose(recon_b, r_ref, atol=1e-1, rtol=1e-1)
    assert jnp.allclose(mean_b, m_ref, atol=1e-1, rtol=1e-1)
    assert jnp.allclose(logvar_b, lv_ref, atol=1e-1, rtol=1e-1)

    print("KERNEL_OK")
</pallas_src>

<mosaic_0001>
module attributes {stable_mosaic.version = 11 : i64} {
  func.func @_generator_kernel(%arg0: i32, %arg1: memref<16x128xf32, #tpu.memory_space<vmem>>, %arg2: memref<1x128xf32, #tpu.memory_space<vmem>>, %arg3: memref<128x128xf32, #tpu.memory_space<vmem>>, %arg4: memref<1x128xf32, #tpu.memory_space<vmem>>, %arg5: memref<8x128x128xf32, #tpu.memory_space<vmem>>, %arg6: memref<8x128xf32, #tpu.memory_space<vmem>>, %arg7: memref<128x128xf32, #tpu.memory_space<vmem>>, %arg8: memref<1x128xf32, #tpu.memory_space<vmem>>, %arg9: memref<128x128xf32, #tpu.memory_space<vmem>>, %arg10: memref<1x128xf32, #tpu.memory_space<vmem>>, %arg11: memref<128x128xf32, #tpu.memory_space<vmem>>, %arg12: memref<1x128xf32, #tpu.memory_space<vmem>>, %arg13: memref<16x128xf32, #tpu.memory_space<vmem>>, %arg14: memref<16x128xf32, #tpu.memory_space<vmem>>) attributes {dimension_semantics = [#tpu.dimension_semantics<parallel>], iteration_bounds = array<i64: 1>, scalar_prefetch = 0 : i64, scratch_operands = 0 : i64, tpu.core_type = #tpu.core_type<tc>, window_params = [{transform_indices = @transform_0, window_bounds = array<i64: 16, 128>}, {pipeline_mode = #tpu.pipeline_mode<synchronous>, transform_indices = @transform_1, window_bounds = array<i64: 1, 128>}, {pipeline_mode = #tpu.pipeline_mode<synchronous>, transform_indices = @transform_2, window_bounds = array<i64: 128, 128>}, {pipeline_mode = #tpu.pipeline_mode<synchronous>, transform_indices = @transform_3, window_bounds = array<i64: 1, 128>}, {pipeline_mode = #tpu.pipeline_mode<synchronous>, transform_indices = @transform_4, window_bounds = array<i64: 8, 128, 128>}, {pipeline_mode = #tpu.pipeline_mode<synchronous>, transform_indices = @transform_5, window_bounds = array<i64: 8, 128>}, {pipeline_mode = #tpu.pipeline_mode<synchronous>, transform_indices = @transform_6, window_bounds = array<i64: 128, 128>}, {pipeline_mode = #tpu.pipeline_mode<synchronous>, transform_indices = @transform_7, window_bounds = array<i64: 1, 128>}, {pipeline_mode = #tpu.pipeline_mode<synchronous>, transform_indices = @transform_8, window_bounds = array<i64: 128, 128>}, {pipeline_mode = #tpu.pipeline_mode<synchronous>, transform_indices = @transform_9, window_bounds = array<i64: 1, 128>}, {pipeline_mode = #tpu.pipeline_mode<synchronous>, transform_indices = @transform_10, window_bounds = array<i64: 128, 128>}, {pipeline_mode = #tpu.pipeline_mode<synchronous>, transform_indices = @transform_11, window_bounds = array<i64: 1, 128>}, {transform_indices = @transform_12, window_bounds = array<i64: 16, 128>}, {transform_indices = @transform_13, window_bounds = array<i64: 16, 128>}]} {
    %c0 = arith.constant 0 : index
    %c0_0 = arith.constant 0 : index
    %0 = vector.load %arg1[%c0, %c0_0] : memref<16x128xf32, #tpu.memory_space<vmem>>, vector<16x128xf32>
    %c0_1 = arith.constant 0 : index
    %c0_2 = arith.constant 0 : index
    %1 = vector.load %arg3[%c0_1, %c0_2] : memref<128x128xf32, #tpu.memory_space<vmem>>, vector<128x128xf32>
    %cst = arith.constant dense<0.000000e+00> : vector<16x128xf32>
    %2 = tpu.matmul %0, %1, %cst {dimension_numbers = #tpu.dot_dimension_numbers<[1], [0], [0], [1], [0, 0, 1, 1], [], []>} : vector<16x128xf32>, vector<128x128xf32>, vector<16x128xf32> -> vector<16x128xf32>
    %c0_3 = arith.constant 0 : index
    %c0_4 = arith.constant 0 : index
    %3 = vector.load %arg4[%c0_3, %c0_4] : memref<1x128xf32, #tpu.memory_space<vmem>>, vector<1x128xf32>
    %4 = vector.broadcast %3 : vector<1x128xf32> to vector<16x128xf32>
    %5 = arith.addf %2, %4 : vector<16x128xf32>
    %cst_5 = arith.constant 2.000000e+01 : f32
    %6 = vector.broadcast %cst_5 : f32 to vector<16x128xf32>
    %7 = arith.minimumf %5, %6 : vector<16x128xf32>
    %8 = math.exp %7 : vector<16x128xf32>
    %cst_6 = arith.constant 1.000000e+00 : f32
    %9 = vector.broadcast %cst_6 : f32 to vector<16x128xf32>
    %10 = arith.addf %9, %8 : vector<16x128xf32>
    %cst_7 = arith.constant 1.000000e+00 : f32
    %11 = vector.broadcast %cst_7 : f32 to vector<16x128xf32>
    %12 = arith.addf %11, %8 : vector<16x128xf32>
    %13 = arith.mulf %10, %12 : vector<16x128xf32>
    %cst_8 = arith.constant 1.000000e+00 : f32
    %14 = vector.broadcast %cst_8 : f32 to vector<16x128xf32>
    %15 = arith.subf %13, %14 : vector<16x128xf32>
    %cst_9 = arith.constant 1.000000e+00 : f32
    %16 = vector.broadcast %cst_9 : f32 to vector<16x128xf32>
    %17 = arith.addf %13, %16 : vector<16x128xf32>
    %18 = arith.divf %15, %17 : vector<16x128xf32>
    %cst_10 = arith.constant 2.000000e+01 : f32
    %19 = vector.broadcast %cst_10 : f32 to vector<16x128xf32>
    %20 = arith.cmpf ogt, %5, %19 : vector<16x128xf32>
    %21 = arith.mulf %5, %18 : vector<16x128xf32>
    %22 = arith.select %20, %5, %21 : vector<16x128xi1>, vector<16x128xf32>
    %c0_11 = arith.constant 0 : index
    %c0_12 = arith.constant 0 : index
    %c0_13 = arith.constant 0 : index
    %23 = vector.load %arg5[%c0_11, %c0_12, %c0_13] : memref<8x128x128xf32, #tpu.memory_space<vmem>>, vector<1x128x128xf32>
    %24 = vector.shape_cast %23 : vector<1x128x128xf32> to vector<128x128xf32>
    %cst_14 = arith.constant dense<0.000000e+00> : vector<16x128xf32>
    %25 = tpu.matmul %22, %24, %cst_14 {dimension_numbers = #tpu.dot_dimension_numbers<[1], [0], [0], [1], [0, 0, 1, 1], [], []>} : vector<16x128xf32>, vector<128x128xf32>, vector<16x128xf32> -> vector<16x128xf32>
    %c0_15 = arith.constant 0 : index
    %c0_16 = arith.constant 0 : index
    %26 = vector.load %arg6[%c0_15, %c0_16] : memref<8x128xf32, #tpu.memory_space<vmem>>, vector<1x128xf32>
    %27 = vector.shape_cast %26 : vector<1x128xf32> to vector<128xf32>
    %28 = vector.shape_cast %27 : vector<128xf32> to vector<1x128xf32>
    %29 = vector.broadcast %28 : vector<1x128xf32> to vector<16x128xf32>
    %30 = arith.addf %25, %29 : vector<16x128xf32>
    %cst_17 = arith.constant 2.000000e+01 : f32
    %31 = vector.broadcast %cst_17 : f32 to vector<16x128xf32>
    %32 = arith.minimumf %30, %31 : vector<16x128xf32>
    %33 = math.exp %32 : vector<16x128xf32>
    %cst_18 = arith.constant 1.000000e+00 : f32
    %34 = vector.broadcast %cst_18 : f32 to vector<16x128xf32>
    %35 = arith.addf %34, %33 : vector<16x128xf32>
    %cst_19 = arith.constant 1.000000e+00 : f32
    %36 = vector.broadcast %cst_19 : f32 to vector<16x128xf32>
    %37 = arith.addf %36, %33 : vector<16x128xf32>
    %38 = arith.mulf %35, %37 : vector<16x128xf32>
    %cst_20 = arith.constant 1.000000e+00 : f32
    %39 = vector.broadcast %cst_20 : f32 to vector<16x128xf32>
    %40 = arith.subf %38, %39 : vector<16x128xf32>
    %cst_21 = arith.constant 1.000000e+00 : f32
    %41 = vector.broadcast %cst_21 : f32 to vector<16x128xf32>
    %42 = arith.addf %38, %41 : vector<16x128xf32>
    %43 = arith.divf %40, %42 : vector<16x128xf32>
    %cst_22 = arith.constant 2.000000e+01 : f32
    %44 = vector.broadcast %cst_22 : f32 to vector<16x128xf32>
    %45 = arith.cmpf ogt, %30, %44 : vector<16x128xf32>
    %46 = arith.mulf %30, %43 : vector<16x128xf32>
    %47 = arith.select %45, %30, %46 : vector<16x128xi1>, vector<16x128xf32>
    %c1 = arith.constant 1 : index
    %c0_23 = arith.constant 0 : index
    %c0_24 = arith.constant 0 : index
    %48 = vector.load %arg5[%c1, %c0_23, %c0_24] : memref<8x128x128xf32, #tpu.memory_space<vmem>>, vector<1x128x128xf32>
    %49 = vector.shape_cast %48 : vector<1x128x128xf32> to vector<128x128xf32>
    %cst_25 = arith.constant dense<0.000000e+00> : vector<16x128xf32>
    %50 = tpu.matmul %47, %49, %cst_25 {dimension_numbers = #tpu.dot_dimension_numbers<[1], [0], [0], [1], [0, 0, 1, 1], [], []>} : vector<16x128xf32>, vector<128x128xf32>, vector<16x128xf32> -> vector<16x128xf32>
    %c1_26 = arith.constant 1 : index
    %c0_27 = arith.constant 0 : index
    %51 = vector.load %arg6[%c1_26, %c0_27] : memref<8x128xf32, #tpu.memory_space<vmem>>, vector<1x128xf32>
    %52 = vector.shape_cast %51 : vector<1x128xf32> to vector<128xf32>
    %53 = vector.shape_cast %52 : vector<128xf32> to vector<1x128xf32>
    %54 = vector.broadcast %53 : vector<1x128xf32> to vector<16x128xf32>
    %55 = arith.addf %50, %54 : vector<16x128xf32>
    %cst_28 = arith.constant 2.000000e+01 : f32
    %56 = vector.broadcast %cst_28 : f32 to vector<16x128xf32>
    %57 = arith.minimumf %55, %56 : vector<16x128xf32>
    %58 = math.exp %57 : vector<16x128xf32>
    %cst_29 = arith.constant 1.000000e+00 : f32
    %59 = vector.broadcast %cst_29 : f32 to vector<16x128xf32>
    %60 = arith.addf %59, %58 : vector<16x128xf32>
    %cst_30 = arith.constant 1.000000e+00 : f32
    %61 = vector.broadcast %cst_30 : f32 to vector<16x128xf32>
    %62 = arith.addf %61, %58 : vector<16x128xf32>
    %63 = arith.mulf %60, %62 : vector<16x128xf32>
    %cst_31 = arith.constant 1.000000e+00 : f32
    %64 = vector.broadcast %cst_31 : f32 to vector<16x128xf32>
    %65 = arith.subf %63, %64 : vector<16x128xf32>
    %cst_32 = arith.constant 1.000000e+00 : f32
    %66 = vector.broadcast %cst_32 : f32 to vector<16x128xf32>
    %67 = arith.addf %63, %66 : vector<16x128xf32>
    %68 = arith.divf %65, %67 : vector<16x128xf32>
    %cst_33 = arith.constant 2.000000e+01 : f32
    %69 = vector.broadcast %cst_33 : f32 to vector<16x128xf32>
    %70 = arith.cmpf ogt, %55, %69 : vector<16x128xf32>
    %71 = arith.mulf %55, %68 : vector<16x128xf32>
    %72 = arith.select %70, %55, %71 : vector<16x128xi1>, vector<16x128xf32>
    %73 = arith.addf %72, %22 : vector<16x128xf32>
    %c2 = arith.constant 2 : index
    %c0_34 = arith.constant 0 : index
    %c0_35 = arith.constant 0 : index
    %74 = vector.load %arg5[%c2, %c0_34, %c0_35] : memref<8x128x128xf32, #tpu.memory_space<vmem>>, vector<1x128x128xf32>
    %75 = vector.shape_cast %74 : vector<1x128x128xf32> to vector<128x128xf32>
    %cst_36 = arith.constant dense<0.000000e+00> : vector<16x128xf32>
    %76 = tpu.matmul %73, %75, %cst_36 {dimension_numbers = #tpu.dot_dimension_numbers<[1], [0], [0], [1], [0, 0, 1, 1], [], []>} : vector<16x128xf32>, vector<128x128xf32>, vector<16x128xf32> -> vector<16x128xf32>
    %c2_37 = arith.constant 2 : index
    %c0_38 = arith.constant 0 : index
    %77 = vector.load %arg6[%c2_37, %c0_38] : memref<8x128xf32, #tpu.memory_space<vmem>>, vector<1x128xf32>
    %78 = vector.shape_cast %77 : vector<1x128xf32> to vector<128xf32>
    %79 = vector.shape_cast %78 : vector<128xf32> to vector<1x128xf32>
    %80 = vector.broadcast %79 : vector<1x128xf32> to vector<16x128xf32>
    %81 = arith.addf %76, %80 : vector<16x128xf32>
    %cst_39 = arith.constant 2.000000e+01 : f32
    %82 = vector.broadcast %cst_39 : f32 to vector<16x128xf32>
    %83 = arith.minimumf %81, %82 : vector<16x128xf32>
    %84 = math.exp %83 : vector<16x128xf32>
    %cst_40 = arith.constant 1.000000e+00 : f32
    %85 = vector.broadcast %cst_40 : f32 to vector<16x128xf32>
    %86 = arith.addf %85, %84 : vector<16x128xf32>
    %cst_41 = arith.constant 1.000000e+00 : f32
    %87 = vector.broadcast %cst_41 : f32 to vector<16x128xf32>
    %88 = arith.addf %87, %84 : vector<16x128xf32>
    %89 = arith.mulf %86, %88 : vector<16x128xf32>
    %cst_42 = arith.constant 1.000000e+00 : f32
    %90 = vector.broadcast %cst_42 : f32 to vector<16x128xf32>
    %91 = arith.subf %89, %90 : vector<16x128xf32>
    %cst_43 = arith.constant 1.000000e+00 : f32
    %92 = vector.broadcast %cst_43 : f32 to vector<16x128xf32>
    %93 = arith.addf %89, %92 : vector<16x128xf32>
    %94 = arith.divf %91, %93 : vector<16x128xf32>
    %cst_44 = arith.constant 2.000000e+01 : f32
    %95 = vector.broadcast %cst_44 : f32 to vector<16x128xf32>
    %96 = arith.cmpf ogt, %81, %95 : vector<16x128xf32>
    %97 = arith.mulf %81, %94 : vector<16x128xf32>
    %98 = arith.select %96, %81, %97 : vector<16x128xi1>, vector<16x128xf32>
    %c3 = arith.constant 3 : index
    %c0_45 = arith.constant 0 : index
    %c0_46 = arith.constant 0 : index
    %99 = vector.load %arg5[%c3, %c0_45, %c0_46] : memref<8x128x128xf32, #tpu.memory_space<vmem>>, vector<1x128x128xf32>
    %100 = vector.shape_cast %99 : vector<1x128x128xf32> to vector<128x128xf32>
    %cst_47 = arith.constant dense<0.000000e+00> : vector<16x128xf32>
    %101 = tpu.matmul %98, %100, %cst_47 {dimension_numbers = #tpu.dot_dimension_numbers<[1], [0], [0], [1], [0, 0, 1, 1], [], []>} : vector<16x128xf32>, vector<128x128xf32>, vector<16x128xf32> -> vector<16x128xf32>
    %c3_48 = arith.constant 3 : index
    %c0_49 = arith.constant 0 : index
    %102 = vector.load %arg6[%c3_48, %c0_49] : memref<8x128xf32, #tpu.memory_space<vmem>>, vector<1x128xf32>
    %103 = vector.shape_cast %102 : vector<1x128xf32> to vector<128xf32>
    %104 = vector.shape_cast %103 : vector<128xf32> to vector<1x128xf32>
    %105 = vector.broadcast %104 : vector<1x128xf32> to vector<16x128xf32>
    %106 = arith.addf %101, %105 : vector<16x128xf32>
    %cst_50 = arith.constant 2.000000e+01 : f32
    %107 = vector.broadcast %cst_50 : f32 to vector<16x128xf32>
    %108 = arith.minimumf %106, %107 : vector<16x128xf32>
    %109 = math.exp %108 : vector<16x128xf32>
    %cst_51 = arith.constant 1.000000e+00 : f32
    %110 = vector.broadcast %cst_51 : f32 to vector<16x128xf32>
    %111 = arith.addf %110, %109 : vector<16x128xf32>
    %cst_52 = arith.constant 1.000000e+00 : f32
    %112 = vector.broadcast %cst_52 : f32 to vector<16x128xf32>
    %113 = arith.addf %112, %109 : vector<16x128xf32>
    %114 = arith.mulf %111, %113 : vector<16x128xf32>
    %cst_53 = arith.constant 1.000000e+00 : f32
    %115 = vector.broadcast %cst_53 : f32 to vector<16x128xf32>
    %116 = arith.subf %114, %115 : vector<16x128xf32>
    %cst_54 = arith.constant 1.000000e+00 : f32
    %117 = vector.broadcast %cst_54 : f32 to vector<16x128xf32>
    %118 = arith.addf %114, %117 : vector<16x128xf32>
    %119 = arith.divf %116, %118 : vector<16x128xf32>
    %cst_55 = arith.constant 2.000000e+01 : f32
    %120 = vector.broadcast %cst_55 : f32 to vector<16x128xf32>
    %121 = arith.cmpf ogt, %106, %120 : vector<16x128xf32>
    %122 = arith.mulf %106, %119 : vector<16x128xf32>
    %123 = arith.select %121, %106, %122 : vector<16x128xi1>, vector<16x128xf32>
    %124 = arith.addf %123, %73 : vector<16x128xf32>
    %c0_56 = arith.constant 0 : index
    %c0_57 = arith.constant 0 : index
    %125 = vector.load %arg7[%c0_56, %c0_57] : memref<128x128xf32, #tpu.memory_space<vmem>>, vector<128x128xf32>
    %cst_58 = arith.constant dense<0.000000e+00> : vector<16x128xf32>
    %126 = tpu.matmul %124, %125, %cst_58 {dimension_numbers = #tpu.dot_dimension_numbers<[1], [0], [0], [1], [0, 0, 1, 1], [], []>} : vector<16x128xf32>, vector<128x128xf32>, vector<16x128xf32> -> vector<16x128xf32>
    %c0_59 = arith.constant 0 : index
    %c0_60 = arith.constant 0 : index
    %127 = vector.load %arg8[%c0_59, %c0_60] : memref<1x128xf32, #tpu.memory_space<vmem>>, vector<1x128xf32>
    %128 = vector.broadcast %127 : vector<1x128xf32> to vector<16x128xf32>
    %129 = arith.addf %126, %128 : vector<16x128xf32>
    %c0_61 = arith.constant 0 : index
    %c0_62 = arith.constant 0 : index
    %130 = vector.load %arg2[%c0_61, %c0_62] : memref<1x128xf32, #tpu.memory_space<vmem>>, vector<1x128xf32>
    %131 = vector.broadcast %130 : vector<1x128xf32> to vector<16x128xf32>
    %132 = arith.minimumf %129, %131 : vector<16x128xf32>
    %c0_63 = arith.constant 0 : index
    %c0_64 = arith.constant 0 : index
    %133 = vector.load %arg14[%c0_63, %c0_64] : memref<16x128xf32, #tpu.memory_space<vmem>>, vector<16x128xf32>
    tpu.vector_store %arg14[%c0_63, %c0_64], %132 {strides = array<i32>} : memref<16x128xf32, #tpu.memory_space<vmem>>, vector<16x128xf32>,
    %c0_65 = arith.constant 0 : index
    %c0_66 = arith.constant 0 : index
    %134 = vector.load %arg9[%c0_65, %c0_66] : memref<128x128xf32, #tpu.memory_space<vmem>>, vector<128x128xf32>
    %cst_67 = arith.constant dense<0.000000e+00> : vector<16x128xf32>
    %135 = tpu.matmul %129, %134, %cst_67 {dimension_numbers = #tpu.dot_dimension_numbers<[1], [0], [0], [1], [0, 0, 1, 1], [], []>} : vector<16x128xf32>, vector<128x128xf32>, vector<16x128xf32> -> vector<16x128xf32>
    %c0_68 = arith.constant 0 : index
    %c0_69 = arith.constant 0 : index
    %136 = vector.load %arg10[%c0_68, %c0_69] : memref<1x128xf32, #tpu.memory_space<vmem>>, vector<1x128xf32>
    %137 = vector.broadcast %136 : vector<1x128xf32> to vector<16x128xf32>
    %138 = arith.addf %135, %137 : vector<16x128xf32>
    %cst_70 = arith.constant 2.000000e+01 : f32
    %139 = vector.broadcast %cst_70 : f32 to vector<16x128xf32>
    %140 = arith.minimumf %138, %139 : vector<16x128xf32>
    %141 = math.exp %140 : vector<16x128xf32>
    %cst_71 = arith.constant 1.000000e+00 : f32
    %142 = vector.broadcast %cst_71 : f32 to vector<16x128xf32>
    %143 = arith.addf %142, %141 : vector<16x128xf32>
    %cst_72 = arith.constant 1.000000e+00 : f32
    %144 = vector.broadcast %cst_72 : f32 to vector<16x128xf32>
    %145 = arith.addf %144, %141 : vector<16x128xf32>
    %146 = arith.mulf %143, %145 : vector<16x128xf32>
    %cst_73 = arith.constant 1.000000e+00 : f32
    %147 = vector.broadcast %cst_73 : f32 to vector<16x128xf32>
    %148 = arith.subf %146, %147 : vector<16x128xf32>
    %cst_74 = arith.constant 1.000000e+00 : f32
    %149 = vector.broadcast %cst_74 : f32 to vector<16x128xf32>
    %150 = arith.addf %146, %149 : vector<16x128xf32>
    %151 = arith.divf %148, %150 : vector<16x128xf32>
    %cst_75 = arith.constant 2.000000e+01 : f32
    %152 = vector.broadcast %cst_75 : f32 to vector<16x128xf32>
    %153 = arith.cmpf ogt, %138, %152 : vector<16x128xf32>
    %154 = arith.mulf %138, %151 : vector<16x128xf32>
    %155 = arith.select %153, %138, %154 : vector<16x128xi1>, vector<16x128xf32>
    %c4 = arith.constant 4 : index
    %c0_76 = arith.constant 0 : index
    %c0_77 = arith.constant 0 : index
    %156 = vector.load %arg5[%c4, %c0_76, %c0_77] : memref<8x128x128xf32, #tpu.memory_space<vmem>>, vector<1x128x128xf32>
    %157 = vector.shape_cast %156 : vector<1x128x128xf32> to vector<128x128xf32>
    %cst_78 = arith.constant dense<0.000000e+00> : vector<16x128xf32>
    %158 = tpu.matmul %155, %157, %cst_78 {dimension_numbers = #tpu.dot_dimension_numbers<[1], [0], [0], [1], [0, 0, 1, 1], [], []>} : vector<16x128xf32>, vector<128x128xf32>, vector<16x128xf32> -> vector<16x128xf32>
    %c4_79 = arith.constant 4 : index
    %c0_80 = arith.constant 0 : index
    %159 = vector.load %arg6[%c4_79, %c0_80] : memref<8x128xf32, #tpu.memory_space<vmem>>, vector<1x128xf32>
    %160 = vector.shape_cast %159 : vector<1x128xf32> to vector<128xf32>
    %161 = vector.shape_cast %160 : vector<128xf32> to vector<1x128xf32>
    %162 = vector.broadcast %161 : vector<1x128xf32> to vector<16x128xf32>
    %163 = arith.addf %158, %162 : vector<16x128xf32>
    %cst_81 = arith.constant 2.000000e+01 : f32
    %164 = vector.broadcast %cst_81 : f32 to vector<16x128xf32>
    %165 = arith.minimumf %163, %164 : vector<16x128xf32>
    %166 = math.exp %165 : vector<16x128xf32>
    %cst_82 = arith.constant 1.000000e+00 : f32
    %167 = vector.broadcast %cst_82 : f32 to vector<16x128xf32>
    %168 = arith.addf %167, %166 : vector<16x128xf32>
    %cst_83 = arith.constant 1.000000e+00 : f32
    %169 = vector.broadcast %cst_83 : f32 to vector<16x128xf32>
    %170 = arith.addf %169, %166 : vector<16x128xf32>
    %171 = arith.mulf %168, %170 : vector<16x128xf32>
    %cst_84 = arith.constant 1.000000e+00 : f32
    %172 = vector.broadcast %cst_84 : f32 to vector<16x128xf32>
    %173 = arith.subf %171, %172 : vector<16x128xf32>
    %cst_85 = arith.constant 1.000000e+00 : f32
    %174 = vector.broadcast %cst_85 : f32 to vector<16x128xf32>
    %175 = arith.addf %171, %174 : vector<16x128xf32>
    %176 = arith.divf %173, %175 : vector<16x128xf32>
    %cst_86 = arith.constant 2.000000e+01 : f32
    %177 = vector.broadcast %cst_86 : f32 to vector<16x128xf32>
    %178 = arith.cmpf ogt, %163, %177 : vector<16x128xf32>
    %179 = arith.mulf %163, %176 : vector<16x128xf32>
    %180 = arith.select %178, %163, %179 : vector<16x128xi1>, vector<16x128xf32>
    %c5 = arith.constant 5 : index
    %c0_87 = arith.constant 0 : index
    %c0_88 = arith.constant 0 : index
    %181 = vector.load %arg5[%c5, %c0_87, %c0_88] : memref<8x128x128xf32, #tpu.memory_space<vmem>>, vector<1x128x128xf32>
    %182 = vector.shape_cast %181 : vector<1x128x128xf32> to vector<128x128xf32>
    %cst_89 = arith.constant dense<0.000000e+00> : vector<16x128xf32>
    %183 = tpu.matmul %180, %182, %cst_89 {dimension_numbers = #tpu.dot_dimension_numbers<[1], [0], [0], [1], [0, 0, 1, 1], [], []>} : vector<16x128xf32>, vector<128x128xf32>, vector<16x128xf32> -> vector<16x128xf32>
    %c5_90 = arith.constant 5 : index
    %c0_91 = arith.constant 0 : index
    %184 = vector.load %arg6[%c5_90, %c0_91] : memref<8x128xf32, #tpu.memory_space<vmem>>, vector<1x128xf32>
    %185 = vector.shape_cast %184 : vector<1x128xf32> to vector<128xf32>
    %186 = vector.shape_cast %185 : vector<128xf32> to vector<1x128xf32>
    %187 = vector.broadcast %186 : vector<1x128xf32> to vector<16x128xf32>
    %188 = arith.addf %183, %187 : vector<16x128xf32>
    %cst_92 = arith.constant 2.000000e+01 : f32
    %189 = vector.broadcast %cst_92 : f32 to vector<16x128xf32>
    %190 = arith.minimumf %188, %189 : vector<16x128xf32>
    %191 = math.exp %190 : vector<16x128xf32>
    %cst_93 = arith.constant 1.000000e+00 : f32
    %192 = vector.broadcast %cst_93 : f32 to vector<16x128xf32>
    %193 = arith.addf %192, %191 : vector<16x128xf32>
    %cst_94 = arith.constant 1.000000e+00 : f32
    %194 = vector.broadcast %cst_94 : f32 to vector<16x128xf32>
    %195 = arith.addf %194, %191 : vector<16x128xf32>
    %196 = arith.mulf %193, %195 : vector<16x128xf32>
    %cst_95 = arith.constant 1.000000e+00 : f32
    %197 = vector.broadcast %cst_95 : f32 to vector<16x128xf32>
    %198 = arith.subf %196, %197 : vector<16x128xf32>
    %cst_96 = arith.constant 1.000000e+00 : f32
    %199 = vector.broadcast %cst_96 : f32 to vector<16x128xf32>
    %200 = arith.addf %196, %199 : vector<16x128xf32>
    %201 = arith.divf %198, %200 : vector<16x128xf32>
    %cst_97 = arith.constant 2.000000e+01 : f32
    %202 = vector.broadcast %cst_97 : f32 to vector<16x128xf32>
    %203 = arith.cmpf ogt, %188, %202 : vector<16x128xf32>
    %204 = arith.mulf %188, %201 : vector<16x128xf32>
    %205 = arith.select %203, %188, %204 : vector<16x128xi1>, vector<16x128xf32>
    %206 = arith.addf %205, %155 : vector<16x128xf32>
    %c6 = arith.constant 6 : index
    %c0_98 = arith.constant 0 : index
    %c0_99 = arith.constant 0 : index
    %207 = vector.load %arg5[%c6, %c0_98, %c0_99] : memref<8x128x128xf32, #tpu.memory_space<vmem>>, vector<1x128x128xf32>
    %208 = vector.shape_cast %207 : vector<1x128x128xf32> to vector<128x128xf32>
    %cst_100 = arith.constant dense<0.000000e+00> : vector<16x128xf32>
    %209 = tpu.matmul %206, %208, %cst_100 {dimension_numbers = #tpu.dot_dimension_numbers<[1], [0], [0], [1], [0, 0, 1, 1], [], []>} : vector<16x128xf32>, vector<128x128xf32>, vector<16x128xf32> -> vector<16x128xf32>
    %c6_101 = arith.constant 6 : index
    %c0_102 = arith.constant 0 : index
    %210 = vector.load %arg6[%c6_101, %c0_102] : memref<8x128xf32, #tpu.memory_space<vmem>>, vector<1x128xf32>
    %211 = vector.shape_cast %210 : vector<1x128xf32> to vector<128xf32>
    %212 = vector.shape_cast %211 : vector<128xf32> to vector<1x128xf32>
    %213 = vector.broadcast %212 : vector<1x128xf32> to vector<16x128xf32>
    %214 = arith.addf %209, %213 : vector<16x128xf32>
    %cst_103 = arith.constant 2.000000e+01 : f32
    %215 = vector.broadcast %cst_103 : f32 to vector<16x128xf32>
    %216 = arith.minimumf %214, %215 : vector<16x128xf32>
    %217 = math.exp %216 : vector<16x128xf32>
    %cst_104 = arith.constant 1.000000e+00 : f32
    %218 = vector.broadcast %cst_104 : f32 to vector<16x128xf32>
    %219 = arith.addf %218, %217 : vector<16x128xf32>
    %cst_105 = arith.constant 1.000000e+00 : f32
    %220 = vector.broadcast %cst_105 : f32 to vector<16x128xf32>
    %221 = arith.addf %220, %217 : vector<16x128xf32>
    %222 = arith.mulf %219, %221 : vector<16x128xf32>
    %cst_106 = arith.constant 1.000000e+00 : f32
    %223 = vector.broadcast %cst_106 : f32 to vector<16x128xf32>
    %224 = arith.subf %222, %223 : vector<16x128xf32>
    %cst_107 = arith.constant 1.000000e+00 : f32
    %225 = vector.broadcast %cst_107 : f32 to vector<16x128xf32>
    %226 = arith.addf %222, %225 : vector<16x128xf32>
    %227 = arith.divf %224, %226 : vector<16x128xf32>
    %cst_108 = arith.constant 2.000000e+01 : f32
    %228 = vector.broadcast %cst_108 : f32 to vector<16x128xf32>
    %229 = arith.cmpf ogt, %214, %228 : vector<16x128xf32>
    %230 = arith.mulf %214, %227 : vector<16x128xf32>
    %231 = arith.select %229, %214, %230 : vector<16x128xi1>, vector<16x128xf32>
    %c7 = arith.constant 7 : index
    %c0_109 = arith.constant 0 : index
    %c0_110 = arith.constant 0 : index
    %232 = vector.load %arg5[%c7, %c0_109, %c0_110] : memref<8x128x128xf32, #tpu.memory_space<vmem>>, vector<1x128x128xf32>
    %233 = vector.shape_cast %232 : vector<1x128x128xf32> to vector<128x128xf32>
    %cst_111 = arith.constant dense<0.000000e+00> : vector<16x128xf32>
    %234 = tpu.matmul %231, %233, %cst_111 {dimension_numbers = #tpu.dot_dimension_numbers<[1], [0], [0], [1], [0, 0, 1, 1], [], []>} : vector<16x128xf32>, vector<128x128xf32>, vector<16x128xf32> -> vector<16x128xf32>
    %c7_112 = arith.constant 7 : index
    %c0_113 = arith.constant 0 : index
    %235 = vector.load %arg6[%c7_112, %c0_113] : memref<8x128xf32, #tpu.memory_space<vmem>>, vector<1x128xf32>
    %236 = vector.shape_cast %235 : vector<1x128xf32> to vector<128xf32>
    %237 = vector.shape_cast %236 : vector<128xf32> to vector<1x128xf32>
    %238 = vector.broadcast %237 : vector<1x128xf32> to vector<16x128xf32>
    %239 = arith.addf %234, %238 : vector<16x128xf32>
    %cst_114 = arith.constant 2.000000e+01 : f32
    %240 = vector.broadcast %cst_114 : f32 to vector<16x128xf32>
    %241 = arith.minimumf %239, %240 : vector<16x128xf32>
    %242 = math.exp %241 : vector<16x128xf32>
    %cst_115 = arith.constant 1.000000e+00 : f32
    %243 = vector.broadcast %cst_115 : f32 to vector<16x128xf32>
    %244 = arith.addf %243, %242 : vector<16x128xf32>
    %cst_116 = arith.constant 1.000000e+00 : f32
    %245 = vector.broadcast %cst_116 : f32 to vector<16x128xf32>
    %246 = arith.addf %245, %242 : vector<16x128xf32>
    %247 = arith.mulf %244, %246 : vector<16x128xf32>
    %cst_117 = arith.constant 1.000000e+00 : f32
    %248 = vector.broadcast %cst_117 : f32 to vector<16x128xf32>
    %249 = arith.subf %247, %248 : vector<16x128xf32>
    %cst_118 = arith.constant 1.000000e+00 : f32
    %250 = vector.broadcast %cst_118 : f32 to vector<16x128xf32>
    %251 = arith.addf %247, %250 : vector<16x128xf32>
    %252 = arith.divf %249, %251 : vector<16x128xf32>
    %cst_119 = arith.constant 2.000000e+01 : f32
    %253 = vector.broadcast %cst_119 : f32 to vector<16x128xf32>
    %254 = arith.cmpf ogt, %239, %253 : vector<16x128xf32>
    %255 = arith.mulf %239, %252 : vector<16x128xf32>
    %256 = arith.select %254, %239, %255 : vector<16x128xi1>, vector<16x128xf32>
    %257 = arith.addf %256, %206 : vector<16x128xf32>
    %c0_120 = arith.constant 0 : index
    %c0_121 = arith.constant 0 : index
    %258 = vector.load %arg11[%c0_120, %c0_121] : memref<128x128xf32, #tpu.memory_space<vmem>>, vector<128x128xf32>
    %cst_122 = arith.constant dense<0.000000e+00> : vector<16x128xf32>
    %259 = tpu.matmul %257, %258, %cst_122 {dimension_numbers = #tpu.dot_dimension_numbers<[1], [0], [0], [1], [0, 0, 1, 1], [], []>} : vector<16x128xf32>, vector<128x128xf32>, vector<16x128xf32> -> vector<16x128xf32>
    %c0_123 = arith.constant 0 : index
    %c0_124 = arith.constant 0 : index
    %260 = vector.load %arg12[%c0_123, %c0_124] : memref<1x128xf32, #tpu.memory_space<vmem>>, vector<1x128xf32>
    %261 = vector.broadcast %260 : vector<1x128xf32> to vector<16x128xf32>
    %262 = arith.addf %259, %261 : vector<16x128xf32>
    %263 = math.tanh %262 : vector<16x128xf32>
    %c0_125 = arith.constant 0 : index
    %c0_126 = arith.constant 0 : index
    %264 = vector.load %arg13[%c0_125, %c0_126] : memref<16x128xf32, #tpu.memory_space<vmem>>, vector<16x128xf32>
    tpu.vector_store %arg13[%c0_125, %c0_126], %263 {strides = array<i32>} : memref<16x128xf32, #tpu.memory_space<vmem>>, vector<16x128xf32>,
    return
  }
  func.func @transform_0(%arg0: i32) -> (i32, i32) {
    %c0_i32 = arith.constant 0 : i32
    %c0_i32_0 = arith.constant 0 : i32
    return %arg0, %c0_i32 : i32, i32
  }
  func.func @transform_1(%arg0: i32) -> (i32, i32) {
    %c0_i32 = arith.constant 0 : i32
    %c0_i32_0 = arith.constant 0 : i32
    %c0_i32_1 = arith.constant 0 : i32
    return %c0_i32, %c0_i32_0 : i32, i32
  }
  func.func @transform_2(%arg0: i32) -> (i32, i32) {
    %c0_i32 = arith.constant 0 : i32
    %c0_i32_0 = arith.constant 0 : i32
    %c0_i32_1 = arith.constant 0 : i32
    return %c0_i32, %c0_i32_0 : i32, i32
  }
  func.func @transform_3(%arg0: i32) -> (i32, i32) {
    %c0_i32 = arith.constant 0 : i32
    %c0_i32_0 = arith.constant 0 : i32
    %c0_i32_1 = arith.constant 0 : i32
    return %c0_i32, %c0_i32_0 : i32, i32
  }
  func.func @transform_4(%arg0: i32) -> (i32, i32, i32) {
    %c0_i32 = arith.constant 0 : i32
    %c0_i32_0 = arith.constant 0 : i32
    %c0_i32_1 = arith.constant 0 : i32
    %c0_i32_2 = arith.constant 0 : i32
    return %c0_i32, %c0_i32_0, %c0_i32_1 : i32, i32, i32
  }
  func.func @transform_5(%arg0: i32) -> (i32, i32) {
    %c0_i32 = arith.constant 0 : i32
    %c0_i32_0 = arith.constant 0 : i32
    %c0_i32_1 = arith.constant 0 : i32
    return %c0_i32, %c0_i32_0 : i32, i32
  }
  func.func @transform_6(%arg0: i32) -> (i32, i32) {
    %c0_i32 = arith.constant 0 : i32
    %c0_i32_0 = arith.constant 0 : i32
    %c0_i32_1 = arith.constant 0 : i32
    return %c0_i32, %c0_i32_0 : i32, i32
  }
  func.func @transform_7(%arg0: i32) -> (i32, i32) {
    %c0_i32 = arith.constant 0 : i32
    %c0_i32_0 = arith.constant 0 : i32
    %c0_i32_1 = arith.constant 0 : i32
    return %c0_i32, %c0_i32_0 : i32, i32
  }
  func.func @transform_8(%arg0: i32) -> (i32, i32) {
    %c0_i32 = arith.constant 0 : i32
    %c0_i32_0 = arith.constant 0 : i32
    %c0_i32_1 = arith.constant 0 : i32
    return %c0_i32, %c0_i32_0 : i32, i32
  }
  func.func @transform_9(%arg0: i32) -> (i32, i32) {
    %c0_i32 = arith.constant 0 : i32
    %c0_i32_0 = arith.constant 0 : i32
    %c0_i32_1 = arith.constant 0 : i32
    return %c0_i32, %c0_i32_0 : i32, i32
  }
  func.func @transform_10(%arg0: i32) -> (i32, i32) {
    %c0_i32 = arith.constant 0 : i32
    %c0_i32_0 = arith.constant 0 : i32
    %c0_i32_1 = arith.constant 0 : i32
    return %c0_i32, %c0_i32_0 : i32, i32
  }
  func.func @transform_11(%arg0: i32) -> (i32, i32) {
    %c0_i32 = arith.constant 0 : i32
    %c0_i32_0 = arith.constant 0 : i32
    %c0_i32_1 = arith.constant 0 : i32
    return %c0_i32, %c0_i32_0 : i32, i32
  }
  func.func @transform_12(%arg0: i32) -> (i32, i32) {
    %c0_i32 = arith.constant 0 : i32
    %c0_i32_0 = arith.constant 0 : i32
    return %arg0, %c0_i32 : i32, i32
  }
  func.func @transform_13(%arg0: i32) -> (i32, i32) {
    %c0_i32 = arith.constant 0 : i32
    %c0_i32_0 = arith.constant 0 : i32
    return %arg0, %c0_i32 : i32, i32
  }
}

module attributes {stable_mosaic.version = 11 : i64} {
  func.func @_generator_kernel(%arg0: i32, %arg1: memref<16x128xf32, #tpu.memory_space<vmem>>, %arg2: memref<1x128xf32, #tpu.memory_space<vmem>>, %arg3: memref<128x128xf32, #tpu.memory_space<vmem>>, %arg4: memref<1x128xf32, #tpu.memory_space<vmem>>, %arg5: memref<8x128x128xf32, #tpu.memory_space<vmem>>, %arg6: memref<8x128xf32, #tpu.memory_space<vmem>>, %arg7: memref<128x128xf32, #tpu.memory_space<vmem>>, %arg8: memref<1x128xf32, #tpu.memory_space<vmem>>, %arg9: memref<128x128xf32, #tpu.memory_space<vmem>>, %arg10: memref<1x128xf32, #tpu.memory_space<vmem>>, %arg11: memref<128x128xf32, #tpu.memory_space<vmem>>, %arg12: memref<1x128xf32, #tpu.memory_space<vmem>>, %arg13: memref<16x128xf32, #tpu.memory_space<vmem>>, %arg14: memref<16x128xf32, #tpu.memory_space<vmem>>) attributes {dimension_semantics = [#tpu.dimension_semantics<parallel>], iteration_bounds = array<i64: 1>, scalar_prefetch = 0 : i64, scratch_operands = 0 : i64, tpu.core_type = #tpu.core_type<tc>, window_params = [{transform_indices = @transform_0, window_bounds = array<i64: 16, 128>}, {pipeline_mode = #tpu.pipeline_mode<synchronous>, transform_indices = @transform_1, window_bounds = array<i64: 1, 128>}, {pipeline_mode = #tpu.pipeline_mode<synchronous>, transform_indices = @transform_2, window_bounds = array<i64: 128, 128>}, {pipeline_mode = #tpu.pipeline_mode<synchronous>, transform_indices = @transform_3, window_bounds = array<i64: 1, 128>}, {pipeline_mode = #tpu.pipeline_mode<synchronous>, transform_indices = @transform_4, window_bounds = array<i64: 8, 128, 128>}, {pipeline_mode = #tpu.pipeline_mode<synchronous>, transform_indices = @transform_5, window_bounds = array<i64: 8, 128>}, {pipeline_mode = #tpu.pipeline_mode<synchronous>, transform_indices = @transform_6, window_bounds = array<i64: 128, 128>}, {pipeline_mode = #tpu.pipeline_mode<synchronous>, transform_indices = @transform_7, window_bounds = array<i64: 1, 128>}, {pipeline_mode = #tpu.pipeline_mode<synchronous>, transform_indices = @transform_8, window_bounds = array<i64: 128, 128>}, {pipeline_mode = #tpu.pipeline_mode<synchronous>, transform_indices = @transform_9, window_bounds = array<i64: 1, 128>}, {pipeline_mode = #tpu.pipeline_mode<synchronous>, transform_indices = @transform_10, window_bounds = array<i64: 128, 128>}, {pipeline_mode = #tpu.pipeline_mode<synchronous>, transform_indices = @transform_11, window_bounds = array<i64: 1, 128>}, {transform_indices = @transform_12, window_bounds = array<i64: 16, 128>}, {transform_indices = @transform_13, window_bounds = array<i64: 16, 128>}]} {
    %c0 = arith.constant 0 : index
    %c0_0 = arith.constant 0 : index
    %0 = vector.load %arg1[%c0, %c0_0] : memref<16x128xf32, #tpu.memory_space<vmem>>, vector<16x128xf32>
    %c0_1 = arith.constant 0 : index
    %c0_2 = arith.constant 0 : index
    %1 = vector.load %arg3[%c0_1, %c0_2] : memref<128x128xf32, #tpu.memory_space<vmem>>, vector<128x128xf32>
    %cst = arith.constant dense<0.000000e+00> : vector<16x128xf32>
    %2 = tpu.matmul %0, %1, %cst {dimension_numbers = #tpu.dot_dimension_numbers<[1], [0], [0], [1], [0, 0, 1, 1], [], []>} : vector<16x128xf32>, vector<128x128xf32>, vector<16x128xf32> -> vector<16x128xf32>
    %c0_3 = arith.constant 0 : index
    %c0_4 = arith.constant 0 : index
    %3 = vector.load %arg4[%c0_3, %c0_4] : memref<1x128xf32, #tpu.memory_space<vmem>>, vector<1x128xf32>
    %4 = vector.broadcast %3 : vector<1x128xf32> to vector<16x128xf32>
    %5 = arith.addf %2, %4 : vector<16x128xf32>
    %cst_5 = arith.constant 2.000000e+01 : f32
    %6 = vector.broadcast %cst_5 : f32 to vector<16x128xf32>
    %7 = arith.minimumf %5, %6 : vector<16x128xf32>
    %8 = math.exp %7 : vector<16x128xf32>
    %cst_6 = arith.constant 1.000000e+00 : f32
    %9 = vector.broadcast %cst_6 : f32 to vector<16x128xf32>
    %10 = arith.addf %9, %8 : vector<16x128xf32>
    %cst_7 = arith.constant 1.000000e+00 : f32
    %11 = vector.broadcast %cst_7 : f32 to vector<16x128xf32>
    %12 = arith.addf %11, %8 : vector<16x128xf32>
    %13 = arith.mulf %10, %12 : vector<16x128xf32>
    %cst_8 = arith.constant 1.000000e+00 : f32
    %14 = vector.broadcast %cst_8 : f32 to vector<16x128xf32>
    %15 = arith.subf %13, %14 : vector<16x128xf32>
    %cst_9 = arith.constant 1.000000e+00 : f32
    %16 = vector.broadcast %cst_9 : f32 to vector<16x128xf32>
    %17 = arith.addf %13, %16 : vector<16x128xf32>
    %18 = arith.divf %15, %17 : vector<16x128xf32>
    %cst_10 = arith.constant 2.000000e+01 : f32
    %19 = vector.broadcast %cst_10 : f32 to vector<16x128xf32>
    %20 = arith.cmpf ogt, %5, %19 : vector<16x128xf32>
    %21 = arith.mulf %5, %18 : vector<16x128xf32>
    %22 = arith.select %20, %5, %21 : vector<16x128xi1>, vector<16x128xf32>
    %c0_11 = arith.constant 0 : index
    %c0_12 = arith.constant 0 : index
    %c0_13 = arith.constant 0 : index
    %23 = vector.load %arg5[%c0_11, %c0_12, %c0_13] : memref<8x128x128xf32, #tpu.memory_space<vmem>>, vector<1x128x128xf32>
    %24 = vector.shape_cast %23 : vector<1x128x128xf32> to vector<128x128xf32>
    %cst_14 = arith.constant dense<0.000000e+00> : vector<16x128xf32>
    %25 = tpu.matmul %22, %24, %cst_14 {dimension_numbers = #tpu.dot_dimension_numbers<[1], [0], [0], [1], [0, 0, 1, 1], [], []>} : vector<16x128xf32>, vector<128x128xf32>, vector<16x128xf32> -> vector<16x128xf32>
    %c0_15 = arith.constant 0 : index
    %c0_16 = arith.constant 0 : index
    %26 = vector.load %arg6[%c0_15, %c0_16] : memref<8x128xf32, #tpu.memory_space<vmem>>, vector<1x128xf32>
    %27 = vector.shape_cast %26 : vector<1x128xf32> to vector<128xf32>
    %28 = vector.shape_cast %27 : vector<128xf32> to vector<1x128xf32>
    %29 = vector.broadcast %28 : vector<1x128xf32> to vector<16x128xf32>
    %30 = arith.addf %25, %29 : vector<16x128xf32>
    %cst_17 = arith.constant 2.000000e+01 : f32
    %31 = vector.broadcast %cst_17 : f32 to vector<16x128xf32>
    %32 = arith.minimumf %30, %31 : vector<16x128xf32>
    %33 = math.exp %32 : vector<16x128xf32>
    %cst_18 = arith.constant 1.000000e+00 : f32
    %34 = vector.broadcast %cst_18 : f32 to vector<16x128xf32>
    %35 = arith.addf %34, %33 : vector<16x128xf32>
    %cst_19 = arith.constant 1.000000e+00 : f32
    %36 = vector.broadcast %cst_19 : f32 to vector<16x128xf32>
    %37 = arith.addf %36, %33 : vector<16x128xf32>
    %38 = arith.mulf %35, %37 : vector<16x128xf32>
    %cst_20 = arith.constant 1.000000e+00 : f32
    %39 = vector.broadcast %cst_20 : f32 to vector<16x128xf32>
    %40 = arith.subf %38, %39 : vector<16x128xf32>
    %cst_21 = arith.constant 1.000000e+00 : f32
    %41 = vector.broadcast %cst_21 : f32 to vector<16x128xf32>
    %42 = arith.addf %38, %41 : vector<16x128xf32>
    %43 = arith.divf %40, %42 : vector<16x128xf32>
    %cst_22 = arith.constant 2.000000e+01 : f32
    %44 = vector.broadcast %cst_22 : f32 to vector<16x128xf32>
    %45 = arith.cmpf ogt, %30, %44 : vector<16x128xf32>
    %46 = arith.mulf %30, %43 : vector<16x128xf32>
    %47 = arith.select %45, %30, %46 : vector<16x128xi1>, vector<16x128xf32>
    %c1 = arith.constant 1 : index
    %c0_23 = arith.constant 0 : index
    %c0_24 = arith.constant 0 : index
    %48 = vector.load %arg5[%c1, %c0_23, %c0_24] : memref<8x128x128xf32, #tpu.memory_space<vmem>>, vector<1x128x128xf32>
    %49 = vector.shape_cast %48 : vector<1x128x128xf32> to vector<128x128xf32>
    %cst_25 = arith.constant dense<0.000000e+00> : vector<16x128xf32>
    %50 = tpu.matmul %47, %49, %cst_25 {dimension_numbers = #tpu.dot_dimension_numbers<[1], [0], [0], [1], [0, 0, 1, 1], [], []>} : vector<16x128xf32>, vector<128x128xf32>, vector<16x128xf32> -> vector<16x128xf32>
    %c1_26 = arith.constant 1 : index
    %c0_27 = arith.constant 0 : index
    %51 = vector.load %arg6[%c1_26, %c0_27] : memref<8x128xf32, #tpu.memory_space<vmem>>, vector<1x128xf32>
    %52 = vector.shape_cast %51 : vector<1x128xf32> to vector<128xf32>
    %53 = vector.shape_cast %52 : vector<128xf32> to vector<1x128xf32>
    %54 = vector.broadcast %53 : vector<1x128xf32> to vector<16x128xf32>
    %55 = arith.addf %50, %54 : vector<16x128xf32>
    %cst_28 = arith.constant 2.000000e+01 : f32
    %56 = vector.broadcast %cst_28 : f32 to vector<16x128xf32>
    %57 = arith.minimumf %55, %56 : vector<16x128xf32>
    %58 = math.exp %57 : vector<16x128xf32>
    %cst_29 = arith.constant 1.000000e+00 : f32
    %59 = vector.broadcast %cst_29 : f32 to vector<16x128xf32>
    %60 = arith.addf %59, %58 : vector<16x128xf32>
    %cst_30 = arith.constant 1.000000e+00 : f32
    %61 = vector.broadcast %cst_30 : f32 to vector<16x128xf32>
    %62 = arith.addf %61, %58 : vector<16x128xf32>
    %63 = arith.mulf %60, %62 : vector<16x128xf32>
    %cst_31 = arith.constant 1.000000e+00 : f32
    %64 = vector.broadcast %cst_31 : f32 to vector<16x128xf32>
    %65 = arith.subf %63, %64 : vector<16x128xf32>
    %cst_32 = arith.constant 1.000000e+00 : f32
    %66 = vector.broadcast %cst_32 : f32 to vector<16x128xf32>
    %67 = arith.addf %63, %66 : vector<16x128xf32>
    %68 = arith.divf %65, %67 : vector<16x128xf32>
    %cst_33 = arith.constant 2.000000e+01 : f32
    %69 = vector.broadcast %cst_33 : f32 to vector<16x128xf32>
    %70 = arith.cmpf ogt, %55, %69 : vector<16x128xf32>
    %71 = arith.mulf %55, %68 : vector<16x128xf32>
    %72 = arith.select %70, %55, %71 : vector<16x128xi1>, vector<16x128xf32>
    %73 = arith.addf %72, %22 : vector<16x128xf32>
    %c2 = arith.constant 2 : index
    %c0_34 = arith.constant 0 : index
    %c0_35 = arith.constant 0 : index
    %74 = vector.load %arg5[%c2, %c0_34, %c0_35] : memref<8x128x128xf32, #tpu.memory_space<vmem>>, vector<1x128x128xf32>
    %75 = vector.shape_cast %74 : vector<1x128x128xf32> to vector<128x128xf32>
    %cst_36 = arith.constant dense<0.000000e+00> : vector<16x128xf32>
    %76 = tpu.matmul %73, %75, %cst_36 {dimension_numbers = #tpu.dot_dimension_numbers<[1], [0], [0], [1], [0, 0, 1, 1], [], []>} : vector<16x128xf32>, vector<128x128xf32>, vector<16x128xf32> -> vector<16x128xf32>
    %c2_37 = arith.constant 2 : index
    %c0_38 = arith.constant 0 : index
    %77 = vector.load %arg6[%c2_37, %c0_38] : memref<8x128xf32, #tpu.memory_space<vmem>>, vector<1x128xf32>
    %78 = vector.shape_cast %77 : vector<1x128xf32> to vector<128xf32>
    %79 = vector.shape_cast %78 : vector<128xf32> to vector<1x128xf32>
    %80 = vector.broadcast %79 : vector<1x128xf32> to vector<16x128xf32>
    %81 = arith.addf %76, %80 : vector<16x128xf32>
    %cst_39 = arith.constant 2.000000e+01 : f32
    %82 = vector.broadcast %cst_39 : f32 to vector<16x128xf32>
    %83 = arith.minimumf %81, %82 : vector<16x128xf32>
    %84 = math.exp %83 : vector<16x128xf32>
    %cst_40 = arith.constant 1.000000e+00 : f32
    %85 = vector.broadcast %cst_40 : f32 to vector<16x128xf32>
    %86 = arith.addf %85, %84 : vector<16x128xf32>
    %cst_41 = arith.constant 1.000000e+00 : f32
    %87 = vector.broadcast %cst_41 : f32 to vector<16x128xf32>
    %88 = arith.addf %87, %84 : vector<16x128xf32>
    %89 = arith.mulf %86, %88 : vector<16x128xf32>
    %cst_42 = arith.constant 1.000000e+00 : f32
    %90 = vector.broadcast %cst_42 : f32 to vector<16x128xf32>
    %91 = arith.subf %89, %90 : vector<16x128xf32>
    %cst_43 = arith.constant 1.000000e+00 : f32
    %92 = vector.broadcast %cst_43 : f32 to vector<16x128xf32>
    %93 = arith.addf %89, %92 : vector<16x128xf32>
    %94 = arith.divf %91, %93 : vector<16x128xf32>
    %cst_44 = arith.constant 2.000000e+01 : f32
    %95 = vector.broadcast %cst_44 : f32 to vector<16x128xf32>
    %96 = arith.cmpf ogt, %81, %95 : vector<16x128xf32>
    %97 = arith.mulf %81, %94 : vector<16x128xf32>
    %98 = arith.select %96, %81, %97 : vector<16x128xi1>, vector<16x128xf32>
    %c3 = arith.constant 3 : index
    %c0_45 = arith.constant 0 : index
    %c0_46 = arith.constant 0 : index
    %99 = vector.load %arg5[%c3, %c0_45, %c0_46] : memref<8x128x128xf32, #tpu.memory_space<vmem>>, vector<1x128x128xf32>
    %100 = vector.shape_cast %99 : vector<1x128x128xf32> to vector<128x128xf32>
    %cst_47 = arith.constant dense<0.000000e+00> : vector<16x128xf32>
    %101 = tpu.matmul %98, %100, %cst_47 {dimension_numbers = #tpu.dot_dimension_numbers<[1], [0], [0], [1], [0, 0, 1, 1], [], []>} : vector<16x128xf32>, vector<128x128xf32>, vector<16x128xf32> -> vector<16x128xf32>
    %c3_48 = arith.constant 3 : index
    %c0_49 = arith.constant 0 : index
    %102 = vector.load %arg6[%c3_48, %c0_49] : memref<8x128xf32, #tpu.memory_space<vmem>>, vector<1x128xf32>
    %103 = vector.shape_cast %102 : vector<1x128xf32> to vector<128xf32>
    %104 = vector.shape_cast %103 : vector<128xf32> to vector<1x128xf32>
    %105 = vector.broadcast %104 : vector<1x128xf32> to vector<16x128xf32>
    %106 = arith.addf %101, %105 : vector<16x128xf32>
    %cst_50 = arith.constant 2.000000e+01 : f32
    %107 = vector.broadcast %cst_50 : f32 to vector<16x128xf32>
    %108 = arith.minimumf %106, %107 : vector<16x128xf32>
    %109 = math.exp %108 : vector<16x128xf32>
    %cst_51 = arith.constant 1.000000e+00 : f32
    %110 = vector.broadcast %cst_51 : f32 to vector<16x128xf32>
    %111 = arith.addf %110, %109 : vector<16x128xf32>
    %cst_52 = arith.constant 1.000000e+00 : f32
    %112 = vector.broadcast %cst_52 : f32 to vector<16x128xf32>
    %113 = arith.addf %112, %109 : vector<16x128xf32>
    %114 = arith.mulf %111, %113 : vector<16x128xf32>
    %cst_53 = arith.constant 1.000000e+00 : f32
    %115 = vector.broadcast %cst_53 : f32 to vector<16x128xf32>
    %116 = arith.subf %114, %115 : vector<16x128xf32>
    %cst_54 = arith.constant 1.000000e+00 : f32
    %117 = vector.broadcast %cst_54 : f32 to vector<16x128xf32>
    %118 = arith.addf %114, %117 : vector<16x128xf32>
    %119 = arith.divf %116, %118 : vector<16x128xf32>
    %cst_55 = arith.constant 2.000000e+01 : f32
    %120 = vector.broadcast %cst_55 : f32 to vector<16x128xf32>
    %121 = arith.cmpf ogt, %106, %120 : vector<16x128xf32>
    %122 = arith.mulf %106, %119 : vector<16x128xf32>
    %123 = arith.select %121, %106, %122 : vector<16x128xi1>, vector<16x128xf32>
    %124 = arith.addf %123, %73 : vector<16x128xf32>
    %c0_56 = arith.constant 0 : index
    %c0_57 = arith.constant 0 : index
    %125 = vector.load %arg7[%c0_56, %c0_57] : memref<128x128xf32, #tpu.memory_space<vmem>>, vector<128x128xf32>
    %cst_58 = arith.constant dense<0.000000e+00> : vector<16x128xf32>
    %126 = tpu.matmul %124, %125, %cst_58 {dimension_numbers = #tpu.dot_dimension_numbers<[1], [0], [0], [1], [0, 0, 1, 1], [], []>} : vector<16x128xf32>, vector<128x128xf32>, vector<16x128xf32> -> vector<16x128xf32>
    %c0_59 = arith.constant 0 : index
    %c0_60 = arith.constant 0 : index
    %127 = vector.load %arg8[%c0_59, %c0_60] : memref<1x128xf32, #tpu.memory_space<vmem>>, vector<1x128xf32>
    %128 = vector.broadcast %127 : vector<1x128xf32> to vector<16x128xf32>
    %129 = arith.addf %126, %128 : vector<16x128xf32>
    %c0_61 = arith.constant 0 : index
    %c0_62 = arith.constant 0 : index
    %130 = vector.load %arg2[%c0_61, %c0_62] : memref<1x128xf32, #tpu.memory_space<vmem>>, vector<1x128xf32>
    %131 = vector.broadcast %130 : vector<1x128xf32> to vector<16x128xf32>
    %132 = arith.minimumf %129, %131 : vector<16x128xf32>
    %c0_63 = arith.constant 0 : index
    %c0_64 = arith.constant 0 : index
    %133 = vector.load %arg14[%c0_63, %c0_64] : memref<16x128xf32, #tpu.memory_space<vmem>>, vector<16x128xf32>
    tpu.vector_store %arg14[%c0_63, %c0_64], %132 {strides = array<i32>} : memref<16x128xf32, #tpu.memory_space<vmem>>, vector<16x128xf32>,
    %c0_65 = arith.constant 0 : index
    %c0_66 = arith.constant 0 : index
    %134 = vector.load %arg9[%c0_65, %c0_66] : memref<128x128xf32, #tpu.memory_space<vmem>>, vector<128x128xf32>
    %cst_67 = arith.constant dense<0.000000e+00> : vector<16x128xf32>
    %135 = tpu.matmul %129, %134, %cst_67 {dimension_numbers = #tpu.dot_dimension_numbers<[1], [0], [0], [1], [0, 0, 1, 1], [], []>} : vector<16x128xf32>, vector<128x128xf32>, vector<16x128xf32> -> vector<16x128xf32>
    %c0_68 = arith.constant 0 : index
    %c0_69 = arith.constant 0 : index
    %136 = vector.load %arg10[%c0_68, %c0_69] : memref<1x128xf32, #tpu.memory_space<vmem>>, vector<1x128xf32>
    %137 = vector.broadcast %136 : vector<1x128xf32> to vector<16x128xf32>
    %138 = arith.addf %135, %137 : vector<16x128xf32>
    %cst_70 = arith.constant 2.000000e+01 : f32
    %139 = vector.broadcast %cst_70 : f32 to vector<16x128xf32>
    %140 = arith.minimumf %138, %139 : vector<16x128xf32>
    %141 = math.exp %140 : vector<16x128xf32>
    %cst_71 = arith.constant 1.000000e+00 : f32
    %142 = vector.broadcast %cst_71 : f32 to vector<16x128xf32>
    %143 = arith.addf %142, %141 : vector<16x128xf32>
    %cst_72 = arith.constant 1.000000e+00 : f32
    %144 = vector.broadcast %cst_72 : f32 to vector<16x128xf32>
    %145 = arith.addf %144, %141 : vector<16x128xf32>
    %146 = arith.mulf %143, %145 : vector<16x128xf32>
    %cst_73 = arith.constant 1.000000e+00 : f32
    %147 = vector.broadcast %cst_73 : f32 to vector<16x128xf32>
    %148 = arith.subf %146, %147 : vector<16x128xf32>
    %cst_74 = arith.constant 1.000000e+00 : f32
    %149 = vector.broadcast %cst_74 : f32 to vector<16x128xf32>
    %150 = arith.addf %146, %149 : vector<16x128xf32>
    %151 = arith.divf %148, %150 : vector<16x128xf32>
    %cst_75 = arith.constant 2.000000e+01 : f32
    %152 = vector.broadcast %cst_75 : f32 to vector<16x128xf32>
    %153 = arith.cmpf ogt, %138, %152 : vector<16x128xf32>
    %154 = arith.mulf %138, %151 : vector<16x128xf32>
    %155 = arith.select %153, %138, %154 : vector<16x128xi1>, vector<16x128xf32>
    %c4 = arith.constant 4 : index
    %c0_76 = arith.constant 0 : index
    %c0_77 = arith.constant 0 : index
    %156 = vector.load %arg5[%c4, %c0_76, %c0_77] : memref<8x128x128xf32, #tpu.memory_space<vmem>>, vector<1x128x128xf32>
    %157 = vector.shape_cast %156 : vector<1x128x128xf32> to vector<128x128xf32>
    %cst_78 = arith.constant dense<0.000000e+00> : vector<16x128xf32>
    %158 = tpu.matmul %155, %157, %cst_78 {dimension_numbers = #tpu.dot_dimension_numbers<[1], [0], [0], [1], [0, 0, 1, 1], [], []>} : vector<16x128xf32>, vector<128x128xf32>, vector<16x128xf32> -> vector<16x128xf32>
    %c4_79 = arith.constant 4 : index
    %c0_80 = arith.constant 0 : index
    %159 = vector.load %arg6[%c4_79, %c0_80] : memref<8x128xf32, #tpu.memory_space<vmem>>, vector<1x128xf32>
    %160 = vector.shape_cast %159 : vector<1x128xf32> to vector<128xf32>
    %161 = vector.shape_cast %160 : vector<128xf32> to vector<1x128xf32>
    %162 = vector.broadcast %161 : vector<1x128xf32> to vector<16x128xf32>
    %163 = arith.addf %158, %162 : vector<16x128xf32>
    %cst_81 = arith.constant 2.000000e+01 : f32
    %164 = vector.broadcast %cst_81 : f32 to vector<16x128xf32>
    %165 = arith.minimumf %163, %164 : vector<16x128xf32>
    %166 = math.exp %165 : vector<16x128xf32>
    %cst_82 = arith.constant 1.000000e+00 : f32
    %167 = vector.broadcast %cst_82 : f32 to vector<16x128xf32>
    %168 = arith.addf %167, %166 : vector<16x128xf32>
    %cst_83 = arith.constant 1.000000e+00 : f32
    %169 = vector.broadcast %cst_83 : f32 to vector<16x128xf32>
    %170 = arith.addf %169, %166 : vector<16x128xf32>
    %171 = arith.mulf %168, %170 : vector<16x128xf32>
    %cst_84 = arith.constant 1.000000e+00 : f32
    %172 = vector.broadcast %cst_84 : f32 to vector<16x128xf32>
    %173 = arith.subf %171, %172 : vector<16x128xf32>
    %cst_85 = arith.constant 1.000000e+00 : f32
    %174 = vector.broadcast %cst_85 : f32 to vector<16x128xf32>
    %175 = arith.addf %171, %174 : vector<16x128xf32>
    %176 = arith.divf %173, %175 : vector<16x128xf32>
    %cst_86 = arith.constant 2.000000e+01 : f32
    %177 = vector.broadcast %cst_86 : f32 to vector<16x128xf32>
    %178 = arith.cmpf ogt, %163, %177 : vector<16x128xf32>
    %179 = arith.mulf %163, %176 : vector<16x128xf32>
    %180 = arith.select %178, %163, %179 : vector<16x128xi1>, vector<16x128xf32>
    %c5 = arith.constant 5 : index
    %c0_87 = arith.constant 0 : index
    %c0_88 = arith.constant 0 : index
    %181 = vector.load %arg5[%c5, %c0_87, %c0_88] : memref<8x128x128xf32, #tpu.memory_space<vmem>>, vector<1x128x128xf32>
    %182 = vector.shape_cast %181 : vector<1x128x128xf32> to vector<128x128xf32>
    %cst_89 = arith.constant dense<0.000000e+00> : vector<16x128xf32>
    %183 = tpu.matmul %180, %182, %cst_89 {dimension_numbers = #tpu.dot_dimension_numbers<[1], [0], [0], [1], [0, 0, 1, 1], [], []>} : vector<16x128xf32>, vector<128x128xf32>, vector<16x128xf32> -> vector<16x128xf32>
    %c5_90 = arith.constant 5 : index
    %c0_91 = arith.constant 0 : index
    %184 = vector.load %arg6[%c5_90, %c0_91] : memref<8x128xf32, #tpu.memory_space<vmem>>, vector<1x128xf32>
    %185 = vector.shape_cast %184 : vector<1x128xf32> to vector<128xf32>
    %186 = vector.shape_cast %185 : vector<128xf32> to vector<1x128xf32>
    %187 = vector.broadcast %186 : vector<1x128xf32> to vector<16x128xf32>
    %188 = arith.addf %183, %187 : vector<16x128xf32>
    %cst_92 = arith.constant 2.000000e+01 : f32
    %189 = vector.broadcast %cst_92 : f32 to vector<16x128xf32>
    %190 = arith.minimumf %188, %189 : vector<16x128xf32>
    %191 = math.exp %190 : vector<16x128xf32>
    %cst_93 = arith.constant 1.000000e+00 : f32
    %192 = vector.broadcast %cst_93 : f32 to vector<16x128xf32>
    %193 = arith.addf %192, %191 : vector<16x128xf32>
    %cst_94 = arith.constant 1.000000e+00 : f32
    %194 = vector.broadcast %cst_94 : f32 to vector<16x128xf32>
    %195 = arith.addf %194, %191 : vector<16x128xf32>
    %196 = arith.mulf %193, %195 : vector<16x128xf32>
    %cst_95 = arith.constant 1.000000e+00 : f32
    %197 = vector.broadcast %cst_95 : f32 to vector<16x128xf32>
    %198 = arith.subf %196, %197 : vector<16x128xf32>
    %cst_96 = arith.constant 1.000000e+00 : f32
    %199 = vector.broadcast %cst_96 : f32 to vector<16x128xf32>
    %200 = arith.addf %196, %199 : vector<16x128xf32>
    %201 = arith.divf %198, %200 : vector<16x128xf32>
    %cst_97 = arith.constant 2.000000e+01 : f32
    %202 = vector.broadcast %cst_97 : f32 to vector<16x128xf32>
    %203 = arith.cmpf ogt, %188, %202 : vector<16x128xf32>
    %204 = arith.mulf %188, %201 : vector<16x128xf32>
    %205 = arith.select %203, %188, %204 : vector<16x128xi1>, vector<16x128xf32>
    %206 = arith.addf %205, %155 : vector<16x128xf32>
    %c6 = arith.constant 6 : index
    %c0_98 = arith.constant 0 : index
    %c0_99 = arith.constant 0 : index
    %207 = vector.load %arg5[%c6, %c0_98, %c0_99] : memref<8x128x128xf32, #tpu.memory_space<vmem>>, vector<1x128x128xf32>
    %208 = vector.shape_cast %207 : vector<1x128x128xf32> to vector<128x128xf32>
    %cst_100 = arith.constant dense<0.000000e+00> : vector<16x128xf32>
    %209 = tpu.matmul %206, %208, %cst_100 {dimension_numbers = #tpu.dot_dimension_numbers<[1], [0], [0], [1], [0, 0, 1, 1], [], []>} : vector<16x128xf32>, vector<128x128xf32>, vector<16x128xf32> -> vector<16x128xf32>
    %c6_101 = arith.constant 6 : index
    %c0_102 = arith.constant 0 : index
    %210 = vector.load %arg6[%c6_101, %c0_102] : memref<8x128xf32, #tpu.memory_space<vmem>>, vector<1x128xf32>
    %211 = vector.shape_cast %210 : vector<1x128xf32> to vector<128xf32>
    %212 = vector.shape_cast %211 : vector<128xf32> to vector<1x128xf32>
    %213 = vector.broadcast %212 : vector<1x128xf32> to vector<16x128xf32>
    %214 = arith.addf %209, %213 : vector<16x128xf32>
    %cst_103 = arith.constant 2.000000e+01 : f32
    %215 = vector.broadcast %cst_103 : f32 to vector<16x128xf32>
    %216 = arith.minimumf %214, %215 : vector<16x128xf32>
    %217 = math.exp %216 : vector<16x128xf32>
    %cst_104 = arith.constant 1.000000e+00 : f32
    %218 = vector.broadcast %cst_104 : f32 to vector<16x128xf32>
    %219 = arith.addf %218, %217 : vector<16x128xf32>
    %cst_105 = arith.constant 1.000000e+00 : f32
    %220 = vector.broadcast %cst_105 : f32 to vector<16x128xf32>
    %221 = arith.addf %220, %217 : vector<16x128xf32>
    %222 = arith.mulf %219, %221 : vector<16x128xf32>
    %cst_106 = arith.constant 1.000000e+00 : f32
    %223 = vector.broadcast %cst_106 : f32 to vector<16x128xf32>
    %224 = arith.subf %222, %223 : vector<16x128xf32>
    %cst_107 = arith.constant 1.000000e+00 : f32
    %225 = vector.broadcast %cst_107 : f32 to vector<16x128xf32>
    %226 = arith.addf %222, %225 : vector<16x128xf32>
    %227 = arith.divf %224, %226 : vector<16x128xf32>
    %cst_108 = arith.constant 2.000000e+01 : f32
    %228 = vector.broadcast %cst_108 : f32 to vector<16x128xf32>
    %229 = arith.cmpf ogt, %214, %228 : vector<16x128xf32>
    %230 = arith.mulf %214, %227 : vector<16x128xf32>
    %231 = arith.select %229, %214, %230 : vector<16x128xi1>, vector<16x128xf32>
    %c7 = arith.constant 7 : index
    %c0_109 = arith.constant 0 : index
    %c0_110 = arith.constant 0 : index
    %232 = vector.load %arg5[%c7, %c0_109, %c0_110] : memref<8x128x128xf32, #tpu.memory_space<vmem>>, vector<1x128x128xf32>
    %233 = vector.shape_cast %232 : vector<1x128x128xf32> to vector<128x128xf32>
    %cst_111 = arith.constant dense<0.000000e+00> : vector<16x128xf32>
    %234 = tpu.matmul %231, %233, %cst_111 {dimension_numbers = #tpu.dot_dimension_numbers<[1], [0], [0], [1], [0, 0, 1, 1], [], []>} : vector<16x128xf32>, vector<128x128xf32>, vector<16x128xf32> -> vector<16x128xf32>
    %c7_112 = arith.constant 7 : index
    %c0_113 = arith.constant 0 : index
    %235 = vector.load %arg6[%c7_112, %c0_113] : memref<8x128xf32, #tpu.memory_space<vmem>>, vector<1x128xf32>
    %236 = vector.shape_cast %235 : vector<1x128xf32> to vector<128xf32>
    %237 = vector.shape_cast %236 : vector<128xf32> to vector<1x128xf32>
    %238 = vector.broadcast %237 : vector<1x128xf32> to vector<16x128xf32>
    %239 = arith.addf %234, %238 : vector<16x128xf32>
    %cst_114 = arith.constant 2.000000e+01 : f32
    %240 = vector.broadcast %cst_114 : f32 to vector<16x128xf32>
    %241 = arith.minimumf %239, %240 : vector<16x128xf32>
    %242 = math.exp %241 : vector<16x128xf32>
    %cst_115 = arith.constant 1.000000e+00 : f32
    %243 = vector.broadcast %cst_115 : f32 to vector<16x128xf32>
    %244 = arith.addf %243, %242 : vector<16x128xf32>
    %cst_116 = arith.constant 1.000000e+00 : f32
    %245 = vector.broadcast %cst_116 : f32 to vector<16x128xf32>
    %246 = arith.addf %245, %242 : vector<16x128xf32>
    %247 = arith.mulf %244, %246 : vector<16x128xf32>
    %cst_117 = arith.constant 1.000000e+00 : f32
    %248 = vector.broadcast %cst_117 : f32 to vector<16x128xf32>
    %249 = arith.subf %247, %248 : vector<16x128xf32>
    %cst_118 = arith.constant 1.000000e+00 : f32
    %250 = vector.broadcast %cst_118 : f32 to vector<16x128xf32>
    %251 = arith.addf %247, %250 : vector<16x128xf32>
    %252 = arith.divf %249, %251 : vector<16x128xf32>
    %cst_119 = arith.constant 2.000000e+01 : f32
    %253 = vector.broadcast %cst_119 : f32 to vector<16x128xf32>
    %254 = arith.cmpf ogt, %239, %253 : vector<16x128xf32>
    %255 = arith.mulf %239, %252 : vector<16x128xf32>
    %256 = arith.select %254, %239, %255 : vector<16x128xi1>, vector<16x128xf32>
    %257 = arith.addf %256, %206 : vector<16x128xf32>
    %c0_120 = arith.constant 0 : index
    %c0_121 = arith.constant 0 : index
    %258 = vector.load %arg11[%c0_120, %c0_121] : memref<128x128xf32, #tpu.memory_space<vmem>>, vector<128x128xf32>
    %cst_122 = arith.constant dense<0.000000e+00> : vector<16x128xf32>
    %259 = tpu.matmul %257, %258, %cst_122 {dimension_numbers = #tpu.dot_dimension_numbers<[1], [0], [0], [1], [0, 0, 1, 1], [], []>} : vector<16x128xf32>, vector<128x128xf32>, vector<16x128xf32> -> vector<16x128xf32>
    %c0_123 = arith.constant 0 : index
    %c0_124 = arith.constant 0 : index
    %260 = vector.load %arg12[%c0_123, %c0_124] : memref<1x128xf32, #tpu.memory_space<vmem>>, vector<1x128xf32>
    %261 = vector.broadcast %260 : vector<1x128xf32> to vector<16x128xf32>
    %262 = arith.addf %259, %261 : vector<16x128xf32>
    %263 = math.tanh %262 : vector<16x128xf32>
    %c0_125 = arith.constant 0 : index
    %c0_126 = arith.constant 0 : index
    %264 = vector.load %arg13[%c0_125, %c0_126] : memref<16x128xf32, #tpu.memory_space<vmem>>, vector<16x128xf32>
    tpu.vector_store %arg13[%c0_125, %c0_126], %263 {strides = array<i32>} : memref<16x128xf32, #tpu.memory_space<vmem>>, vector<16x128xf32>,
    return
  }
  func.func @transform_0(%arg0: i32) -> (i32, i32) {
    %c0_i32 = arith.constant 0 : i32
    %c0_i32_0 = arith.constant 0 : i32
    return %arg0, %c0_i32 : i32, i32
  }
  func.func @transform_1(%arg0: i32) -> (i32, i32) {
    %c0_i32 = arith.constant 0 : i32
    %c0_i32_0 = arith.constant 0 : i32
    %c0_i32_1 = arith.constant 0 : i32
    return %c0_i32, %c0_i32_0 : i32, i32
  }
  func.func @transform_2(%arg0: i32) -> (i32, i32) {
    %c0_i32 = arith.constant 0 : i32
    %c0_i32_0 = arith.constant 0 : i32
    %c0_i32_1 = arith.constant 0 : i32
    return %c0_i32, %c0_i32_0 : i32, i32
  }
  func.func @transform_3(%arg0: i32) -> (i32, i32) {
    %c0_i32 = arith.constant 0 : i32
    %c0_i32_0 = arith.constant 0 : i32
    %c0_i32_1 = arith.constant 0 : i32
    return %c0_i32, %c0_i32_0 : i32, i32
  }
  func.func @transform_4(%arg0: i32) -> (i32, i32, i32) {
    %c0_i32 = arith.constant 0 : i32
    %c0_i32_0 = arith.constant 0 : i32
    %c0_i32_1 = arith.constant 0 : i32
    %c0_i32_2 = arith.constant 0 : i32
    return %c0_i32, %c0_i32_0, %c0_i32_1 : i32, i32, i32
  }
  func.func @transform_5(%arg0: i32) -> (i32, i32) {
    %c0_i32 = arith.constant 0 : i32
    %c0_i32_0 = arith.constant 0 : i32
    %c0_i32_1 = arith.constant 0 : i32
    return %c0_i32, %c0_i32_0 : i32, i32
  }
  func.func @transform_6(%arg0: i32) -> (i32, i32) {
    %c0_i32 = arith.constant 0 : i32
    %c0_i32_0 = arith.constant 0 : i32
    %c0_i32_1 = arith.constant 0 : i32
    return %c0_i32, %c0_i32_0 : i32, i32
  }
  func.func @transform_7(%arg0: i32) -> (i32, i32) {
    %c0_i32 = arith.constant 0 : i32
    %c0_i32_0 = arith.constant 0 : i32
    %c0_i32_1 = arith.constant 0 : i32
    return %c0_i32, %c0_i32_0 : i32, i32
  }
  func.func @transform_8(%arg0: i32) -> (i32, i32) {
    %c0_i32 = arith.constant 0 : i32
    %c0_i32_0 = arith.constant 0 : i32
    %c0_i32_1 = arith.constant 0 : i32
    return %c0_i32, %c0_i32_0 : i32, i32
  }
  func.func @transform_9(%arg0: i32) -> (i32, i32) {
    %c0_i32 = arith.constant 0 : i32
    %c0_i32_0 = arith.constant 0 : i32
    %c0_i32_1 = arith.constant 0 : i32
    return %c0_i32, %c0_i32_0 : i32, i32
  }
  func.func @transform_10(%arg0: i32) -> (i32, i32) {
    %c0_i32 = arith.constant 0 : i32
    %c0_i32_0 = arith.constant 0 : i32
    %c0_i32_1 = arith.constant 0 : i32
    return %c0_i32, %c0_i32_0 : i32, i32
  }
  func.func @transform_11(%arg0: i32) -> (i32, i32) {
    %c0_i32 = arith.constant 0 : i32
    %c0_i32_0 = arith.constant 0 : i32
    %c0_i32_1 = arith.constant 0 : i32
    return %c0_i32, %c0_i32_0 : i32, i32
  }
  func.func @transform_12(%arg0: i32) -> (i32, i32) {
    %c0_i32 = arith.constant 0 : i32
    %c0_i32_0 = arith.constant 0 : i32
    return %arg0, %c0_i32 : i32, i32
  }
  func.func @transform_13(%arg0: i32) -> (i32, i32) {
    %c0_i32 = arith.constant 0 : i32
    %c0_i32_0 = arith.constant 0 : i32
    return %arg0, %c0_i32 : i32, i32
  }
}

</mosaic_0001>

<bundles_post_ra>
// kernel: tpu_custom_call.1
= control target key start
LH: loop header
LB: loop body
LE: loop exit
PB: predicated region body
PF: predicated region fallthrough
CT: control target
= control target key end

     0   :  { %19 = vsyncpa [#allocation3], 0  ;;  %s3222_s0 = inlined_call_operand.hbm [shape: f32[16,128], index: 0, kind: input, shape index: {}]   ;;  %s3223_s1 = inlined_call_operand.vmem [shape: f32[1,128], index: 1, kind: input, shape index: {}]   ;;  %s3224_s2 = inlined_call_operand.hbm [shape: f32[128,128], index: 2, kind: input, shape index: {}]   ;;  %s3225_s3 = inlined_call_operand.vmem [shape: f32[1,128], index: 3, kind: input, shape index: {}]   ;;  %s3226_s4 = inlined_call_operand.hbm [shape: f32[8,128,128], index: 4, kind: input, shape index: {}]   ;;  %s3227_s5 = inlined_call_operand.vmem [shape: f32[8,128], index: 5, kind: input, shape index: {}]   ;;  %s3228_s6 = inlined_call_operand.hbm [shape: f32[128,128], index: 6, kind: input, shape index: {}]   ;;  %s3229_s7 = inlined_call_operand.vmem [shape: f32[1,128], index: 7, kind: input, shape index: {}]   ;;  %s3230_s8 = inlined_call_operand.hbm [shape: f32[128,128], index: 8, kind: input, shape index: {}]   ;;  %s3231_s9 = inlined_call_operand.vmem [shape: f32[1,128], index: 9, kind: input, shape index: {}]   ;;  %s3232_s10 = inlined_call_operand.hbm [shape: f32[128,128], index: 10, kind: input, shape index: {}]   ;;  %s3233_s11 = inlined_call_operand.vmem [shape: f32[1,128], index: 11, kind: input, shape index: {}]   ;;  %s3234_s12 = inlined_call_operand.hbm [shape: f32[16,128], index: 12, kind: output, shape index: {0}]   ;;  %s3235_s13 = inlined_call_operand.hbm [shape: f32[16,128], index: 13, kind: output, shape index: {1}]  }
   0x1   :  { %20 = vsyncpa [#allocation6], 0 }
   0x2   :  { %21 = vsyncpa [#allocation9], 0 }
   0x3   :  { %22 = vsyncpa [#allocation12], 0 }
   0x4   :  { %23 = vsyncpa [#allocation4], 0 }
   0x5   :  { %24 = vsyncpa [#allocation15], 0  ;;  %s2930_s25 = smov [#allocation5]   ;;  %s2931_s27 = smov [#allocation8]  }
   0x6   :  { %s44_s26 = sshll.u32 %s2930_s25, 4  ;;  %s72_s28 = sshll.u32 %s2931_s27, 4  ;;  %s45_s26 = int_to_ptr.vmem [resolvable:$true] %s44_s26  ;;  %s3010_s28 = int_to_ptr.vmem [resolvable:$true] %s72_s28 }
   0x7   :  { %s2742_s14 = scalar_lea.hbm %s3224_s2, 2048 }
   0x8   :  { %p2743_p0 = scmp.ne.s32.totalorder %s3224_s2, %s2742_s14  ;;  %p2746_p1 = scmp.lt.u32.totalorder %s2742_s14, %s3224_s2 }
   0xa   :  { %p2748_p2 = pnand %p2746_p1, %p2743_p0 }
   0xc   :  { %2751 = shalt.err (!%p2748_p2)
}
   0xd   :  { %s2752_s19 = scalar_lea.vmem %s45_s26, 2048  ;;  %p2757_p4 = scmp.lt.s32.totalorder %s45_s26, %s45_s26 }
   0xe   :  { %p2753_p3 = scmp.ne.s32.totalorder %s45_s26, %s2752_s19  ;;  %p2758_p5 = scmp.lt.s32.totalorder %s2752_s19, %s2752_s19 }
  0x10   :  { %p2759_p6 = por %p2758_p5, %p2757_p4 }
  0x12   :  { %p2760_p7 = pnand %p2759_p6, %p2753_p3 }
  0x14   :  { %2763 = shalt.err (!%p2760_p7)
}
  0x15   :  { %s2932_s20 = smov 128   ;;  %s2933_s21 = smov 8  }
  0x16   :  { %50 = dma.hbm_to_vmem [thread:$0]  %s3224_s2, 2048, %s45_s26, [#allocation6], %s2932_s20, %s2932_s20, %s2933_s21  }
  0x17   :  { %s2764_s27 = scalar_lea.hbm %s3228_s6, 2048 }
  0x18   :  { %p2765_p8 = scmp.ne.s32.totalorder %s3228_s6, %s2764_s27  ;;  %p2768_p9 = scmp.lt.u32.totalorder %s2764_s27, %s3228_s6 }
  0x1a   :  { %p2770_p10 = pnand %p2768_p9, %p2765_p8 }
  0x1c   :  { %2773 = shalt.err (!%p2770_p10)
}
  0x1d   :  { %s2774_s16 = scalar_lea.vmem %s3010_s28, 2048  ;;  %p2779_p12 = scmp.lt.s32.totalorder %s3010_s28, %s3010_s28 }
  0x1e   :  { %p2775_p11 = scmp.ne.s32.totalorder %s3010_s28, %s2774_s16  ;;  %p2780_p13 = scmp.lt.s32.totalorder %s2774_s16, %s2774_s16 }
  0x20   :  { %p2781_p0 = por %p2780_p13, %p2779_p12 }
  0x22   :  { %p2782_p1 = pnand %p2781_p0, %p2775_p11 }
  0x24   :  { %2785 = shalt.err (!%p2782_p1)
}
  0x25   :  { %78 = dma.hbm_to_vmem [thread:$0]  %s3228_s6, 2048, %s3010_s28, [#allocation9], %s2932_s20, %s2932_s20, %s2933_s21  }
  0x26   :  { %s2934_s17 = smov [#allocation2]   ;;  %s2935_s19 = smov [#allocation7]  }
  0x27   :  { %s30_s18 = sshll.u32 %s2934_s17, 4  ;;  %s58_s22 = sshll.u32 %s2935_s19, 4  ;;  %s31_s18 = int_to_ptr.vmem [resolvable:$true] %s30_s18  ;;  %s3047_s22 = int_to_ptr.vmem [resolvable:$true] %s58_s22 }
  0x28   :  { %s2786_s25 = scalar_lea.hbm %s3222_s0, 256 }
  0x29   :  { %p2787_p2 = scmp.ne.s32.totalorder %s3222_s0, %s2786_s25  ;;  %p2790_p3 = scmp.lt.u32.totalorder %s2786_s25, %s3222_s0 }
  0x2b   :  { %p2792_p4 = pnand %p2790_p3, %p2787_p2 }
  0x2d   :  { %2795 = shalt.err (!%p2792_p4)
}
  0x2e   :  { %s2796_s6 = scalar_lea.vmem %s31_s18, 256  ;;  %p2801_p6 = scmp.lt.s32.totalorder %s31_s18, %s31_s18 }
  0x2f   :  { %p2797_p5 = scmp.ne.s32.totalorder %s31_s18, %s2796_s6  ;;  %p2802_p7 = scmp.lt.s32.totalorder %s2796_s6, %s2796_s6 }
  0x31   :  { %p2803_p8 = por %p2802_p7, %p2801_p6 }
  0x33   :  { %p2804_p9 = pnand %p2803_p8, %p2797_p5 }
  0x35   :  { %2807 = shalt.err (!%p2804_p9)
}
  0x36   :  { %36 = dma.hbm_to_vmem [thread:$0]  %s3222_s0, 256, %s31_s18, [#allocation3], %s2932_s20, %s2932_s20, %s2933_s21  }
  0x37   :  { %s2808_s26 = scalar_lea.hbm %s3226_s4, 16384 }
  0x38   :  { %p2809_p10 = scmp.ne.s32.totalorder %s3226_s4, %s2808_s26  ;;  %p2812_p11 = scmp.lt.u32.totalorder %s2808_s26, %s3226_s4 }
  0x3a   :  { %p2814_p12 = pnand %p2812_p11, %p2809_p10 }
  0x3c   :  { %2817 = shalt.err (!%p2814_p12)
}
  0x3d   :  { %s2818_s25 = scalar_lea.vmem %s3047_s22, 16384  ;;  %p2823_p0 = scmp.lt.s32.totalorder %s3047_s22, %s3047_s22 }
  0x3e   :  { %p2819_p13 = scmp.ne.s32.totalorder %s3047_s22, %s2818_s25  ;;  %p2824_p1 = scmp.lt.s32.totalorder %s2818_s25, %s2818_s25 }
  0x40   :  { %p2825_p2 = por %p2824_p1, %p2823_p0 }
  0x42   :  { %p2826_p3 = pnand %p2825_p2, %p2819_p13 }
  0x44   :  { %2829 = shalt.err (!%p2826_p3)
}
  0x45   :  { %64 = dma.hbm_to_vmem [thread:$0]  %s3226_s4, 16384, %s3047_s22, [#allocation6], %s2932_s20, %s2932_s20, %s2933_s21  }
  0x46   :  { %s2936_s27 = smov [#allocation10]   ;;  %s2937_s30 = smov [#allocation11]  }
  0x47   :  { %s86_s29 = sshll.u32 %s2936_s27, 4  ;;  %s100_s14 = sshll.u32 %s2937_s30, 4  ;;  %s87_s29 = int_to_ptr.vmem [resolvable:$true] %s86_s29  ;;  %s3084_s14 = int_to_ptr.vmem [resolvable:$true] %s100_s14 }
  0x48   :  { %s2830_s15 = scalar_lea.hbm %s3230_s8, 2048 }
  0x49   :  { %p2831_p4 = scmp.ne.s32.totalorder %s3230_s8, %s2830_s15  ;;  %p2834_p5 = scmp.lt.u32.totalorder %s2830_s15, %s3230_s8 }
  0x4b   :  { %p2836_p6 = pnand %p2834_p5, %p2831_p4 }
  0x4d   :  { %2839 = shalt.err (!%p2836_p6)
}
  0x4e   :  { %s2840_s4 = scalar_lea.vmem %s87_s29, 2048  ;;  %p2845_p8 = scmp.lt.s32.totalorder %s87_s29, %s87_s29 }
  0x4f   :  { %p2841_p7 = scmp.ne.s32.totalorder %s87_s29, %s2840_s4  ;;  %p2846_p9 = scmp.lt.s32.totalorder %s2840_s4, %s2840_s4 }
  0x51   :  { %p2847_p10 = por %p2846_p9, %p2845_p8 }
  0x53   :  { %p2848_p11 = pnand %p2847_p10, %p2841_p7 }
  0x55   :  { %2851 = shalt.err (!%p2848_p11)
}
  0x56   :  { %92 = dma.hbm_to_vmem [thread:$0]  %s3230_s8, 2048, %s87_s29, [#allocation9], %s2932_s20, %s2932_s20, %s2933_s21  }
  0x57   :  { %s2852_s25 = scalar_lea.hbm %s3232_s10, 2048 }
  0x58   :  { %p2853_p12 = scmp.ne.s32.totalorder %s3232_s10, %s2852_s25  ;;  %p2856_p13 = scmp.lt.u32.totalorder %s2852_s25, %s3232_s10 }
  0x5a   :  { %p2858_p0 = pnand %p2856_p13, %p2853_p12 }
  0x5c   :  { %2861 = shalt.err (!%p2858_p0)
}
  0x5d   :  { %s2862_s6 = scalar_lea.vmem %s3084_s14, 2048  ;;  %p2867_p2 = scmp.lt.s32.totalorder %s3084_s14, %s3084_s14 }
  0x5e   :  { %p2863_p1 = scmp.ne.s32.totalorder %s3084_s14, %s2862_s6  ;;  %p2868_p3 = scmp.lt.s32.totalorder %s2862_s6, %s2862_s6 }
  0x60   :  { %p2869_p4 = por %p2868_p3, %p2867_p2 }
  0x62   :  { %p2870_p5 = pnand %p2869_p4, %p2863_p1 }
  0x64   :  { %2873 = shalt.err (!%p2870_p5)
}
  0x65   :  { %106 = dma.hbm_to_vmem [thread:$0]  %s3232_s10, 2048, %s3084_s14, [#allocation12], %s2932_s20, %s2932_s20, %s2933_s21  }
  0x66   :  { %2918 = dma.done.wait [#allocation3], 256  }
  0x67   :  { %2919 = vsyncadd [#allocation3], 4294967040 }
  0x68   :  { %2920 = dma.done.wait [#allocation6], 18432  }
  0x69   :  { %2921 = vsyncadd [#allocation6], 4294948864 }
  0x6a   :  { %2922 = dma.done.wait [#allocation9], 4096  }
  0x6b   :  { %2923 = vsyncadd [#allocation9], 4294963200 }
  0x6c   :  { %2924 = dma.done.wait [#allocation12], 2048  }
  0x6d   :  { %2925 = vsyncadd [#allocation12], 4294965248  ;;  %v129_v0 = vld [vmem:[#allocation5] sm:$0xff]  ;;  %v130_v1 = vld [vmem:[#allocation5 + $0x8] sm:$0xff] }
  0x6e   :  { %v131_v2 = vld [vmem:[#allocation5 + $0x10] sm:$0xff]  ;;  %v2264_v3 = vpack.c.bf16 %v130_v1, %v129_v0  ;;  %v132_v4 = vld [vmem:[#allocation5 + $0x18] sm:$0xff]  ;;  %v133_v6 = vld [vmem:[#allocation5 + $0x20] sm:$0xff] }
  0x6f   :  { %v2268_v5 = vpack.c.bf16 %v132_v4, %v131_v2  ;;  %v134_v7 = vld [vmem:[#allocation5 + $0x28] sm:$0xff]  ;;  %v127_v9 = vld [vmem:[#allocation2] sm:$0xff]  ;;  %v136_v11 = vld [vmem:[#allocation5 + $0x38] sm:$0xff] }
  0x70   :  { %2265 = vmatprep.subr.bf16.mxu0 %v2264_v3  ;;  %v2272_v8 = vpack.c.bf16 %v134_v7, %v133_v6  ;;  %v135_v10 = vld [vmem:[#allocation5 + $0x30] sm:$0xff]  ;;  %1876 = vmatprep.mubr.f32.mxu0 %v127_v9  ;;  %v137_v13 = vld [vmem:[#allocation5 + $0x40] sm:$0xff]  ;;  %v138_v14 = vld [vmem:[#allocation5 + $0x48] sm:$0xff] }
  0x71   :  { %2267 = vmatpush3.bf16.msra.mxu0 %v2264_v3  ;;  %v2276_v12 = vpack.c.bf16 %v136_v11, %v135_v10  ;;  %v2280_v15 = vpack.c.bf16 %v138_v14, %v137_v13  ;;  %v139_v16 = vld [vmem:[#allocation5 + $0x50] sm:$0xff]  ;;  %v140_v17 = vld [vmem:[#allocation5 + $0x58] sm:$0xff]  ;;  %v141_v19 = vld [vmem:[#allocation5 + $0x60] sm:$0xff] }
  0x72   :  { %2269 = vmatprep.subr.bf16.mxu0 %v2268_v5  ;;  %v2284_v18 = vpack.c.bf16 %v140_v17, %v139_v16  ;;  %v142_v20 = vld [vmem:[#allocation5 + $0x68] sm:$0xff]  ;;  %v143_v22 = vld [vmem:[#allocation5 + $0x70] sm:$0xff]  ;;  %v144_v23 = vld [vmem:[#allocation5 + $0x78] sm:$0xff] }
  0x73   :  { %v2288_v21 = vpack.c.bf16 %v142_v20, %v141_v19  ;;  %v2292_v24 = vpack.c.bf16 %v144_v23, %v143_v22  ;;  %v128_v25 = vld [vmem:[#allocation2 + $0x8] sm:$0xff]  ;;  %v251_v26 = vld [vmem:[#allocation7] sm:$0xff]  ;;  %v252_v27 = vld [vmem:[#allocation7 + $0x8] sm:$0xff] }
  0x74   :  { %v2296_v28 = vpack.c.bf16 %v252_v27, %v251_v26  ;;  %v253_v29 = vld [vmem:[#allocation7 + $0x10] sm:$0xff]  ;;  %v254_v30 = vld [vmem:[#allocation7 + $0x18] sm:$0xff]  ;;  %v255_v32 = vld [vmem:[#allocation7 + $0x20] sm:$0xff] }
  0x75   :  { %2271 = vmatpush3.bf16.msra.mxu0 %v2268_v5  ;;  %v2300_v31 = vpack.c.bf16 %v254_v30, %v253_v29  ;;  %v256_v33 = vld [vmem:[#allocation7 + $0x28] sm:$0xff]  ;;  %v257_v35 = vld [vmem:[#allocation7 + $0x30] sm:$0xff]  ;;  %v258_v36 = vld [vmem:[#allocation7 + $0x38] sm:$0xff] }
  0x76   :  { %2273 = vmatprep.subr.bf16.mxu0 %v2272_v8  ;;  %2297 = vmatprep.subr.bf16.mxu1 %v2296_v28  ;;  %v2304_v34 = vpack.c.bf16 %v256_v33, %v255_v32  ;;  %v259_v37 = vld [vmem:[#allocation7 + $0x40] sm:$0xff]  ;;  %v2308_v38 = vpack.c.bf16 %v258_v36, %v257_v35  ;;  %v260_v39 = vld [vmem:[#allocation7 + $0x48] sm:$0xff]  ;;  %v261_v41 = vld [vmem:[#allocation7 + $0x50] sm:$0xff] }
  0x77   :  { %2299 = vmatpush3.bf16.msra.mxu1 %v2296_v28  ;;  %v2312_v40 = vpack.c.bf16 %v260_v39, %v259_v37  ;;  %v262_v42 = vld [vmem:[#allocation7 + $0x58] sm:$0xff]  ;;  %v263_v44 = vld [vmem:[#allocation7 + $0x60] sm:$0xff]  ;;  %v264_v45 = vld [vmem:[#allocation7 + $0x68] sm:$0xff] }
  0x78   :  { %2301 = vmatprep.subr.bf16.mxu1 %v2300_v31  ;;  %v2316_v43 = vpack.c.bf16 %v262_v42, %v261_v41  ;;  %v2320_v46 = vpack.c.bf16 %v264_v45, %v263_v44  ;;  %v265_v47 = vld [vmem:[#allocation7 + $0x70] sm:$0xff]  ;;  %v266_v48 = vld [vmem:[#allocation7 + $0x78] sm:$0xff]  ;;  %v372_v13 = vld [vmem:[#allocation7 + $0x80] sm:$0xff] }
  0x79   :  { %2275 = vmatpush3.bf16.msra.mxu0 %v2272_v8  ;;  %v2324_v49 = vpack.c.bf16 %v266_v48, %v265_v47  ;;  %v1595_v50 = vld [vmem:[%s3225_s3] ss:$0 sm:$0xff]  ;;  %v373_v14 = vld [vmem:[#allocation7 + $0x88] sm:$0xff]  ;;  %v375_v17 = vld [vmem:[#allocation7 + $0x98] sm:$0xff] }
  0x7a   :  { %2277 = vmatprep.subr.bf16.mxu0 %v2276_v12  ;;  %v374_v16 = vld [vmem:[#allocation7 + $0x90] sm:$0xff]  ;;  %v376_v19 = vld [vmem:[#allocation7 + $0xa0] sm:$0xff]  ;;  %v377_v20 = vld [vmem:[#allocation7 + $0xa8] sm:$0xff] }
  0x7b   :  { %2303 = vmatpush3.bf16.msra.mxu1 %v2300_v31  ;;  %v378_v22 = vld [vmem:[#allocation7 + $0xb0] sm:$0xff]  ;;  %v379_v23 = vld [vmem:[#allocation7 + $0xb8] sm:$0xff]  ;;  %v381_v26 = vld [vmem:[#allocation7 + $0xc8] sm:$0xff] }
  0x7c   :  { %2305 = vmatprep.subr.bf16.mxu1 %v2304_v34  ;;  %v382_v28 = vld [vmem:[#allocation7 + $0xd0] sm:$0xff]  ;;  %v383_v29 = vld [vmem:[#allocation7 + $0xd8] sm:$0xff]  ;;  %v384_v31 = vld [vmem:[#allocation7 + $0xe0] sm:$0xff] }
  0x7d   :  { %2279 = vmatpush3.bf16.msra.mxu0 %v2276_v12  ;;  %v2348_v30 = vpack.c.bf16 %v383_v29, %v382_v28  ;;  %v385_v32 = vld [vmem:[#allocation7 + $0xe8] sm:$0xff]  ;;  %v387_v35 = vld [vmem:[#allocation7 + $0xf8] sm:$0xff]  ;;  %v1598_v37 = vld [vmem:[%s3227_s5] ss:$0 sm:$0xff] }
  0x7e   :  { %2281 = vmatprep.subr.bf16.mxu0 %v2280_v15  ;;  %v2352_v33 = vpack.c.bf16 %v385_v32, %v384_v31 }
  0x7f   :  { %2307 = vmatpush3.bf16.msra.mxu1 %v2304_v34  ;;  %v386_v34 = vld [vmem:[#allocation7 + $0xf0] sm:$0xff] }
  0x80   :  { %2309 = vmatprep.subr.bf16.mxu1 %v2308_v38  ;;  %v2356_v36 = vpack.c.bf16 %v387_v35, %v386_v34 }
  0x81   :  { %2283 = vmatpush3.bf16.msra.mxu0 %v2280_v15  ;;  %v2328_v15 = vpack.c.bf16 %v373_v14, %v372_v13  ;;  %v503_v14 = vld [vmem:[#allocation7 + $0x140] sm:$0xff] }
  0x82   :  { %2285 = vmatprep.subr.bf16.mxu0 %v2284_v18 }
  0x83   :  { %2311 = vmatpush3.bf16.msra.mxu1 %v2308_v38 }
  0x84   :  { %2313 = vmatprep.subr.bf16.mxu1 %v2312_v40 }
  0x85   :  { %2287 = vmatpush3.bf16.msra.mxu0 %v2284_v18  ;;  %v2332_v18 = vpack.c.bf16 %v375_v17, %v374_v16  ;;  %v505_v17 = vld [vmem:[#allocation7 + $0x150] sm:$0xff] }
  0x86   :  { %2289 = vmatprep.subr.bf16.mxu0 %v2288_v21 }
  0x87   :  { %2315 = vmatpush3.bf16.msra.mxu1 %v2312_v40 }
  0x88   :  { %2317 = vmatprep.subr.bf16.mxu1 %v2316_v43 }
  0x89   :  { %2291 = vmatpush3.bf16.msra.mxu0 %v2288_v21  ;;  %v2336_v21 = vpack.c.bf16 %v377_v20, %v376_v19  ;;  %v507_v20 = vld [vmem:[#allocation7 + $0x160] sm:$0xff] }
  0x8a   :  { %2293 = vmatprep.subr.bf16.mxu0 %v2292_v24 }
  0x8b   :  { %2319 = vmatpush3.bf16.msra.mxu1 %v2316_v43 }
  0x8c   :  { %2321 = vmatprep.subr.bf16.mxu1 %v2320_v46 }
  0x8d   :  { %2295 = vmatpush3.bf16.msra.mxu0 %v2292_v24  ;;  %v2340_v24 = vpack.c.bf16 %v379_v23, %v378_v22  ;;  %v509_v23 = vld [vmem:[#allocation7 + $0x170] sm:$0xff] }
  0x8e   :  { %2329 = vmatprep.subr.bf16.mxu0 %v2328_v15 }
  0x8f   :  { %2323 = vmatpush3.bf16.msra.mxu1 %v2320_v46 }
  0x90   :  { %1877 = vmatmul.mubr.f32.vlgmr.msra.gmra.mrb[0].mxu0 %v128_v25  ;;  %2325 = vmatprep.subr.bf16.mxu1 %v2324_v49  ;;  %v380_v25 = vld [vmem:[#allocation7 + $0xc0] sm:$0xff] }
  0x91   :  { %2331 = vmatpush3.bf16.msra.mxu0 %v2328_v15  ;;  %v2344_v27 = vpack.c.bf16 %v381_v26, %v380_v25  ;;  %v504_v15 = vld [vmem:[#allocation7 + $0x148] sm:$0xff]  ;;  %v1601_v26 = vld [vmem:[%s3227_s5 + $0x1] ss:$0 sm:$0xff] }
  0x92   :  { %2333 = vmatprep.subr.bf16.mxu0 %v2332_v18  ;;  %v2376_v16 = vpack.c.bf16 %v504_v15, %v503_v14  ;;  %v1604_v15 = vld [vmem:[%s3227_s5 + $0x2] ss:$0 sm:$0xff] }
  0x93   :  { %2327 = vmatpush3.bf16.msra.mxu1 %v2324_v49 }
  0x95   :  { %2335 = vmatpush3.bf16.msra.mxu0 %v2332_v18  ;;  %v506_v18 = vld [vmem:[#allocation7 + $0x158] sm:$0xff] }
  0x96   :  { %2337 = vmatprep.subr.bf16.mxu0 %v2336_v21  ;;  %v2380_v19 = vpack.c.bf16 %v506_v18, %v505_v17 }
  0x99   :  { %2339 = vmatpush3.bf16.msra.mxu0 %v2336_v21  ;;  %v508_v21 = vld [vmem:[#allocation7 + $0x168] sm:$0xff] }
  0x9a   :  { %2341 = vmatprep.subr.bf16.mxu0 %v2340_v24  ;;  %v2384_v22 = vpack.c.bf16 %v508_v21, %v507_v20 }
  0x9d   :  { %2343 = vmatpush3.bf16.msra.mxu0 %v2340_v24  ;;  %v510_v24 = vld [vmem:[#allocation7 + $0x178] sm:$0xff] }
  0x9e   :  { %2345 = vmatprep.subr.bf16.mxu0 %v2344_v27  ;;  %v2388_v25 = vpack.c.bf16 %v510_v24, %v509_v23 }
  0xa1   :  { %2347 = vmatpush3.bf16.msra.mxu0 %v2344_v27 }
  0xa2   :  { %2349 = vmatprep.subr.bf16.mxu0 %v2348_v30 }
  0xa5   :  { %2351 = vmatpush3.bf16.msra.mxu0 %v2348_v30 }
  0xa6   :  { %2353 = vmatprep.subr.bf16.mxu0 %v2352_v33 }
  0xa9   :  { %2355 = vmatpush3.bf16.msra.mxu0 %v2352_v33 }
  0xaa   :  { %2357 = vmatprep.subr.bf16.mxu0 %v2356_v36 }
  0xad   :  { %2359 = vmatpush3.bf16.msra.mxu0 %v2356_v36 }
 0x163   :  { %v1878_v51 = vpop.f32.mrb[0].mxu0 }
 0x164   :  { %v224_v52 = vadd.f32 %v1878_v51, %v1595_v50  ;;  %v218_v53 = vpop.f32.mrb[1].mxu0 }
 0x165   :  { %v219_v54 = vadd.f32 %v1595_v50, %v218_v53 }
 0x166   :  { %v228_v55 = vmin.f32 %v224_v52, 20.0  ;;  %vm246_vm1 = vcmp.gt.f32.partialorder %v224_v52, 20.0 }
 0x167   :  { %v227_v56 = vmin.f32 %v219_v54, 20.0  ;;  %vm245_vm0 = vcmp.gt.f32.partialorder %v219_v54, 20.0 }
 0x168   :  { %v231_v57 = vmul.f32 1.442695, %v228_v55 }
 0x169   :  { %v229_v58 = vmul.f32 1.442695, %v227_v56 }
 0x16a   :  { %2658 = vpow2.f32 %v231_v57 }
 0x16b   :  { %2660 = vpow2.f32 %v229_v58 }
 0x174   :  { %v2659_v59 = vpop.eup %2658 }
 0x175   :  { %v2661_v60 = vpop.eup %2660  ;;  %v234_v61 = vadd.f32 1.0, %v2659_v59 }
 0x176   :  { %v233_v62 = vadd.f32 1.0, %v2661_v60 }
 0x177   :  { %v236_v63 = vmul.f32 %v234_v61, %v234_v61 }
 0x178   :  { %v235_v0 = vmul.f32 %v233_v62, %v233_v62 }
 0x179   :  { %v240_v1 = vadd.f32 1.0, %v236_v63  ;;  %v1597_v3 = vadd.f32 -1.0, %v236_v63 }
 0x17a   :  { %v239_v2 = vadd.f32 1.0, %v235_v0  ;;  %v1596_v5 = vadd.f32 -1.0, %v235_v0  ;;  %v495_v0 = vld [vmem:[#allocation7 + $0x100] sm:$0xff] }
 0x17b   :  { %2662 = vrcp.f32 %v240_v1  ;;  %v496_v1 = vld [vmem:[#allocation7 + $0x108] sm:$0xff] }
 0x17c   :  { %2664 = vrcp.f32 %v239_v2  ;;  %v2360_v2 = vpack.c.bf16 %v496_v1, %v495_v0  ;;  %v624_v1 = vld [vmem:[#allocation7 + $0x1c0] sm:$0xff] }
 0x17e   :  { %2361 = vmatprep.subr.bf16.mxu1 %v2360_v2 }
 0x185   :  { %v2663_v4 = vpop.eup %2662 }
 0x186   :  { %v2665_v6 = vpop.eup %2664  ;;  %v244_v7 = vmul.f32 %v2663_v4, %v1597_v3  ;;  %v497_v3 = vld [vmem:[#allocation7 + $0x110] sm:$0xff]  ;;  %v498_v4 = vld [vmem:[#allocation7 + $0x118] sm:$0xff] }
 0x187   :  { %v242_v8 = vmul.f32 %v2665_v6, %v1596_v5  ;;  %v2364_v5 = vpack.c.bf16 %v498_v4, %v497_v3  ;;  %v499_v6 = vld [vmem:[#allocation7 + $0x120] sm:$0xff]  ;;  %v626_v4 = vld [vmem:[#allocation7 + $0x1d0] sm:$0xff] }
 0x188   :  { %v248_v9 = vmul.f32 %v244_v7, %v224_v52  ;;  %v500_v7 = vld [vmem:[#allocation7 + $0x128] sm:$0xff] }
 0x189   :  { %v247_v10 = vmul.f32 %v242_v8, %v219_v54  ;;  %v2368_v8 = vpack.c.bf16 %v500_v7, %v499_v6  ;;  %v628_v7 = vld [vmem:[#allocation7 + $0x1e0] sm:$0xff] }
 0x18a   :  { %v3127_v12 = vsel %vm246_vm1, %v224_v52, %v248_v9  ;;  %v501_v9 = vld [vmem:[#allocation7 + $0x130] sm:$0xff] }
 0x18b   :  { %v3124_v11 = vsel %vm245_vm0, %v219_v54, %v247_v10  ;;  %v502_v10 = vld [vmem:[#allocation7 + $0x138] sm:$0xff] }
 0x18c   :  { %1911 = vmatprep.mubr.f32.mxu1 %v3124_v11  ;;  %v2372_v13 = vpack.c.bf16 %v502_v10, %v501_v9  ;;  %v630_v10 = vld [vmem:[#allocation7 + $0x1f0] sm:$0xff] }
 0x18d   :  { %1912 = vmatmul.mubr.f32.vlgmr.msra.gmra.mrb[0].mxu1 %v3127_v12 }
 0x18e   :  { %2363 = vmatpush3.bf16.msra.mxu1 %v2360_v2  ;;  %v625_v2 = vld [vmem:[#allocation7 + $0x1c8] sm:$0xff] }
 0x18f   :  { %2365 = vmatprep.subr.bf16.mxu1 %v2364_v5  ;;  %v2408_v3 = vpack.c.bf16 %v625_v2, %v624_v1  ;;  %v847_v2 = vld [vmem:[#allocation10] sm:$0xff] }
 0x192   :  { %2367 = vmatpush3.bf16.msra.mxu1 %v2364_v5  ;;  %v627_v5 = vld [vmem:[#allocation7 + $0x1d8] sm:$0xff] }
 0x193   :  { %2369 = vmatprep.subr.bf16.mxu1 %v2368_v8  ;;  %v2412_v6 = vpack.c.bf16 %v627_v5, %v626_v4  ;;  %v849_v4 = vld [vmem:[#allocation10 + $0x10] sm:$0xff] }
 0x196   :  { %2371 = vmatpush3.bf16.msra.mxu1 %v2368_v8  ;;  %v629_v8 = vld [vmem:[#allocation7 + $0x1e8] sm:$0xff] }
 0x197   :  { %2373 = vmatprep.subr.bf16.mxu1 %v2372_v13  ;;  %v2416_v9 = vpack.c.bf16 %v629_v8, %v628_v7  ;;  %v851_v8 = vld [vmem:[#allocation10 + $0x20] sm:$0xff] }
 0x19a   :  { %2375 = vmatpush3.bf16.msra.mxu1 %v2372_v13  ;;  %v631_v13 = vld [vmem:[#allocation7 + $0x1f8] sm:$0xff] }
 0x19b   :  { %2377 = vmatprep.subr.bf16.mxu1 %v2376_v16  ;;  %v2420_v14 = vpack.c.bf16 %v631_v13, %v630_v10  ;;  %v853_v13 = vld [vmem:[#allocation10 + $0x30] sm:$0xff] }
 0x19e   :  { %2379 = vmatpush3.bf16.msra.mxu1 %v2376_v16 }
 0x19f   :  { %2381 = vmatprep.subr.bf16.mxu1 %v2380_v19 }
 0x1a2   :  { %2383 = vmatpush3.bf16.msra.mxu1 %v2380_v19 }
 0x1a3   :  { %2385 = vmatprep.subr.bf16.mxu1 %v2384_v22 }
 0x1a6   :  { %2387 = vmatpush3.bf16.msra.mxu1 %v2384_v22 }
 0x1a7   :  { %2389 = vmatprep.subr.bf16.mxu1 %v2388_v25 }
 0x1aa   :  { %2391 = vmatpush3.bf16.msra.mxu1 %v2388_v25 }
 0x260   :  { %v1913_v38 = vpop.f32.mrb[0].mxu1 }
 0x261   :  { %v344_v39 = vadd.f32 %v1913_v38, %v1598_v37  ;;  %v338_v40 = vpop.f32.mrb[1].mxu1 }
 0x262   :  { %v339_v41 = vadd.f32 %v1598_v37, %v338_v40 }
 0x263   :  { %v348_v42 = vmin.f32 %v344_v39, 20.0  ;;  %vm366_vm3 = vcmp.gt.f32.partialorder %v344_v39, 20.0 }
 0x264   :  { %v347_v43 = vmin.f32 %v339_v41, 20.0  ;;  %vm365_vm2 = vcmp.gt.f32.partialorder %v339_v41, 20.0 }
 0x265   :  { %v351_v44 = vmul.f32 1.442695, %v348_v42 }
 0x266   :  { %v349_v45 = vmul.f32 1.442695, %v347_v43 }
 0x267   :  { %2666 = vpow2.f32 %v351_v44 }
 0x268   :  { %2668 = vpow2.f32 %v349_v45 }
 0x271   :  { %v2667_v46 = vpop.eup %2666 }
 0x272   :  { %v2669_v47 = vpop.eup %2668  ;;  %v354_v48 = vadd.f32 1.0, %v2667_v46 }
 0x273   :  { %v353_v49 = vadd.f32 1.0, %v2669_v47 }
 0x274   :  { %v356_v50 = vmul.f32 %v354_v48, %v354_v48 }
 0x275   :  { %v355_v51 = vmul.f32 %v353_v49, %v353_v49 }
 0x276   :  { %v360_v52 = vadd.f32 1.0, %v356_v50  ;;  %v1600_v54 = vadd.f32 -1.0, %v356_v50 }
 0x277   :  { %v359_v53 = vadd.f32 1.0, %v355_v51  ;;  %v1599_v56 = vadd.f32 -1.0, %v355_v51 }
 0x278   :  { %2670 = vrcp.f32 %v360_v52 }
 0x279   :  { %2672 = vrcp.f32 %v359_v53 }
 0x282   :  { %v2671_v55 = vpop.eup %2670 }
 0x283   :  { %v2673_v57 = vpop.eup %2672  ;;  %v364_v58 = vmul.f32 %v2671_v55, %v1600_v54  ;;  %v616_v55 = vld [vmem:[#allocation7 + $0x180] sm:$0xff] }
 0x284   :  { %v362_v59 = vmul.f32 %v2673_v57, %v1599_v56  ;;  %v617_v56 = vld [vmem:[#allocation7 + $0x188] sm:$0xff] }
 0x285   :  { %v368_v60 = vmul.f32 %v364_v58, %v344_v39  ;;  %v2392_v57 = vpack.c.bf16 %v617_v56, %v616_v55  ;;  %v618_v58 = vld [vmem:[#allocation7 + $0x190] sm:$0xff]  ;;  %v746_v56 = vld [vmem:[#allocation8 + $0x40] sm:$0xff] }
 0x286   :  { %v367_v61 = vmul.f32 %v362_v59, %v339_v41  ;;  %v619_v59 = vld [vmem:[#allocation7 + $0x198] sm:$0xff] }
 0x287   :  { %v370_v63 = vsel %vm366_vm3, %v344_v39, %v368_v60  ;;  %2393 = vmatprep.subr.bf16.mxu0 %v2392_v57  ;;  %v2396_v60 = vpack.c.bf16 %v619_v59, %v618_v58  ;;  %v748_v59 = vld [vmem:[#allocation8 + $0x50] sm:$0xff] }
 0x288   :  { %v369_v62 = vsel %vm365_vm2, %v339_v41, %v367_v61  ;;  %v620_v61 = vld [vmem:[#allocation7 + $0x1a0] sm:$0xff] }
 0x289   :  { %1946 = vmatprep.mubr.f32.mxu0 %v369_v62 }
 0x28a   :  { %1947 = vmatmul.mubr.f32.vlgmr.msra.gmra.mrb[2].mxu0 %v370_v63  ;;  %v623_v63 = vld [vmem:[#allocation7 + $0x1b8] sm:$0xff] }
 0x28b   :  { %2395 = vmatpush3.bf16.msra.mxu0 %v2392_v57  ;;  %v747_v57 = vld [vmem:[#allocation8 + $0x48] sm:$0xff] }
 0x28c   :  { %2397 = vmatprep.subr.bf16.mxu0 %v2396_v60  ;;  %v2440_v58 = vpack.c.bf16 %v747_v57, %v746_v56  ;;  %v861_v56 = vld [vmem:[#allocation10 + $0x70] sm:$0xff]  ;;  %v862_v57 = vld [vmem:[#allocation10 + $0x78] sm:$0xff] }
 0x28f   :  { %2399 = vmatpush3.bf16.msra.mxu0 %v2396_v60  ;;  %v749_v60 = vld [vmem:[#allocation8 + $0x58] sm:$0xff] }
 0x35d   :  { %v1948_v27 = vpop.f32.mrb[2].mxu0 }
 0x35e   :  { %v465_v28 = vadd.f32 %v1948_v27, %v1601_v26  ;;  %v459_v29 = vpop.f32.mrb[3].mxu0 }
 0x35f   :  { %v460_v30 = vadd.f32 %v1601_v26, %v459_v29 }
 0x360   :  { %v469_v31 = vmin.f32 %v465_v28, 20.0  ;;  %vm487_vm4 = vcmp.gt.f32.partialorder %v465_v28, 20.0 }
 0x361   :  { %v468_v32 = vmin.f32 %v460_v30, 20.0  ;;  %vm486_vm5 = vcmp.gt.f32.partialorder %v460_v30, 20.0 }
 0x362   :  { %v472_v33 = vmul.f32 1.442695, %v469_v31 }
 0x363   :  { %v470_v34 = vmul.f32 1.442695, %v468_v32 }
 0x364   :  { %2674 = vpow2.f32 %v472_v33 }
 0x365   :  { %2676 = vpow2.f32 %v470_v34 }
 0x36e   :  { %v2675_v35 = vpop.eup %2674 }
 0x36f   :  { %v2677_v36 = vpop.eup %2676  ;;  %v475_v37 = vadd.f32 1.0, %v2675_v35 }
 0x370   :  { %v474_v38 = vadd.f32 1.0, %v2677_v36 }
 0x371   :  { %v477_v39 = vmul.f32 %v475_v37, %v475_v37 }
 0x372   :  { %v476_v40 = vmul.f32 %v474_v38, %v474_v38 }
 0x373   :  { %v481_v41 = vadd.f32 1.0, %v477_v39  ;;  %v1603_v43 = vadd.f32 -1.0, %v477_v39 }
 0x374   :  { %v480_v42 = vadd.f32 1.0, %v476_v40  ;;  %v1602_v45 = vadd.f32 -1.0, %v476_v40 }
 0x375   :  { %2678 = vrcp.f32 %v481_v41 }
 0x376   :  { %2680 = vrcp.f32 %v480_v42  ;;  %v738_v42 = vld [vmem:[#allocation8] sm:$0xff] }
 0x37f   :  { %v2679_v44 = vpop.eup %2678 }
 0x380   :  { %v2681_v46 = vpop.eup %2680  ;;  %v485_v47 = vmul.f32 %v2679_v44, %v1603_v43  ;;  %v739_v43 = vld [vmem:[#allocation8 + $0x8] sm:$0xff] }
 0x381   :  { %v483_v48 = vmul.f32 %v2681_v46, %v1602_v45  ;;  %v2424_v44 = vpack.c.bf16 %v739_v43, %v738_v42  ;;  %v740_v45 = vld [vmem:[#allocation8 + $0x10] sm:$0xff]  ;;  %v741_v46 = vld [vmem:[#allocation8 + $0x18] sm:$0xff] }
 0x382   :  { %v489_v49 = vmul.f32 %v485_v47, %v465_v28  ;;  %v2428_v47 = vpack.c.bf16 %v741_v46, %v740_v45 }
 0x383   :  { %v488_v50 = vmul.f32 %v483_v48, %v460_v30  ;;  %2425 = vmatprep.subr.bf16.mxu1 %v2424_v44  ;;  %v742_v48 = vld [vmem:[#allocation8 + $0x20] sm:$0xff] }
 0x384   :  { %v491_v51 = vsel %vm487_vm4, %v465_v28, %v489_v49  ;;  %v743_v49 = vld [vmem:[#allocation8 + $0x28] sm:$0xff] }
 0x385   :  { %v490_v52 = vsel %vm486_vm5, %v460_v30, %v488_v50  ;;  %v3140_v54 = vadd.f32 %v491_v51, %v3127_v12  ;;  %v622_v12 = vld [vmem:[#allocation7 + $0x1b0] sm:$0xff]  ;;  %v2432_v50 = vpack.c.bf16 %v743_v49, %v742_v48 }
 0x386   :  { %v3137_v53 = vadd.f32 %v490_v52, %v3124_v11  ;;  %v621_v11 = vld [vmem:[#allocation7 + $0x1a8] sm:$0xff]  ;;  %v2404_v0 = vpack.c.bf16 %v623_v63, %v622_v12  ;;  %v744_v51 = vld [vmem:[#allocation8 + $0x30] sm:$0xff]  ;;  %v745_v52 = vld [vmem:[#allocation8 + $0x38] sm:$0xff] }
 0x387   :  { %v2400_v62 = vpack.c.bf16 %v621_v11, %v620_v61  ;;  %v2436_v55 = vpack.c.bf16 %v745_v52, %v744_v51  ;;  %v2444_v61 = vpack.c.bf16 %v749_v60, %v748_v59  ;;  %v750_v11 = vld [vmem:[#allocation8 + $0x60] sm:$0xff]  ;;  %v752_v63 = vld [vmem:[#allocation8 + $0x70] sm:$0xff] }
 0x388   :  { %1981 = vmatprep.mubr.f32.mxu1 %v3137_v53  ;;  %v1610_v59 = vld [vmem:[%s3229_s7] ss:$0 sm:$0xff] }
 0x389   :  { %1982 = vmatmul.mubr.f32.vlgmr.msra.gmra.mrb[2].mxu1 %v3140_v54  ;;  %2401 = vmatprep.subr.bf16.mxu0 %v2400_v62 }
 0x38a   :  { %2403 = vmatpush3.bf16.msra.mxu0 %v2400_v62  ;;  %2427 = vmatpush3.bf16.msra.mxu1 %v2424_v44  ;;  %v751_v62 = vld [vmem:[#allocation8 + $0x68] sm:$0xff] }
 0x38b   :  { %2405 = vmatprep.subr.bf16.mxu0 %v2404_v0  ;;  %2429 = vmatprep.subr.bf16.mxu1 %v2428_v47  ;;  %v2448_v12 = vpack.c.bf16 %v751_v62, %v750_v11 }
 0x38e   :  { %2407 = vmatpush3.bf16.msra.mxu0 %v2404_v0  ;;  %2431 = vmatpush3.bf16.msra.mxu1 %v2428_v47  ;;  %v753_v0 = vld [vmem:[#allocation8 + $0x78] sm:$0xff] }
 0x38f   :  { %2409 = vmatprep.subr.bf16.mxu0 %v2408_v3  ;;  %2433 = vmatprep.subr.bf16.mxu1 %v2432_v50  ;;  %v2452_v1 = vpack.c.bf16 %v753_v0, %v752_v63  ;;  %v970_v63 = vld [vmem:[#allocation7 + $0x200] sm:$0xff]  ;;  %v971_v0 = vld [vmem:[#allocation7 + $0x208] sm:$0xff] }
 0x392   :  { %2411 = vmatpush3.bf16.msra.mxu0 %v2408_v3  ;;  %2435 = vmatpush3.bf16.msra.mxu1 %v2432_v50  ;;  %v848_v3 = vld [vmem:[#allocation10 + $0x8] sm:$0xff] }
 0x393   :  { %2413 = vmatprep.subr.bf16.mxu0 %v2412_v6  ;;  %2437 = vmatprep.subr.bf16.mxu1 %v2436_v55  ;;  %v2456_v5 = vpack.c.bf16 %v848_v3, %v847_v2  ;;  %v972_v2 = vld [vmem:[#allocation7 + $0x210] sm:$0xff]  ;;  %v973_v3 = vld [vmem:[#allocation7 + $0x218] sm:$0xff] }
 0x396   :  { %2415 = vmatpush3.bf16.msra.mxu0 %v2412_v6  ;;  %2439 = vmatpush3.bf16.msra.mxu1 %v2436_v55  ;;  %v850_v6 = vld [vmem:[#allocation10 + $0x18] sm:$0xff] }
 0x397   :  { %2417 = vmatprep.subr.bf16.mxu0 %v2416_v9  ;;  %2441 = vmatprep.subr.bf16.mxu1 %v2440_v58  ;;  %v2460_v7 = vpack.c.bf16 %v850_v6, %v849_v4  ;;  %v2492_v4 = vpack.c.bf16 %v973_v3, %v972_v2  ;;  %v975_v6 = vld [vmem:[#allocation7 + $0x228] sm:$0xff]  ;;  %v1102_v2 = vld [vmem:[#allocation7 + $0x2d8] sm:$0xff] }
 0x39a   :  { %2419 = vmatpush3.bf16.msra.mxu0 %v2416_v9  ;;  %2443 = vmatpush3.bf16.msra.mxu1 %v2440_v58  ;;  %v852_v9 = vld [vmem:[#allocation10 + $0x28] sm:$0xff]  ;;  %v2484_v58 = vpack.c.bf16 %v862_v57, %v861_v56  ;;  %v1093_v57 = vld [vmem:[#allocation7 + $0x290] sm:$0xff] }
 0x39b   :  { %2421 = vmatprep.subr.bf16.mxu0 %v2420_v14  ;;  %2445 = vmatprep.subr.bf16.mxu1 %v2444_v61  ;;  %v2464_v10 = vpack.c.bf16 %v852_v9, %v851_v8  ;;  %v976_v8 = vld [vmem:[#allocation7 + $0x230] sm:$0xff]  ;;  %v977_v9 = vld [vmem:[#allocation7 + $0x238] sm:$0xff] }
 0x39e   :  { %2423 = vmatpush3.bf16.msra.mxu0 %v2420_v14  ;;  %2447 = vmatpush3.bf16.msra.mxu1 %v2444_v61  ;;  %v854_v14 = vld [vmem:[#allocation10 + $0x38] sm:$0xff]  ;;  %v1611_v61 = vld [vmem:[%s3223_s1] ss:$0 sm:$0xff] }
 0x39f   :  { %2449 = vmatprep.subr.bf16.mxu1 %v2448_v12  ;;  %2457 = vmatprep.subr.bf16.mxu0 %v2456_v5 }
 0x3a2   :  { %2451 = vmatpush3.bf16.msra.mxu1 %v2448_v12 }
 0x3a3   :  { %2453 = vmatprep.subr.bf16.mxu1 %v2452_v1 }
 0x3a6   :  { %2455 = vmatpush3.bf16.msra.mxu1 %v2452_v1  ;;  %v2488_v1 = vpack.c.bf16 %v971_v0, %v970_v63  ;;  %v1100_v63 = vld [vmem:[#allocation7 + $0x2c8] sm:$0xff] }
 0x3a8   :  { %2489 = vmatprep.subr.bf16.mxu1 %v2488_v1 }
 0x45c   :  { %v1983_v16 = vpop.f32.mrb[2].mxu1 }
 0x45d   :  { %v588_v17 = vadd.f32 %v1983_v16, %v1604_v15  ;;  %v582_v18 = vpop.f32.mrb[3].mxu1  ;;  %v855_v16 = vld [vmem:[#allocation10 + $0x40] sm:$0xff] }
 0x45e   :  { %v583_v19 = vadd.f32 %v1604_v15, %v582_v18  ;;  %v2468_v15 = vpack.c.bf16 %v854_v14, %v853_v13  ;;  %v978_v13 = vld [vmem:[#allocation7 + $0x240] sm:$0xff]  ;;  %v979_v14 = vld [vmem:[#allocation7 + $0x248] sm:$0xff] }
 0x45f   :  { %v592_v20 = vmin.f32 %v588_v17, 20.0  ;;  %vm610_vm7 = vcmp.gt.f32.partialorder %v588_v17, 20.0 }
 0x460   :  { %v591_v21 = vmin.f32 %v583_v19, 20.0  ;;  %vm609_vm6 = vcmp.gt.f32.partialorder %v583_v19, 20.0 }
 0x461   :  { %v595_v22 = vmul.f32 1.442695, %v592_v20  ;;  %v858_v20 = vld [vmem:[#allocation10 + $0x58] sm:$0xff] }
 0x462   :  { %v593_v23 = vmul.f32 1.442695, %v591_v21 }
 0x463   :  { %2682 = vpow2.f32 %v595_v22  ;;  %v859_v22 = vld [vmem:[#allocation10 + $0x60] sm:$0xff] }
 0x464   :  { %2684 = vpow2.f32 %v593_v23  ;;  %v860_v23 = vld [vmem:[#allocation10 + $0x68] sm:$0xff] }
 0x46d   :  { %v2683_v24 = vpop.eup %2682 }
 0x46e   :  { %v2685_v25 = vpop.eup %2684  ;;  %v598_v26 = vadd.f32 1.0, %v2683_v24  ;;  %v2480_v24 = vpack.c.bf16 %v860_v23, %v859_v22  ;;  %v984_v22 = vld [vmem:[#allocation7 + $0x270] sm:$0xff]  ;;  %v985_v23 = vld [vmem:[#allocation7 + $0x278] sm:$0xff] }
 0x46f   :  { %v597_v27 = vadd.f32 1.0, %v2685_v25  ;;  %v1607_v25 = vld [vmem:[%s3227_s5 + $0x3] ss:$0 sm:$0xff] }
 0x470   :  { %v600_v28 = vmul.f32 %v598_v26, %v598_v26 }
 0x471   :  { %v599_v29 = vmul.f32 %v597_v27, %v597_v27 }
 0x472   :  { %v604_v30 = vadd.f32 1.0, %v600_v28  ;;  %v1606_v32 = vadd.f32 -1.0, %v600_v28 }
 0x473   :  { %v603_v31 = vadd.f32 1.0, %v599_v29  ;;  %v1605_v34 = vadd.f32 -1.0, %v599_v29 }
 0x474   :  { %2686 = vrcp.f32 %v604_v30 }
 0x475   :  { %2688 = vrcp.f32 %v603_v31 }
 0x47e   :  { %v2687_v33 = vpop.eup %2686 }
 0x47f   :  { %v2689_v35 = vpop.eup %2688  ;;  %v608_v36 = vmul.f32 %v2687_v33, %v1606_v32 }
 0x480   :  { %v606_v37 = vmul.f32 %v2689_v35, %v1605_v34 }
 0x481   :  { %v612_v38 = vmul.f32 %v608_v36, %v588_v17 }
 0x482   :  { %v611_v39 = vmul.f32 %v606_v37, %v583_v19 }
 0x483   :  { %v614_v41 = vsel %vm610_vm7, %v588_v17, %v612_v38  ;;  %v856_v17 = vld [vmem:[#allocation10 + $0x48] sm:$0xff] }
 0x484   :  { %v613_v40 = vsel %vm609_vm6, %v583_v19, %v611_v39  ;;  %v2472_v18 = vpack.c.bf16 %v856_v17, %v855_v16  ;;  %v857_v19 = vld [vmem:[#allocation10 + $0x50] sm:$0xff]  ;;  %v981_v17 = vld [vmem:[#allocation7 + $0x258] sm:$0xff] }
 0x485   :  { %2016 = vmatprep.mubr.f32.mxu0 %v613_v40  ;;  %v2476_v21 = vpack.c.bf16 %v858_v20, %v857_v19  ;;  %v980_v16 = vld [vmem:[#allocation7 + $0x250] sm:$0xff]  ;;  %v982_v19 = vld [vmem:[#allocation7 + $0x260] sm:$0xff]  ;;  %v983_v20 = vld [vmem:[#allocation7 + $0x268] sm:$0xff] }
 0x486   :  { %2017 = vmatmul.mubr.f32.vlgmr.msra.gmra.mrb[4].mxu0 %v614_v41 }
 0x487   :  { %2459 = vmatpush3.bf16.msra.mxu0 %v2456_v5  ;;  %v974_v5 = vld [vmem:[#allocation7 + $0x220] sm:$0xff] }
 0x488   :  { %2461 = vmatprep.subr.bf16.mxu0 %v2460_v7 }
 0x48b   :  { %2463 = vmatpush3.bf16.msra.mxu0 %v2460_v7  ;;  %v2496_v7 = vpack.c.bf16 %v975_v6, %v974_v5  ;;  %v1104_v5 = vld [vmem:[#allocation7 + $0x2e8] sm:$0xff] }
 0x48c   :  { %2465 = vmatprep.subr.bf16.mxu0 %v2464_v10 }
 0x48f   :  { %2467 = vmatpush3.bf16.msra.mxu0 %v2464_v10  ;;  %v2500_v10 = vpack.c.bf16 %v977_v9, %v976_v8  ;;  %v1106_v8 = vld [vmem:[#allocation7 + $0x2f8] sm:$0xff] }
 0x490   :  { %2469 = vmatprep.subr.bf16.mxu0 %v2468_v15 }
 0x493   :  { %2471 = vmatpush3.bf16.msra.mxu0 %v2468_v15  ;;  %v2504_v15 = vpack.c.bf16 %v979_v14, %v978_v13 }
 0x494   :  { %2473 = vmatprep.subr.bf16.mxu0 %v2472_v18 }
 0x497   :  { %2475 = vmatpush3.bf16.msra.mxu0 %v2472_v18  ;;  %v2508_v18 = vpack.c.bf16 %v981_v17, %v980_v16 }
 0x498   :  { %2477 = vmatprep.subr.bf16.mxu0 %v2476_v21 }
 0x49b   :  { %2479 = vmatpush3.bf16.msra.mxu0 %v2476_v21  ;;  %v2512_v21 = vpack.c.bf16 %v983_v20, %v982_v19 }
 0x49c   :  { %2481 = vmatprep.subr.bf16.mxu0 %v2480_v24 }
 0x49f   :  { %2483 = vmatpush3.bf16.msra.mxu0 %v2480_v24  ;;  %v2516_v24 = vpack.c.bf16 %v985_v23, %v984_v22 }
 0x4a0   :  { %2485 = vmatprep.subr.bf16.mxu0 %v2484_v58 }
 0x4a3   :  { %2487 = vmatpush3.bf16.msra.mxu0 %v2484_v58  ;;  %v1094_v58 = vld [vmem:[#allocation7 + $0x298] sm:$0xff] }
 0x559   :  { %v2018_v26 = vpop.f32.mrb[4].mxu0 }
 0x55a   :  { %v709_v27 = vadd.f32 %v2018_v26, %v1607_v25  ;;  %v703_v28 = vpop.f32.mrb[5].mxu0 }
 0x55b   :  { %v704_v29 = vadd.f32 %v1607_v25, %v703_v28  ;;  %v1612_v25 = vld [vmem:[%s3231_s9] ss:$0 sm:$0xff] }
 0x55c   :  { %v713_v30 = vmin.f32 %v709_v27, 20.0  ;;  %vm731_vm8 = vcmp.gt.f32.partialorder %v709_v27, 20.0 }
 0x55d   :  { %v712_v31 = vmin.f32 %v704_v29, 20.0  ;;  %vm730_vm9 = vcmp.gt.f32.partialorder %v704_v29, 20.0 }
 0x55e   :  { %v716_v32 = vmul.f32 1.442695, %v713_v30 }
 0x55f   :  { %v714_v33 = vmul.f32 1.442695, %v712_v31 }
 0x560   :  { %2690 = vpow2.f32 %v716_v32 }
 0x561   :  { %2692 = vpow2.f32 %v714_v33 }
 0x56a   :  { %v2691_v34 = vpop.eup %2690 }
 0x56b   :  { %v2693_v35 = vpop.eup %2692  ;;  %v719_v36 = vadd.f32 1.0, %v2691_v34 }
 0x56c   :  { %v718_v37 = vadd.f32 1.0, %v2693_v35 }
 0x56d   :  { %v721_v38 = vmul.f32 %v719_v36, %v719_v36 }
 0x56e   :  { %v720_v39 = vmul.f32 %v718_v37, %v718_v37 }
 0x56f   :  { %v725_v40 = vadd.f32 1.0, %v721_v38  ;;  %v1609_v42 = vadd.f32 -1.0, %v721_v38 }
 0x570   :  { %v724_v41 = vadd.f32 1.0, %v720_v39  ;;  %v1608_v44 = vadd.f32 -1.0, %v720_v39 }
 0x571   :  { %2694 = vrcp.f32 %v725_v40 }
 0x572   :  { %2696 = vrcp.f32 %v724_v41 }
 0x57b   :  { %v2695_v43 = vpop.eup %2694 }
 0x57c   :  { %v2697_v45 = vpop.eup %2696  ;;  %v729_v46 = vmul.f32 %v2695_v43, %v1609_v42 }
 0x57d   :  { %v727_v47 = vmul.f32 %v2697_v45, %v1608_v44 }
 0x57e   :  { %v733_v48 = vmul.f32 %v729_v46, %v709_v27 }
 0x57f   :  { %v732_v49 = vmul.f32 %v727_v47, %v704_v29 }
 0x580   :  { %v735_v50 = vsel %vm731_vm8, %v709_v27, %v733_v48 }
 0x581   :  { %v734_v51 = vsel %vm730_vm9, %v704_v29, %v732_v49  ;;  %v737_v55 = vadd.f32 %v735_v50, %v3140_v54 }
 0x582   :  { %v736_v52 = vadd.f32 %v734_v51, %v3137_v53 }
 0x584   :  { %2051 = vmatprep.mubr.f32.mxu1 %v736_v52  ;;  %v1091_v52 = vld [vmem:[#allocation7 + $0x280] sm:$0xff] }
 0x585   :  { %2052 = vmatmul.mubr.f32.vlgmr.msra.gmra.mrb[4].mxu1 %v737_v55  ;;  %v1092_v55 = vld [vmem:[#allocation7 + $0x288] sm:$0xff] }
 0x586   :  { %2491 = vmatpush3.bf16.msra.mxu1 %v2488_v1  ;;  %v2520_v56 = vpack.c.bf16 %v1092_v55, %v1091_v52  ;;  %v1101_v1 = vld [vmem:[#allocation7 + $0x2d0] sm:$0xff]  ;;  %v1222_v55 = vld [vmem:[#allocation7 + $0x340] sm:$0xff] }
 0x587   :  { %2493 = vmatprep.subr.bf16.mxu1 %v2492_v4  ;;  %v2540_v3 = vpack.c.bf16 %v1102_v2, %v1101_v1 }
 0x588   :  { %2521 = vmatprep.subr.bf16.mxu0 %v2520_v56 }
 0x58a   :  { %2495 = vmatpush3.bf16.msra.mxu1 %v2492_v4  ;;  %v1103_v4 = vld [vmem:[#allocation7 + $0x2e0] sm:$0xff] }
 0x58b   :  { %2497 = vmatprep.subr.bf16.mxu1 %v2496_v7  ;;  %v2544_v6 = vpack.c.bf16 %v1104_v5, %v1103_v4 }
 0x58e   :  { %2499 = vmatpush3.bf16.msra.mxu1 %v2496_v7  ;;  %v1105_v7 = vld [vmem:[#allocation7 + $0x2f0] sm:$0xff] }
 0x58f   :  { %2501 = vmatprep.subr.bf16.mxu1 %v2500_v10  ;;  %v2548_v9 = vpack.c.bf16 %v1106_v8, %v1105_v7 }
 0x592   :  { %2503 = vmatpush3.bf16.msra.mxu1 %v2500_v10  ;;  %v1615_v10 = vld [vmem:[%s3227_s5 + $0x4] ss:$0 sm:$0xff] }
 0x593   :  { %2505 = vmatprep.subr.bf16.mxu1 %v2504_v15 }
 0x596   :  { %2507 = vmatpush3.bf16.msra.mxu1 %v2504_v15 }
 0x597   :  { %2509 = vmatprep.subr.bf16.mxu1 %v2508_v18 }
 0x59a   :  { %2511 = vmatpush3.bf16.msra.mxu1 %v2508_v18 }
 0x59b   :  { %2513 = vmatprep.subr.bf16.mxu1 %v2512_v21 }
 0x59e   :  { %2515 = vmatpush3.bf16.msra.mxu1 %v2512_v21 }
 0x59f   :  { %2517 = vmatprep.subr.bf16.mxu1 %v2516_v24 }
 0x5a2   :  { %2519 = vmatpush3.bf16.msra.mxu1 %v2516_v24 }
 0x658   :  { %v2053_v60 = vpop.f32.mrb[4].mxu1 }
 0x659   :  { %v833_v11 = vadd.f32 %v2053_v60, %v1610_v59  ;;  %v827_v53 = vpop.f32.mrb[5].mxu1  ;;  %v1095_v60 = vld [vmem:[#allocation7 + $0x2a0] sm:$0xff] }
 0x65a   :  { %v828_v62 = vadd.f32 %v1610_v59, %v827_v53  ;;  %v2524_v59 = vpack.c.bf16 %v1094_v58, %v1093_v57  ;;  %v1097_v53 = vld [vmem:[#allocation7 + $0x2b0] sm:$0xff] }
 0x65b   :  { %v844_v54 = vmin.f32 %v833_v11, %v1611_v61  ;;  %v1224_v58 = vld [vmem:[#allocation7 + $0x350] sm:$0xff] }
 0x65c   :  { %v843_v12 = vmin.f32 %v828_v62, %v1611_v61  ;;  %2086 = vmatprep.mubr.f32.mxu0 %v828_v62  ;;  %v1096_v61 = vld [vmem:[#allocation7 + $0x2a8] sm:$0xff]  ;;  %v1098_v62 = vld [vmem:[#allocation7 + $0x2b8] sm:$0xff] }
 0x65d   :  { %846 = vst [vmem:[#allocation14 + $0x8] sm:$0xff] %v844_v54  ;;  %2087 = vmatmul.mubr.f32.vlgmr.msra.gmra.mrb[6].mxu0 %v833_v11  ;;  %v2528_v11 = vpack.c.bf16 %v1096_v61, %v1095_v60  ;;  %v2532_v54 = vpack.c.bf16 %v1098_v62, %v1097_v53  ;;  %v1226_v61 = vld [vmem:[#allocation7 + $0x360] sm:$0xff]  ;;  %v1228_v62 = vld [vmem:[#allocation7 + $0x370] sm:$0xff] }
 0x65e   :  { %845 = vst [vmem:[#allocation14] sm:$0xff] %v843_v12  ;;  %2523 = vmatpush3.bf16.msra.mxu0 %v2520_v56  ;;  %v1099_v12 = vld [vmem:[#allocation7 + $0x2c0] sm:$0xff]  ;;  %v1223_v56 = vld [vmem:[#allocation7 + $0x348] sm:$0xff] }
 0x65f   :  { %2525 = vmatprep.subr.bf16.mxu0 %v2524_v59  ;;  %v2536_v0 = vpack.c.bf16 %v1100_v63, %v1099_v12  ;;  %v2568_v57 = vpack.c.bf16 %v1223_v56, %v1222_v55  ;;  %v1618_v63 = vld [vmem:[%s3227_s5 + $0x5] ss:$0 sm:$0xff]  ;;  %v1621_v56 = vld [vmem:[%s3227_s5 + $0x6] ss:$0 sm:$0xff] }
 0x662   :  { %2527 = vmatpush3.bf16.msra.mxu0 %v2524_v59  ;;  %v1225_v59 = vld [vmem:[#allocation7 + $0x358] sm:$0xff] }
 0x663   :  { %2529 = vmatprep.subr.bf16.mxu0 %v2528_v11  ;;  %v2572_v60 = vpack.c.bf16 %v1225_v59, %v1224_v58 }
 0x666   :  { %2531 = vmatpush3.bf16.msra.mxu0 %v2528_v11  ;;  %v1227_v11 = vld [vmem:[#allocation7 + $0x368] sm:$0xff] }
 0x667   :  { %2533 = vmatprep.subr.bf16.mxu0 %v2532_v54  ;;  %v2576_v53 = vpack.c.bf16 %v1227_v11, %v1226_v61 }
 0x66a   :  { %2535 = vmatpush3.bf16.msra.mxu0 %v2532_v54  ;;  %v1229_v54 = vld [vmem:[#allocation7 + $0x378] sm:$0xff] }
 0x66b   :  { %2537 = vmatprep.subr.bf16.mxu0 %v2536_v0  ;;  %v2580_v12 = vpack.c.bf16 %v1229_v54, %v1228_v62 }
 0x66e   :  { %2539 = vmatpush3.bf16.msra.mxu0 %v2536_v0 }
 0x66f   :  { %2541 = vmatprep.subr.bf16.mxu0 %v2540_v3 }
 0x672   :  { %2543 = vmatpush3.bf16.msra.mxu0 %v2540_v3 }
 0x673   :  { %2545 = vmatprep.subr.bf16.mxu0 %v2544_v6 }
 0x676   :  { %2547 = vmatpush3.bf16.msra.mxu0 %v2544_v6 }
 0x677   :  { %2549 = vmatprep.subr.bf16.mxu0 %v2548_v9 }
 0x67a   :  { %2551 = vmatpush3.bf16.msra.mxu0 %v2548_v9 }
 0x730   :  { %v2088_v26 = vpop.f32.mrb[6].mxu0 }
 0x731   :  { %v942_v27 = vadd.f32 %v2088_v26, %v1612_v25  ;;  %v936_v28 = vpop.f32.mrb[7].mxu0 }
 0x732   :  { %v937_v29 = vadd.f32 %v1612_v25, %v936_v28 }
 0x733   :  { %v946_v30 = vmin.f32 %v942_v27, 20.0  ;;  %vm964_vm11 = vcmp.gt.f32.partialorder %v942_v27, 20.0 }
 0x734   :  { %v945_v31 = vmin.f32 %v937_v29, 20.0  ;;  %vm963_vm10 = vcmp.gt.f32.partialorder %v937_v29, 20.0 }
 0x735   :  { %v949_v32 = vmul.f32 1.442695, %v946_v30 }
 0x736   :  { %v947_v33 = vmul.f32 1.442695, %v945_v31 }
 0x737   :  { %2698 = vpow2.f32 %v949_v32 }
 0x738   :  { %2700 = vpow2.f32 %v947_v33 }
 0x741   :  { %v2699_v34 = vpop.eup %2698 }
 0x742   :  { %v2701_v35 = vpop.eup %2700  ;;  %v952_v36 = vadd.f32 1.0, %v2699_v34 }
 0x743   :  { %v951_v37 = vadd.f32 1.0, %v2701_v35 }
 0x744   :  { %v954_v38 = vmul.f32 %v952_v36, %v952_v36 }
 0x745   :  { %v953_v39 = vmul.f32 %v951_v37, %v951_v37 }
 0x746   :  { %v958_v40 = vadd.f32 1.0, %v954_v38  ;;  %v1614_v42 = vadd.f32 -1.0, %v954_v38 }
 0x747   :  { %v957_v41 = vadd.f32 1.0, %v953_v39  ;;  %v1613_v44 = vadd.f32 -1.0, %v953_v39  ;;  %v1214_v39 = vld [vmem:[#allocation7 + $0x300] sm:$0xff] }
 0x748   :  { %2702 = vrcp.f32 %v958_v40  ;;  %v1215_v40 = vld [vmem:[#allocation7 + $0x308] sm:$0xff] }
 0x749   :  { %2704 = vrcp.f32 %v957_v41  ;;  %v2552_v41 = vpack.c.bf16 %v1215_v40, %v1214_v39  ;;  %v1343_v40 = vld [vmem:[#allocation7 + $0x3c0] sm:$0xff] }
 0x74b   :  { %2553 = vmatprep.subr.bf16.mxu1 %v2552_v41 }
 0x752   :  { %v2703_v43 = vpop.eup %2702 }
 0x753   :  { %v2705_v45 = vpop.eup %2704  ;;  %v962_v46 = vmul.f32 %v2703_v43, %v1614_v42  ;;  %v1216_v42 = vld [vmem:[#allocation7 + $0x310] sm:$0xff]  ;;  %v1217_v43 = vld [vmem:[#allocation7 + $0x318] sm:$0xff] }
 0x754   :  { %v960_v47 = vmul.f32 %v2705_v45, %v1613_v44  ;;  %v2556_v44 = vpack.c.bf16 %v1217_v43, %v1216_v42  ;;  %v1218_v45 = vld [vmem:[#allocation7 + $0x320] sm:$0xff]  ;;  %v1345_v43 = vld [vmem:[#allocation7 + $0x3d0] sm:$0xff] }
 0x755   :  { %v966_v48 = vmul.f32 %v962_v46, %v942_v27  ;;  %v1219_v46 = vld [vmem:[#allocation7 + $0x328] sm:$0xff] }
 0x756   :  { %v965_v49 = vmul.f32 %v960_v47, %v937_v29  ;;  %v2560_v47 = vpack.c.bf16 %v1219_v46, %v1218_v45  ;;  %v1347_v46 = vld [vmem:[#allocation7 + $0x3e0] sm:$0xff] }
 0x757   :  { %v3164_v51 = vsel %vm964_vm11, %v942_v27, %v966_v48  ;;  %v1220_v48 = vld [vmem:[#allocation7 + $0x330] sm:$0xff] }
 0x758   :  { %v3161_v50 = vsel %vm963_vm10, %v937_v29, %v965_v49  ;;  %v1221_v49 = vld [vmem:[#allocation7 + $0x338] sm:$0xff] }
 0x759   :  { %2121 = vmatprep.mubr.f32.mxu1 %v3161_v50  ;;  %v2564_v52 = vpack.c.bf16 %v1221_v49, %v1220_v48  ;;  %v1349_v49 = vld [vmem:[#allocation7 + $0x3f0] sm:$0xff] }
 0x75a   :  { %2122 = vmatmul.mubr.f32.vlgmr.msra.gmra.mrb[6].mxu1 %v3164_v51 }
 0x75b   :  { %2555 = vmatpush3.bf16.msra.mxu1 %v2552_v41  ;;  %v1344_v41 = vld [vmem:[#allocation7 + $0x3c8] sm:$0xff] }
 0x75c   :  { %2557 = vmatprep.subr.bf16.mxu1 %v2556_v44  ;;  %v2600_v42 = vpack.c.bf16 %v1344_v41, %v1343_v40  ;;  %v1624_v41 = vld [vmem:[%s3227_s5 + $0x7] ss:$0 sm:$0xff]  ;;  %s2938_s5 = smov [#allocation14]  }
 0x75d   :  { %s1576_s29 = sshll.u32 %s2938_s5, 4  ;;  %s1577_s29 = int_to_ptr.vmem [resolvable:$true] %s1576_s29 }
 0x75e   :  { %s2874_s10 = scalar_lea.vmem %s1577_s29, 256  ;;  %p2879_p7 = scmp.lt.s32.totalorder %s1577_s29, %s1577_s29 }
 0x75f   :  { %2559 = vmatpush3.bf16.msra.mxu1 %v2556_v44  ;;  %v1346_v44 = vld [vmem:[#allocation7 + $0x3d8] sm:$0xff]  ;;  %p2875_p6 = scmp.ne.s32.totalorder %s1577_s29, %s2874_s10  ;;  %p2880_p8 = scmp.lt.s32.totalorder %s2874_s10, %s2874_s10 }
 0x760   :  { %2561 = vmatprep.subr.bf16.mxu1 %v2560_v47  ;;  %v2604_v45 = vpack.c.bf16 %v1346_v44, %v1345_v43 }
 0x761   :  { %p2881_p9 = por %p2880_p8, %p2879_p7 }
 0x763   :  { %2563 = vmatpush3.bf16.msra.mxu1 %v2560_v47  ;;  %v1348_v47 = vld [vmem:[#allocation7 + $0x3e8] sm:$0xff]  ;;  %p2882_p10 = pnand %p2881_p9, %p2875_p6 }
 0x764   :  { %2565 = vmatprep.subr.bf16.mxu1 %v2564_v52  ;;  %v2608_v48 = vpack.c.bf16 %v1348_v47, %v1347_v46 }
 0x767   :  { %2567 = vmatpush3.bf16.msra.mxu1 %v2564_v52  ;;  %v1350_v52 = vld [vmem:[#allocation7 + $0x3f8] sm:$0xff] }
 0x768   :  { %2569 = vmatprep.subr.bf16.mxu1 %v2568_v57  ;;  %v2612_v55 = vpack.c.bf16 %v1350_v52, %v1349_v49 }
 0x76b   :  { %2571 = vmatpush3.bf16.msra.mxu1 %v2568_v57 }
 0x76c   :  { %2573 = vmatprep.subr.bf16.mxu1 %v2572_v60 }
 0x76f   :  { %2575 = vmatpush3.bf16.msra.mxu1 %v2572_v60 }
 0x770   :  { %2577 = vmatprep.subr.bf16.mxu1 %v2576_v53 }
 0x773   :  { %2579 = vmatpush3.bf16.msra.mxu1 %v2576_v53 }
 0x774   :  { %2581 = vmatprep.subr.bf16.mxu1 %v2580_v12 }
 0x777   :  { %2583 = vmatpush3.bf16.msra.mxu1 %v2580_v12 }
 0x82d   :  { %v2123_v13 = vpop.f32.mrb[6].mxu1 }
 0x82e   :  { %v1063_v14 = vadd.f32 %v2123_v13, %v1615_v10  ;;  %v1057_v15 = vpop.f32.mrb[7].mxu1 }
 0x82f   :  { %v1058_v16 = vadd.f32 %v1615_v10, %v1057_v15 }
 0x830   :  { %v1067_v17 = vmin.f32 %v1063_v14, 20.0  ;;  %vm1085_vm13 = vcmp.gt.f32.partialorder %v1063_v14, 20.0 }
 0x831   :  { %v1066_v18 = vmin.f32 %v1058_v16, 20.0  ;;  %vm1084_vm12 = vcmp.gt.f32.partialorder %v1058_v16, 20.0 }
 0x832   :  { %v1070_v19 = vmul.f32 1.442695, %v1067_v17 }
 0x833   :  { %v1068_v20 = vmul.f32 1.442695, %v1066_v18 }
 0x834   :  { %2706 = vpow2.f32 %v1070_v19 }
 0x835   :  { %2708 = vpow2.f32 %v1068_v20 }
 0x83e   :  { %v2707_v21 = vpop.eup %2706 }
 0x83f   :  { %v2709_v22 = vpop.eup %2708  ;;  %v1073_v23 = vadd.f32 1.0, %v2707_v21 }
 0x840   :  { %v1072_v24 = vadd.f32 1.0, %v2709_v22 }
 0x841   :  { %v1075_v25 = vmul.f32 %v1073_v23, %v1073_v23 }
 0x842   :  { %v1074_v26 = vmul.f32 %v1072_v24, %v1072_v24 }
 0x843   :  { %v1079_v27 = vadd.f32 1.0, %v1075_v25  ;;  %v1617_v29 = vadd.f32 -1.0, %v1075_v25 }
 0x844   :  { %v1078_v28 = vadd.f32 1.0, %v1074_v26  ;;  %v1616_v31 = vadd.f32 -1.0, %v1074_v26 }
 0x845   :  { %2710 = vrcp.f32 %v1079_v27 }
 0x846   :  { %2712 = vrcp.f32 %v1078_v28 }
 0x84f   :  { %v2711_v30 = vpop.eup %2710 }
 0x850   :  { %v2713_v32 = vpop.eup %2712  ;;  %v1083_v33 = vmul.f32 %v2711_v30, %v1617_v29  ;;  %v1335_v30 = vld [vmem:[#allocation7 + $0x380] sm:$0xff] }
 0x851   :  { %v1081_v34 = vmul.f32 %v2713_v32, %v1616_v31  ;;  %v1336_v31 = vld [vmem:[#allocation7 + $0x388] sm:$0xff] }
 0x852   :  { %v1087_v35 = vmul.f32 %v1083_v33, %v1063_v14  ;;  %v2584_v32 = vpack.c.bf16 %v1336_v31, %v1335_v30  ;;  %v1337_v33 = vld [vmem:[#allocation7 + $0x390] sm:$0xff]  ;;  %v1465_v31 = vld [vmem:[#allocation11 + $0x40] sm:$0xff] }
 0x853   :  { %v1086_v36 = vmul.f32 %v1081_v34, %v1058_v16  ;;  %v1338_v34 = vld [vmem:[#allocation7 + $0x398] sm:$0xff] }
 0x854   :  { %v1089_v38 = vsel %vm1085_vm13, %v1063_v14, %v1087_v35  ;;  %2585 = vmatprep.subr.bf16.mxu0 %v2584_v32  ;;  %v2588_v35 = vpack.c.bf16 %v1338_v34, %v1337_v33  ;;  %v1467_v34 = vld [vmem:[#allocation11 + $0x50] sm:$0xff] }
 0x855   :  { %v1088_v37 = vsel %vm1084_vm12, %v1058_v16, %v1086_v36  ;;  %v1339_v36 = vld [vmem:[#allocation7 + $0x3a0] sm:$0xff] }
 0x856   :  { %2156 = vmatprep.mubr.f32.mxu0 %v1088_v37 }
 0x857   :  { %2157 = vmatmul.mubr.f32.vlgmr.msra.gmra.mrb[8].mxu0 %v1089_v38  ;;  %v1342_v38 = vld [vmem:[#allocation7 + $0x3b8] sm:$0xff] }
 0x858   :  { %2587 = vmatpush3.bf16.msra.mxu0 %v2584_v32  ;;  %v1466_v32 = vld [vmem:[#allocation11 + $0x48] sm:$0xff] }
 0x859   :  { %2589 = vmatprep.subr.bf16.mxu0 %v2588_v35  ;;  %v2632_v33 = vpack.c.bf16 %v1466_v32, %v1465_v31 }
 0x85c   :  { %2591 = vmatpush3.bf16.msra.mxu0 %v2588_v35  ;;  %v1468_v35 = vld [vmem:[#allocation11 + $0x58] sm:$0xff] }
 0x92a   :  { %v2158_v0 = vpop.f32.mrb[8].mxu0 }
 0x92b   :  { %v1184_v1 = vadd.f32 %v2158_v0, %v1618_v63  ;;  %v1178_v2 = vpop.f32.mrb[9].mxu0 }
 0x92c   :  { %v1179_v3 = vadd.f32 %v1618_v63, %v1178_v2 }
 0x92d   :  { %v1188_v4 = vmin.f32 %v1184_v1, 20.0  ;;  %vm1206_vm14 = vcmp.gt.f32.partialorder %v1184_v1, 20.0 }
 0x92e   :  { %v1187_v5 = vmin.f32 %v1179_v3, 20.0  ;;  %vm1205_vm15 = vcmp.gt.f32.partialorder %v1179_v3, 20.0 }
 0x92f   :  { %v1191_v6 = vmul.f32 1.442695, %v1188_v4 }
 0x930   :  { %v1189_v7 = vmul.f32 1.442695, %v1187_v5 }
 0x931   :  { %2714 = vpow2.f32 %v1191_v6 }
 0x932   :  { %2716 = vpow2.f32 %v1189_v7 }
 0x93b   :  { %v2715_v8 = vpop.eup %2714 }
 0x93c   :  { %v2717_v9 = vpop.eup %2716  ;;  %v1194_v10 = vadd.f32 1.0, %v2715_v8 }
 0x93d   :  { %v1193_v13 = vadd.f32 1.0, %v2717_v9 }
 0x93e   :  { %v1196_v14 = vmul.f32 %v1194_v10, %v1194_v10 }
 0x93f   :  { %v1195_v15 = vmul.f32 %v1193_v13, %v1193_v13 }
 0x940   :  { %v1200_v16 = vadd.f32 1.0, %v1196_v14  ;;  %v1620_v18 = vadd.f32 -1.0, %v1196_v14 }
 0x941   :  { %v1199_v17 = vadd.f32 1.0, %v1195_v15  ;;  %v1619_v20 = vadd.f32 -1.0, %v1195_v15 }
 0x942   :  { %2718 = vrcp.f32 %v1200_v16 }
 0x943   :  { %2720 = vrcp.f32 %v1199_v17  ;;  %v1457_v17 = vld [vmem:[#allocation11] sm:$0xff] }
 0x94c   :  { %v2719_v19 = vpop.eup %2718 }
 0x94d   :  { %v2721_v21 = vpop.eup %2720  ;;  %v1204_v22 = vmul.f32 %v2719_v19, %v1620_v18  ;;  %v1458_v18 = vld [vmem:[#allocation11 + $0x8] sm:$0xff] }
 0x94e   :  { %v1202_v23 = vmul.f32 %v2721_v21, %v1619_v20  ;;  %v2616_v19 = vpack.c.bf16 %v1458_v18, %v1457_v17  ;;  %v1459_v20 = vld [vmem:[#allocation11 + $0x10] sm:$0xff]  ;;  %v1460_v21 = vld [vmem:[#allocation11 + $0x18] sm:$0xff] }
 0x94f   :  { %v1208_v24 = vmul.f32 %v1204_v22, %v1184_v1  ;;  %v2620_v22 = vpack.c.bf16 %v1460_v21, %v1459_v20 }
 0x950   :  { %v1207_v25 = vmul.f32 %v1202_v23, %v1179_v3  ;;  %2617 = vmatprep.subr.bf16.mxu1 %v2616_v19  ;;  %v1461_v23 = vld [vmem:[#allocation11 + $0x20] sm:$0xff] }
 0x951   :  { %v1210_v26 = vsel %vm1206_vm14, %v1184_v1, %v1208_v24  ;;  %v1462_v24 = vld [vmem:[#allocation11 + $0x28] sm:$0xff] }
 0x952   :  { %v1209_v27 = vsel %vm1205_vm15, %v1179_v3, %v1207_v25  ;;  %v3177_v29 = vadd.f32 %v1210_v26, %v3164_v51  ;;  %v1341_v51 = vld [vmem:[#allocation7 + $0x3b0] sm:$0xff]  ;;  %v2624_v25 = vpack.c.bf16 %v1462_v24, %v1461_v23 }
 0x953   :  { %v3174_v28 = vadd.f32 %v1209_v27, %v3161_v50  ;;  %v1340_v50 = vld [vmem:[#allocation7 + $0x3a8] sm:$0xff]  ;;  %v2596_v39 = vpack.c.bf16 %v1342_v38, %v1341_v51  ;;  %v1463_v26 = vld [vmem:[#allocation11 + $0x30] sm:$0xff]  ;;  %v1464_v27 = vld [vmem:[#allocation11 + $0x38] sm:$0xff] }
 0x954   :  { %v2592_v37 = vpack.c.bf16 %v1340_v50, %v1339_v36  ;;  %v2628_v30 = vpack.c.bf16 %v1464_v27, %v1463_v26  ;;  %v2636_v36 = vpack.c.bf16 %v1468_v35, %v1467_v34  ;;  %v1469_v50 = vld [vmem:[#allocation11 + $0x60] sm:$0xff]  ;;  %v1471_v38 = vld [vmem:[#allocation11 + $0x70] sm:$0xff] }
 0x955   :  { %2191 = vmatprep.mubr.f32.mxu1 %v3174_v28 }
 0x956   :  { %2192 = vmatmul.mubr.f32.vlgmr.msra.gmra.mrb[8].mxu1 %v3177_v29  ;;  %2593 = vmatprep.subr.bf16.mxu0 %v2592_v37 }
 0x957   :  { %2595 = vmatpush3.bf16.msra.mxu0 %v2592_v37  ;;  %2619 = vmatpush3.bf16.msra.mxu1 %v2616_v19  ;;  %v1470_v37 = vld [vmem:[#allocation11 + $0x68] sm:$0xff] }
 0x958   :  { %2597 = vmatprep.subr.bf16.mxu0 %v2596_v39  ;;  %2621 = vmatprep.subr.bf16.mxu1 %v2620_v22  ;;  %v2640_v51 = vpack.c.bf16 %v1470_v37, %v1469_v50 }
 0x95b   :  { %2599 = vmatpush3.bf16.msra.mxu0 %v2596_v39  ;;  %2623 = vmatpush3.bf16.msra.mxu1 %v2620_v22  ;;  %v1472_v39 = vld [vmem:[#allocation11 + $0x78] sm:$0xff] }
 0x95c   :  { %2601 = vmatprep.subr.bf16.mxu0 %v2600_v42  ;;  %2625 = vmatprep.subr.bf16.mxu1 %v2624_v25  ;;  %v2644_v40 = vpack.c.bf16 %v1472_v39, %v1471_v38 }
 0x95f   :  { %2603 = vmatpush3.bf16.msra.mxu0 %v2600_v42  ;;  %2627 = vmatpush3.bf16.msra.mxu1 %v2624_v25 }
 0x960   :  { %2605 = vmatprep.subr.bf16.mxu0 %v2604_v45  ;;  %2629 = vmatprep.subr.bf16.mxu1 %v2628_v30 }
 0x963   :  { %2607 = vmatpush3.bf16.msra.mxu0 %v2604_v45  ;;  %2631 = vmatpush3.bf16.msra.mxu1 %v2628_v30 }
 0x964   :  { %2609 = vmatprep.subr.bf16.mxu0 %v2608_v48  ;;  %2633 = vmatprep.subr.bf16.mxu1 %v2632_v33 }
 0x967   :  { %2611 = vmatpush3.bf16.msra.mxu0 %v2608_v48  ;;  %2635 = vmatpush3.bf16.msra.mxu1 %v2632_v33 }
 0x968   :  { %2613 = vmatprep.subr.bf16.mxu0 %v2612_v55  ;;  %2637 = vmatprep.subr.bf16.mxu1 %v2636_v36 }
 0x96b   :  { %2615 = vmatpush3.bf16.msra.mxu0 %v2612_v55  ;;  %2639 = vmatpush3.bf16.msra.mxu1 %v2636_v36 }
 0x96c   :  { %2641 = vmatprep.subr.bf16.mxu1 %v2640_v51 }
 0x96f   :  { %2643 = vmatpush3.bf16.msra.mxu1 %v2640_v51 }
 0x970   :  { %2645 = vmatprep.subr.bf16.mxu1 %v2644_v40 }
 0x973   :  { %2647 = vmatpush3.bf16.msra.mxu1 %v2644_v40 }
 0xa29   :  { %v2193_v57 = vpop.f32.mrb[8].mxu1 }
 0xa2a   :  { %v1307_v58 = vadd.f32 %v2193_v57, %v1621_v56  ;;  %v1301_v59 = vpop.f32.mrb[9].mxu1 }
 0xa2b   :  { %v1302_v60 = vadd.f32 %v1621_v56, %v1301_v59 }
 0xa2c   :  { %v1311_v61 = vmin.f32 %v1307_v58, 20.0  ;;  %vm1329_vm1 = vcmp.gt.f32.partialorder %v1307_v58, 20.0 }
 0xa2d   :  { %v1310_v11 = vmin.f32 %v1302_v60, 20.0  ;;  %vm1328_vm0 = vcmp.gt.f32.partialorder %v1302_v60, 20.0 }
 0xa2e   :  { %v1314_v53 = vmul.f32 1.442695, %v1311_v61 }
 0xa2f   :  { %v1312_v62 = vmul.f32 1.442695, %v1310_v11 }
 0xa30   :  { %2722 = vpow2.f32 %v1314_v53 }
 0xa31   :  { %2724 = vpow2.f32 %v1312_v62 }
 0xa3a   :  { %v2723_v54 = vpop.eup %2722 }
 0xa3b   :  { %v2725_v12 = vpop.eup %2724  ;;  %v1317_v63 = vadd.f32 1.0, %v2723_v54 }
 0xa3c   :  { %v1316_v0 = vadd.f32 1.0, %v2725_v12 }
 0xa3d   :  { %v1319_v1 = vmul.f32 %v1317_v63, %v1317_v63 }
 0xa3e   :  { %v1318_v2 = vmul.f32 %v1316_v0, %v1316_v0 }
 0xa3f   :  { %v1323_v3 = vadd.f32 1.0, %v1319_v1  ;;  %v1623_v5 = vadd.f32 -1.0, %v1319_v1 }
 0xa40   :  { %v1322_v4 = vadd.f32 1.0, %v1318_v2  ;;  %v1622_v7 = vadd.f32 -1.0, %v1318_v2 }
 0xa41   :  { %2726 = vrcp.f32 %v1323_v3 }
 0xa42   :  { %2728 = vrcp.f32 %v1322_v4 }
 0xa4b   :  { %v2727_v6 = vpop.eup %2726 }
 0xa4c   :  { %v2729_v8 = vpop.eup %2728  ;;  %v1327_v9 = vmul.f32 %v2727_v6, %v1623_v5 }
 0xa4d   :  { %v1325_v10 = vmul.f32 %v2729_v8, %v1622_v7 }
 0xa4e   :  { %v1331_v13 = vmul.f32 %v1327_v9, %v1307_v58 }
 0xa4f   :  { %v1330_v14 = vmul.f32 %v1325_v10, %v1302_v60 }
 0xa50   :  { %v1333_v16 = vsel %vm1329_vm1, %v1307_v58, %v1331_v13 }
 0xa51   :  { %v1332_v15 = vsel %vm1328_vm0, %v1302_v60, %v1330_v14 }
 0xa52   :  { %2226 = vmatprep.mubr.f32.mxu0 %v1332_v15 }
 0xa53   :  { %2227 = vmatmul.mubr.f32.vlgmr.msra.gmra.mrb[10].mxu0 %v1333_v16 }
 0xb26   :  { %v2228_v42 = vpop.f32.mrb[10].mxu0 }
 0xb27   :  { %v1428_v43 = vadd.f32 %v2228_v42, %v1624_v41  ;;  %v1422_v44 = vpop.f32.mrb[11].mxu0 }
 0xb28   :  { %v1423_v45 = vadd.f32 %v1624_v41, %v1422_v44 }
 0xb29   :  { %v1432_v46 = vmin.f32 %v1428_v43, 20.0  ;;  %vm1450_vm2 = vcmp.gt.f32.partialorder %v1428_v43, 20.0 }
 0xb2a   :  { %v1431_v47 = vmin.f32 %v1423_v45, 20.0  ;;  %vm1449_vm3 = vcmp.gt.f32.partialorder %v1423_v45, 20.0 }
 0xb2b   :  { %v1435_v48 = vmul.f32 1.442695, %v1432_v46 }
 0xb2c   :  { %v1433_v49 = vmul.f32 1.442695, %v1431_v47 }
 0xb2d   :  { %2730 = vpow2.f32 %v1435_v48 }
 0xb2e   :  { %2732 = vpow2.f32 %v1433_v49 }
 0xb37   :  { %v2731_v52 = vpop.eup %2730 }
 0xb38   :  { %v2733_v55 = vpop.eup %2732  ;;  %v1438_v56 = vadd.f32 1.0, %v2731_v52 }
 0xb39   :  { %v1437_v57 = vadd.f32 1.0, %v2733_v55 }
 0xb3a   :  { %v1440_v58 = vmul.f32 %v1438_v56, %v1438_v56 }
 0xb3b   :  { %v1439_v59 = vmul.f32 %v1437_v57, %v1437_v57 }
 0xb3c   :  { %v1444_v60 = vadd.f32 1.0, %v1440_v58  ;;  %v1626_v11 = vadd.f32 -1.0, %v1440_v58 }
 0xb3d   :  { %v1443_v61 = vadd.f32 1.0, %v1439_v59  ;;  %v1625_v62 = vadd.f32 -1.0, %v1439_v59 }
 0xb3e   :  { %2734 = vrcp.f32 %v1444_v60 }
 0xb3f   :  { %2736 = vrcp.f32 %v1443_v61 }
 0xb48   :  { %v2735_v53 = vpop.eup %2734 }
 0xb49   :  { %v2737_v54 = vpop.eup %2736  ;;  %v1448_v12 = vmul.f32 %v2735_v53, %v1626_v11 }
 0xb4a   :  { %v1446_v63 = vmul.f32 %v2737_v54, %v1625_v62 }
 0xb4b   :  { %v1452_v0 = vmul.f32 %v1448_v12, %v1428_v43 }
 0xb4c   :  { %v1451_v1 = vmul.f32 %v1446_v63, %v1423_v45 }
 0xb4d   :  { %v1454_v2 = vsel %vm1450_vm2, %v1428_v43, %v1452_v0 }
 0xb4e   :  { %v1453_v3 = vsel %vm1449_vm3, %v1423_v45, %v1451_v1  ;;  %v1456_v5 = vadd.f32 %v1454_v2, %v3177_v29 }
 0xb4f   :  { %v1455_v4 = vadd.f32 %v1453_v3, %v3174_v28 }
 0xb51   :  { %2261 = vmatprep.mubr.f32.mxu1 %v1455_v4 }
 0xb52   :  { %2262 = vmatmul.mubr.f32.vlgmr.msra.gmra.mrb[10].mxu1 %v1456_v5 }
 0xb53   :  { %2885 = shalt.err (!%p2882_p10)
}
 0xb54   :  { %s2886_s28 = scalar_lea.hbm %s3235_s13, 256 }
 0xb55   :  { %p2887_p11 = scmp.ne.s32.totalorder %s3235_s13, %s2886_s28  ;;  %p2890_p12 = scmp.lt.u32.totalorder %s2886_s28, %s3235_s13 }
 0xb57   :  { %p2892_p13 = pnand %p2890_p12, %p2887_p11 }
 0xb59   :  { %2895 = shalt.err (!%p2892_p13)
}
 0xb5a   :  { %1582 = dma.vmem_to_hbm [thread:$0]  %s1577_s29, 256, %s3235_s13, [#allocation15], %s2932_s20, %s2932_s20, %s2933_s21  }
 0xb5b   :  { %v1627_v28 = vld [vmem:[%s3233_s11] ss:$0 sm:$0xff]  ;;  %s2939_s23 = smov [#allocation13]  }
 0xb5c   :  { %s1564_s24 = sshll.u32 %s2939_s23, 4  ;;  %s1565_s24 = int_to_ptr.vmem [resolvable:$true] %s1564_s24 }
 0xb5d   :  { %s2896_s1 = scalar_lea.vmem %s1565_s24, 256  ;;  %p2901_p1 = scmp.lt.s32.totalorder %s1565_s24, %s1565_s24 }
 0xb5e   :  { %p2897_p0 = scmp.ne.s32.totalorder %s1565_s24, %s2896_s1  ;;  %p2902_p2 = scmp.lt.s32.totalorder %s2896_s1, %s2896_s1 }
 0xb60   :  { %p2903_p3 = por %p2902_p2, %p2901_p1 }
 0xb62   :  { %p2904_p4 = pnand %p2903_p3, %p2897_p0 }
 0xc25   :  { %v2263_v29 = vpop.f32.mrb[10].mxu1 }
 0xc26   :  { %v1552_v6 = vadd.f32 %v2263_v29, %v1627_v28  ;;  %v1546_v7 = vpop.f32.mrb[11].mxu1 }
 0xc27   :  { %v1547_v8 = vadd.f32 %v1627_v28, %v1546_v7 }
 0xc28   :  { %2738 = vtanh.f32 %v1552_v6 }
 0xc29   :  { %2740 = vtanh.f32 %v1547_v8 }
 0xc32   :  { %v2739_v9 = vpop.eup %2738 }
 0xc33   :  { %v2741_v10 = vpop.eup %2740  ;;  %1558 = vst [vmem:[#allocation13 + $0x8] sm:$0xff] %v2739_v9 }
 0xc34   :  { %1557 = vst [vmem:[#allocation13] sm:$0xff] %v2741_v10 }
 0xc35   :  { %2907 = shalt.err (!%p2904_p4)
}
 0xc36   :  { %s2908_s7 = scalar_lea.hbm %s3234_s12, 256 }
 0xc37   :  { %p2909_p5 = scmp.ne.s32.totalorder %s3234_s12, %s2908_s7  ;;  %p2912_p6 = scmp.lt.u32.totalorder %s2908_s7, %s3234_s12 }
 0xc39   :  { %p2914_p7 = pnand %p2912_p6, %p2909_p5 }
 0xc3b   :  { %2917 = shalt.err (!%p2914_p7)
}
 0xc3c   :  { %1570 = dma.vmem_to_hbm [thread:$0]  %s1565_s24, 256, %s3234_s12, [#allocation4], %s2932_s20, %s2932_s20, %s2933_s21  }
 0xc3d   :  { %2926 = dma.done.wait [#allocation4], 256  }
 0xc3e   :  { %2927 = vsyncadd [#allocation4], 4294967040 }
 0xc3f   :  { %2928 = dma.done.wait [#allocation15], 256  }
 0xc40   :  { %2929 = vsyncadd [#allocation15], 4294967040 }
 0xc41   :  { %1589 = vsyncpa [#allocation3], 1 }
 0xc42   :  { %1590 = vsyncpa [#allocation6], 1 }
 0xc43   :  { %1591 = vsyncpa [#allocation9], 1 }
 0xc44   :  { %1592 = vsyncpa [#allocation12], 1 }
 0xc45   :  { %1593 = vsyncpa [#allocation4], 1 }
 0xc46   :  { %1594 = vsyncpa [#allocation15], 1 }

// kernel: tpu_custom_call.1
= control target key start
LH: loop header
LB: loop body
LE: loop exit
PB: predicated region body
PF: predicated region fallthrough
CT: control target
= control target key end

     0   :  { %19 = vsyncpa [#allocation3], 0  ;;  %s3222_s0 = inlined_call_operand.hbm [shape: f32[16,128], index: 0, kind: input, shape index: {}]   ;;  %s3223_s1 = inlined_call_operand.vmem [shape: f32[1,128], index: 1, kind: input, shape index: {}]   ;;  %s3224_s2 = inlined_call_operand.hbm [shape: f32[128,128], index: 2, kind: input, shape index: {}]   ;;  %s3225_s3 = inlined_call_operand.vmem [shape: f32[1,128], index: 3, kind: input, shape index: {}]   ;;  %s3226_s4 = inlined_call_operand.hbm [shape: f32[8,128,128], index: 4, kind: input, shape index: {}]   ;;  %s3227_s5 = inlined_call_operand.vmem [shape: f32[8,128], index: 5, kind: input, shape index: {}]   ;;  %s3228_s6 = inlined_call_operand.hbm [shape: f32[128,128], index: 6, kind: input, shape index: {}]   ;;  %s3229_s7 = inlined_call_operand.vmem [shape: f32[1,128], index: 7, kind: input, shape index: {}]   ;;  %s3230_s8 = inlined_call_operand.hbm [shape: f32[128,128], index: 8, kind: input, shape index: {}]   ;;  %s3231_s9 = inlined_call_operand.vmem [shape: f32[1,128], index: 9, kind: input, shape index: {}]   ;;  %s3232_s10 = inlined_call_operand.hbm [shape: f32[128,128], index: 10, kind: input, shape index: {}]   ;;  %s3233_s11 = inlined_call_operand.vmem [shape: f32[1,128], index: 11, kind: input, shape index: {}]   ;;  %s3234_s12 = inlined_call_operand.hbm [shape: f32[16,128], index: 12, kind: output, shape index: {0}]   ;;  %s3235_s13 = inlined_call_operand.hbm [shape: f32[16,128], index: 13, kind: output, shape index: {1}]  }
   0x1   :  { %20 = vsyncpa [#allocation6], 0 }
   0x2   :  { %21 = vsyncpa [#allocation9], 0 }
   0x3   :  { %22 = vsyncpa [#allocation12], 0 }
   0x4   :  { %23 = vsyncpa [#allocation4], 0 }
   0x5   :  { %24 = vsyncpa [#allocation15], 0  ;;  %s2930_s25 = smov [#allocation5]   ;;  %s2931_s27 = smov [#allocation8]  }
   0x6   :  { %s44_s26 = sshll.u32 %s2930_s25, 4  ;;  %s72_s28 = sshll.u32 %s2931_s27, 4  ;;  %s45_s26 = int_to_ptr.vmem [resolvable:$true] %s44_s26  ;;  %s3010_s28 = int_to_ptr.vmem [resolvable:$true] %s72_s28 }
   0x7   :  { %s2742_s14 = scalar_lea.hbm %s3224_s2, 2048 }
   0x8   :  { %p2743_p0 = scmp.ne.s32.totalorder %s3224_s2, %s2742_s14  ;;  %p2746_p1 = scmp.lt.u32.totalorder %s2742_s14, %s3224_s2 }
   0xa   :  { %p2748_p2 = pnand %p2746_p1, %p2743_p0 }
   0xc   :  { %2751 = shalt.err (!%p2748_p2)
}
   0xd   :  { %s2752_s19 = scalar_lea.vmem %s45_s26, 2048  ;;  %p2757_p4 = scmp.lt.s32.totalorder %s45_s26, %s45_s26 }
   0xe   :  { %p2753_p3 = scmp.ne.s32.totalorder %s45_s26, %s2752_s19  ;;  %p2758_p5 = scmp.lt.s32.totalorder %s2752_s19, %s2752_s19 }
  0x10   :  { %p2759_p6 = por %p2758_p5, %p2757_p4 }
  0x12   :  { %p2760_p7 = pnand %p2759_p6, %p2753_p3 }
  0x14   :  { %2763 = shalt.err (!%p2760_p7)
}
  0x15   :  { %s2932_s20 = smov 128   ;;  %s2933_s21 = smov 8  }
  0x16   :  { %50 = dma.hbm_to_vmem [thread:$0]  %s3224_s2, 2048, %s45_s26, [#allocation6], %s2932_s20, %s2932_s20, %s2933_s21  }
  0x17   :  { %s2764_s27 = scalar_lea.hbm %s3228_s6, 2048 }
  0x18   :  { %p2765_p8 = scmp.ne.s32.totalorder %s3228_s6, %s2764_s27  ;;  %p2768_p9 = scmp.lt.u32.totalorder %s2764_s27, %s3228_s6 }
  0x1a   :  { %p2770_p10 = pnand %p2768_p9, %p2765_p8 }
  0x1c   :  { %2773 = shalt.err (!%p2770_p10)
}
  0x1d   :  { %s2774_s16 = scalar_lea.vmem %s3010_s28, 2048  ;;  %p2779_p12 = scmp.lt.s32.totalorder %s3010_s28, %s3010_s28 }
  0x1e   :  { %p2775_p11 = scmp.ne.s32.totalorder %s3010_s28, %s2774_s16  ;;  %p2780_p13 = scmp.lt.s32.totalorder %s2774_s16, %s2774_s16 }
  0x20   :  { %p2781_p0 = por %p2780_p13, %p2779_p12 }
  0x22   :  { %p2782_p1 = pnand %p2781_p0, %p2775_p11 }
  0x24   :  { %2785 = shalt.err (!%p2782_p1)
}
  0x25   :  { %78 = dma.hbm_to_vmem [thread:$0]  %s3228_s6, 2048, %s3010_s28, [#allocation9], %s2932_s20, %s2932_s20, %s2933_s21  }
  0x26   :  { %s2934_s17 = smov [#allocation2]   ;;  %s2935_s19 = smov [#allocation7]  }
  0x27   :  { %s30_s18 = sshll.u32 %s2934_s17, 4  ;;  %s58_s22 = sshll.u32 %s2935_s19, 4  ;;  %s31_s18 = int_to_ptr.vmem [resolvable:$true] %s30_s18  ;;  %s3047_s22 = int_to_ptr.vmem [resolvable:$true] %s58_s22 }
  0x28   :  { %s2786_s25 = scalar_lea.hbm %s3222_s0, 256 }
  0x29   :  { %p2787_p2 = scmp.ne.s32.totalorder %s3222_s0, %s2786_s25  ;;  %p2790_p3 = scmp.lt.u32.totalorder %s2786_s25, %s3222_s0 }
  0x2b   :  { %p2792_p4 = pnand %p2790_p3, %p2787_p2 }
  0x2d   :  { %2795 = shalt.err (!%p2792_p4)
}
  0x2e   :  { %s2796_s6 = scalar_lea.vmem %s31_s18, 256  ;;  %p2801_p6 = scmp.lt.s32.totalorder %s31_s18, %s31_s18 }
  0x2f   :  { %p2797_p5 = scmp.ne.s32.totalorder %s31_s18, %s2796_s6  ;;  %p2802_p7 = scmp.lt.s32.totalorder %s2796_s6, %s2796_s6 }
  0x31   :  { %p2803_p8 = por %p2802_p7, %p2801_p6 }
  0x33   :  { %p2804_p9 = pnand %p2803_p8, %p2797_p5 }
  0x35   :  { %2807 = shalt.err (!%p2804_p9)
}
  0x36   :  { %36 = dma.hbm_to_vmem [thread:$0]  %s3222_s0, 256, %s31_s18, [#allocation3], %s2932_s20, %s2932_s20, %s2933_s21  }
  0x37   :  { %s2808_s26 = scalar_lea.hbm %s3226_s4, 16384 }
  0x38   :  { %p2809_p10 = scmp.ne.s32.totalorder %s3226_s4, %s2808_s26  ;;  %p2812_p11 = scmp.lt.u32.totalorder %s2808_s26, %s3226_s4 }
  0x3a   :  { %p2814_p12 = pnand %p2812_p11, %p2809_p10 }
  0x3c   :  { %2817 = shalt.err (!%p2814_p12)
}
  0x3d   :  { %s2818_s25 = scalar_lea.vmem %s3047_s22, 16384  ;;  %p2823_p0 = scmp.lt.s32.totalorder %s3047_s22, %s3047_s22 }
  0x3e   :  { %p2819_p13 = scmp.ne.s32.totalorder %s3047_s22, %s2818_s25  ;;  %p2824_p1 = scmp.lt.s32.totalorder %s2818_s25, %s2818_s25 }
  0x40   :  { %p2825_p2 = por %p2824_p1, %p2823_p0 }
  0x42   :  { %p2826_p3 = pnand %p2825_p2, %p2819_p13 }
  0x44   :  { %2829 = shalt.err (!%p2826_p3)
}
  0x45   :  { %64 = dma.hbm_to_vmem [thread:$0]  %s3226_s4, 16384, %s3047_s22, [#allocation6], %s2932_s20, %s2932_s20, %s2933_s21  }
  0x46   :  { %s2936_s27 = smov [#allocation10]   ;;  %s2937_s30 = smov [#allocation11]  }
  0x47   :  { %s86_s29 = sshll.u32 %s2936_s27, 4  ;;  %s100_s14 = sshll.u32 %s2937_s30, 4  ;;  %s87_s29 = int_to_ptr.vmem [resolvable:$true] %s86_s29  ;;  %s3084_s14 = int_to_ptr.vmem [resolvable:$true] %s100_s14 }
  0x48   :  { %s2830_s15 = scalar_lea.hbm %s3230_s8, 2048 }
  0x49   :  { %p2831_p4 = scmp.ne.s32.totalorder %s3230_s8, %s2830_s15  ;;  %p2834_p5 = scmp.lt.u32.totalorder %s2830_s15, %s3230_s8 }
  0x4b   :  { %p2836_p6 = pnand %p2834_p5, %p2831_p4 }
  0x4d   :  { %2839 = shalt.err (!%p2836_p6)
}
  0x4e   :  { %s2840_s4 = scalar_lea.vmem %s87_s29, 2048  ;;  %p2845_p8 = scmp.lt.s32.totalorder %s87_s29, %s87_s29 }
  0x4f   :  { %p2841_p7 = scmp.ne.s32.totalorder %s87_s29, %s2840_s4  ;;  %p2846_p9 = scmp.lt.s32.totalorder %s2840_s4, %s2840_s4 }
  0x51   :  { %p2847_p10 = por %p2846_p9, %p2845_p8 }
  0x53   :  { %p2848_p11 = pnand %p2847_p10, %p2841_p7 }
  0x55   :  { %2851 = shalt.err (!%p2848_p11)
}
  0x56   :  { %92 = dma.hbm_to_vmem [thread:$0]  %s3230_s8, 2048, %s87_s29, [#allocation9], %s2932_s20, %s2932_s20, %s2933_s21  }
  0x57   :  { %s2852_s25 = scalar_lea.hbm %s3232_s10, 2048 }
  0x58   :  { %p2853_p12 = scmp.ne.s32.totalorder %s3232_s10, %s2852_s25  ;;  %p2856_p13 = scmp.lt.u32.totalorder %s2852_s25, %s3232_s10 }
  0x5a   :  { %p2858_p0 = pnand %p2856_p13, %p2853_p12 }
  0x5c   :  { %2861 = shalt.err (!%p2858_p0)
}
  0x5d   :  { %s2862_s6 = scalar_lea.vmem %s3084_s14, 2048  ;;  %p2867_p2 = scmp.lt.s32.totalorder %s3084_s14, %s3084_s14 }
  0x5e   :  { %p2863_p1 = scmp.ne.s32.totalorder %s3084_s14, %s2862_s6  ;;  %p2868_p3 = scmp.lt.s32.totalorder %s2862_s6, %s2862_s6 }
  0x60   :  { %p2869_p4 = por %p2868_p3, %p2867_p2 }
  0x62   :  { %p2870_p5 = pnand %p2869_p4, %p2863_p1 }
  0x64   :  { %2873 = shalt.err (!%p2870_p5)
}
  0x65   :  { %106 = dma.hbm_to_vmem [thread:$0]  %s3232_s10, 2048, %s3084_s14, [#allocation12], %s2932_s20, %s2932_s20, %s2933_s21  }
  0x66   :  { %2918 = dma.done.wait [#allocation3], 256  }
  0x67   :  { %2919 = vsyncadd [#allocation3], 4294967040 }
  0x68   :  { %2920 = dma.done.wait [#allocation6], 18432  }
  0x69   :  { %2921 = vsyncadd [#allocation6], 4294948864 }
  0x6a   :  { %2922 = dma.done.wait [#allocation9], 4096  }
  0x6b   :  { %2923 = vsyncadd [#allocation9], 4294963200 }
  0x6c   :  { %2924 = dma.done.wait [#allocation12], 2048  }
  0x6d   :  { %2925 = vsyncadd [#allocation12], 4294965248  ;;  %v129_v0 = vld [vmem:[#allocation5] sm:$0xff]  ;;  %v130_v1 = vld [vmem:[#allocation5 + $0x8] sm:$0xff] }
  0x6e   :  { %v131_v2 = vld [vmem:[#allocation5 + $0x10] sm:$0xff]  ;;  %v2264_v3 = vpack.c.bf16 %v130_v1, %v129_v0  ;;  %v132_v4 = vld [vmem:[#allocation5 + $0x18] sm:$0xff]  ;;  %v133_v6 = vld [vmem:[#allocation5 + $0x20] sm:$0xff] }
  0x6f   :  { %v2268_v5 = vpack.c.bf16 %v132_v4, %v131_v2  ;;  %v134_v7 = vld [vmem:[#allocation5 + $0x28] sm:$0xff]  ;;  %v127_v9 = vld [vmem:[#allocation2] sm:$0xff]  ;;  %v136_v11 = vld [vmem:[#allocation5 + $0x38] sm:$0xff] }
  0x70   :  { %2265 = vmatprep.subr.bf16.mxu0 %v2264_v3  ;;  %v2272_v8 = vpack.c.bf16 %v134_v7, %v133_v6  ;;  %v135_v10 = vld [vmem:[#allocation5 + $0x30] sm:$0xff]  ;;  %1876 = vmatprep.mubr.f32.mxu0 %v127_v9  ;;  %v137_v13 = vld [vmem:[#allocation5 + $0x40] sm:$0xff]  ;;  %v138_v14 = vld [vmem:[#allocation5 + $0x48] sm:$0xff] }
  0x71   :  { %2267 = vmatpush3.bf16.msra.mxu0 %v2264_v3  ;;  %v2276_v12 = vpack.c.bf16 %v136_v11, %v135_v10  ;;  %v2280_v15 = vpack.c.bf16 %v138_v14, %v137_v13  ;;  %v139_v16 = vld [vmem:[#allocation5 + $0x50] sm:$0xff]  ;;  %v140_v17 = vld [vmem:[#allocation5 + $0x58] sm:$0xff]  ;;  %v141_v19 = vld [vmem:[#allocation5 + $0x60] sm:$0xff] }
  0x72   :  { %2269 = vmatprep.subr.bf16.mxu0 %v2268_v5  ;;  %v2284_v18 = vpack.c.bf16 %v140_v17, %v139_v16  ;;  %v142_v20 = vld [vmem:[#allocation5 + $0x68] sm:$0xff]  ;;  %v143_v22 = vld [vmem:[#allocation5 + $0x70] sm:$0xff]  ;;  %v144_v23 = vld [vmem:[#allocation5 + $0x78] sm:$0xff] }
  0x73   :  { %v2288_v21 = vpack.c.bf16 %v142_v20, %v141_v19  ;;  %v2292_v24 = vpack.c.bf16 %v144_v23, %v143_v22  ;;  %v128_v25 = vld [vmem:[#allocation2 + $0x8] sm:$0xff]  ;;  %v251_v26 = vld [vmem:[#allocation7] sm:$0xff]  ;;  %v252_v27 = vld [vmem:[#allocation7 + $0x8] sm:$0xff] }
  0x74   :  { %v2296_v28 = vpack.c.bf16 %v252_v27, %v251_v26  ;;  %v253_v29 = vld [vmem:[#allocation7 + $0x10] sm:$0xff]  ;;  %v254_v30 = vld [vmem:[#allocation7 + $0x18] sm:$0xff]  ;;  %v255_v32 = vld [vmem:[#allocation7 + $0x20] sm:$0xff] }
  0x75   :  { %2271 = vmatpush3.bf16.msra.mxu0 %v2268_v5  ;;  %v2300_v31 = vpack.c.bf16 %v254_v30, %v253_v29  ;;  %v256_v33 = vld [vmem:[#allocation7 + $0x28] sm:$0xff]  ;;  %v257_v35 = vld [vmem:[#allocation7 + $0x30] sm:$0xff]  ;;  %v258_v36 = vld [vmem:[#allocation7 + $0x38] sm:$0xff] }
  0x76   :  { %2273 = vmatprep.subr.bf16.mxu0 %v2272_v8  ;;  %2297 = vmatprep.subr.bf16.mxu1 %v2296_v28  ;;  %v2304_v34 = vpack.c.bf16 %v256_v33, %v255_v32  ;;  %v259_v37 = vld [vmem:[#allocation7 + $0x40] sm:$0xff]  ;;  %v2308_v38 = vpack.c.bf16 %v258_v36, %v257_v35  ;;  %v260_v39 = vld [vmem:[#allocation7 + $0x48] sm:$0xff]  ;;  %v261_v41 = vld [vmem:[#allocation7 + $0x50] sm:$0xff] }
  0x77   :  { %2299 = vmatpush3.bf16.msra.mxu1 %v2296_v28  ;;  %v2312_v40 = vpack.c.bf16 %v260_v39, %v259_v37  ;;  %v262_v42 = vld [vmem:[#allocation7 + $0x58] sm:$0xff]  ;;  %v263_v44 = vld [vmem:[#allocation7 + $0x60] sm:$0xff]  ;;  %v264_v45 = vld [vmem:[#allocation7 + $0x68] sm:$0xff] }
  0x78   :  { %2301 = vmatprep.subr.bf16.mxu1 %v2300_v31  ;;  %v2316_v43 = vpack.c.bf16 %v262_v42, %v261_v41  ;;  %v2320_v46 = vpack.c.bf16 %v264_v45, %v263_v44  ;;  %v265_v47 = vld [vmem:[#allocation7 + $0x70] sm:$0xff]  ;;  %v266_v48 = vld [vmem:[#allocation7 + $0x78] sm:$0xff]  ;;  %v372_v13 = vld [vmem:[#allocation7 + $0x80] sm:$0xff] }
  0x79   :  { %2275 = vmatpush3.bf16.msra.mxu0 %v2272_v8  ;;  %v2324_v49 = vpack.c.bf16 %v266_v48, %v265_v47  ;;  %v1595_v50 = vld [vmem:[%s3225_s3] ss:$0 sm:$0xff]  ;;  %v373_v14 = vld [vmem:[#allocation7 + $0x88] sm:$0xff]  ;;  %v375_v17 = vld [vmem:[#allocation7 + $0x98] sm:$0xff] }
  0x7a   :  { %2277 = vmatprep.subr.bf16.mxu0 %v2276_v12  ;;  %v374_v16 = vld [vmem:[#allocation7 + $0x90] sm:$0xff]  ;;  %v376_v19 = vld [vmem:[#allocation7 + $0xa0] sm:$0xff]  ;;  %v377_v20 = vld [vmem:[#allocation7 + $0xa8] sm:$0xff] }
  0x7b   :  { %2303 = vmatpush3.bf16.msra.mxu1 %v2300_v31  ;;  %v378_v22 = vld [vmem:[#allocation7 + $0xb0] sm:$0xff]  ;;  %v379_v23 = vld [vmem:[#allocation7 + $0xb8] sm:$0xff]  ;;  %v381_v26 = vld [vmem:[#allocation7 + $0xc8] sm:$0xff] }
  0x7c   :  { %2305 = vmatprep.subr.bf16.mxu1 %v2304_v34  ;;  %v382_v28 = vld [vmem:[#allocation7 + $0xd0] sm:$0xff]  ;;  %v383_v29 = vld [vmem:[#allocation7 + $0xd8] sm:$0xff]  ;;  %v384_v31 = vld [vmem:[#allocation7 + $0xe0] sm:$0xff] }
  0x7d   :  { %2279 = vmatpush3.bf16.msra.mxu0 %v2276_v12  ;;  %v2348_v30 = vpack.c.bf16 %v383_v29, %v382_v28  ;;  %v385_v32 = vld [vmem:[#allocation7 + $0xe8] sm:$0xff]  ;;  %v387_v35 = vld [vmem:[#allocation7 + $0xf8] sm:$0xff]  ;;  %v1598_v37 = vld [vmem:[%s3227_s5] ss:$0 sm:$0xff] }
  0x7e   :  { %2281 = vmatprep.subr.bf16.mxu0 %v2280_v15  ;;  %v2352_v33 = vpack.c.bf16 %v385_v32, %v384_v31 }
  0x7f   :  { %2307 = vmatpush3.bf16.msra.mxu1 %v2304_v34  ;;  %v386_v34 = vld [vmem:[#allocation7 + $0xf0] sm:$0xff] }
  0x80   :  { %2309 = vmatprep.subr.bf16.mxu1 %v2308_v38  ;;  %v2356_v36 = vpack.c.bf16 %v387_v35, %v386_v34 }
  0x81   :  { %2283 = vmatpush3.bf16.msra.mxu0 %v2280_v15  ;;  %v2328_v15 = vpack.c.bf16 %v373_v14, %v372_v13  ;;  %v503_v14 = vld [vmem:[#allocation7 + $0x140] sm:$0xff] }
  0x82   :  { %2285 = vmatprep.subr.bf16.mxu0 %v2284_v18 }
  0x83   :  { %2311 = vmatpush3.bf16.msra.mxu1 %v2308_v38 }
  0x84   :  { %2313 = vmatprep.subr.bf16.mxu1 %v2312_v40 }
  0x85   :  { %2287 = vmatpush3.bf16.msra.mxu0 %v2284_v18  ;;  %v2332_v18 = vpack.c.bf16 %v375_v17, %v374_v16  ;;  %v505_v17 = vld [vmem:[#allocation7 + $0x150] sm:$0xff] }
  0x86   :  { %2289 = vmatprep.subr.bf16.mxu0 %v2288_v21 }
  0x87   :  { %2315 = vmatpush3.bf16.msra.mxu1 %v2312_v40 }
  0x88   :  { %2317 = vmatprep.subr.bf16.mxu1 %v2316_v43 }
  0x89   :  { %2291 = vmatpush3.bf16.msra.mxu0 %v2288_v21  ;;  %v2336_v21 = vpack.c.bf16 %v377_v20, %v376_v19  ;;  %v507_v20 = vld [vmem:[#allocation7 + $0x160] sm:$0xff] }
  0x8a   :  { %2293 = vmatprep.subr.bf16.mxu0 %v2292_v24 }
  0x8b   :  { %2319 = vmatpush3.bf16.msra.mxu1 %v2316_v43 }
  0x8c   :  { %2321 = vmatprep.subr.bf16.mxu1 %v2320_v46 }
  0x8d   :  { %2295 = vmatpush3.bf16.msra.mxu0 %v2292_v24  ;;  %v2340_v24 = vpack.c.bf16 %v379_v23, %v378_v22  ;;  %v509_v23 = vld [vmem:[#allocation7 + $0x170] sm:$0xff] }
  0x8e   :  { %2329 = vmatprep.subr.bf16.mxu0 %v2328_v15 }
  0x8f   :  { %2323 = vmatpush3.bf16.msra.mxu1 %v2320_v46 }
  0x90   :  { %1877 = vmatmul.mubr.f32.vlgmr.msra.gmra.mrb[0].mxu0 %v128_v25  ;;  %2325 = vmatprep.subr.bf16.mxu1 %v2324_v49  ;;  %v380_v25 = vld [vmem:[#allocation7 + $0xc0] sm:$0xff] }
  0x91   :  { %2331 = vmatpush3.bf16.msra.mxu0 %v2328_v15  ;;  %v2344_v27 = vpack.c.bf16 %v381_v26, %v380_v25  ;;  %v504_v15 = vld [vmem:[#allocation7 + $0x148] sm:$0xff]  ;;  %v1601_v26 = vld [vmem:[%s3227_s5 + $0x1] ss:$0 sm:$0xff] }
  0x92   :  { %2333 = vmatprep.subr.bf16.mxu0 %v2332_v18  ;;  %v2376_v16 = vpack.c.bf16 %v504_v15, %v503_v14  ;;  %v1604_v15 = vld [vmem:[%s3227_s5 + $0x2] ss:$0 sm:$0xff] }
  0x93   :  { %2327 = vmatpush3.bf16.msra.mxu1 %v2324_v49 }
  0x95   :  { %2335 = vmatpush3.bf16.msra.mxu0 %v2332_v18  ;;  %v506_v18 = vld [vmem:[#allocation7 + $0x158] sm:$0xff] }
  0x96   :  { %2337 = vmatprep.subr.bf16.mxu0 %v2336_v21  ;;  %v2380_v19 = vpack.c.bf16 %v506_v18, %v505_v17 }
  0x99   :  { %2339 = vmatpush3.bf16.msra.mxu0 %v2336_v21  ;;  %v508_v21 = vld [vmem:[#allocation7 + $0x168] sm:$0xff] }
  0x9a   :  { %2341 = vmatprep.subr.bf16.mxu0 %v2340_v24  ;;  %v2384_v22 = vpack.c.bf16 %v508_v21, %v507_v20 }
  0x9d   :  { %2343 = vmatpush3.bf16.msra.mxu0 %v2340_v24  ;;  %v510_v24 = vld [vmem:[#allocation7 + $0x178] sm:$0xff] }
  0x9e   :  { %2345 = vmatprep.subr.bf16.mxu0 %v2344_v27  ;;  %v2388_v25 = vpack.c.bf16 %v510_v24, %v509_v23 }
  0xa1   :  { %2347 = vmatpush3.bf16.msra.mxu0 %v2344_v27 }
  0xa2   :  { %2349 = vmatprep.subr.bf16.mxu0 %v2348_v30 }
  0xa5   :  { %2351 = vmatpush3.bf16.msra.mxu0 %v2348_v30 }
  0xa6   :  { %2353 = vmatprep.subr.bf16.mxu0 %v2352_v33 }
  0xa9   :  { %2355 = vmatpush3.bf16.msra.mxu0 %v2352_v33 }
  0xaa   :  { %2357 = vmatprep.subr.bf16.mxu0 %v2356_v36 }
  0xad   :  { %2359 = vmatpush3.bf16.msra.mxu0 %v2356_v36 }
 0x163   :  { %v1878_v51 = vpop.f32.mrb[0].mxu0 }
 0x164   :  { %v224_v52 = vadd.f32 %v1878_v51, %v1595_v50  ;;  %v218_v53 = vpop.f32.mrb[1].mxu0 }
 0x165   :  { %v219_v54 = vadd.f32 %v1595_v50, %v218_v53 }
 0x166   :  { %v228_v55 = vmin.f32 %v224_v52, 20.0  ;;  %vm246_vm1 = vcmp.gt.f32.partialorder %v224_v52, 20.0 }
 0x167   :  { %v227_v56 = vmin.f32 %v219_v54, 20.0  ;;  %vm245_vm0 = vcmp.gt.f32.partialorder %v219_v54, 20.0 }
 0x168   :  { %v231_v57 = vmul.f32 1.442695, %v228_v55 }
 0x169   :  { %v229_v58 = vmul.f32 1.442695, %v227_v56 }
 0x16a   :  { %2658 = vpow2.f32 %v231_v57 }
 0x16b   :  { %2660 = vpow2.f32 %v229_v58 }
 0x174   :  { %v2659_v59 = vpop.eup %2658 }
 0x175   :  { %v2661_v60 = vpop.eup %2660  ;;  %v234_v61 = vadd.f32 1.0, %v2659_v59 }
 0x176   :  { %v233_v62 = vadd.f32 1.0, %v2661_v60 }
 0x177   :  { %v236_v63 = vmul.f32 %v234_v61, %v234_v61 }
 0x178   :  { %v235_v0 = vmul.f32 %v233_v62, %v233_v62 }
 0x179   :  { %v240_v1 = vadd.f32 1.0, %v236_v63  ;;  %v1597_v3 = vadd.f32 -1.0, %v236_v63 }
 0x17a   :  { %v239_v2 = vadd.f32 1.0, %v235_v0  ;;  %v1596_v5 = vadd.f32 -1.0, %v235_v0  ;;  %v495_v0 = vld [vmem:[#allocation7 + $0x100] sm:$0xff] }
 0x17b   :  { %2662 = vrcp.f32 %v240_v1  ;;  %v496_v1 = vld [vmem:[#allocation7 + $0x108] sm:$0xff] }
 0x17c   :  { %2664 = vrcp.f32 %v239_v2  ;;  %v2360_v2 = vpack.c.bf16 %v496_v1, %v495_v0  ;;  %v624_v1 = vld [vmem:[#allocation7 + $0x1c0] sm:$0xff] }
 0x17e   :  { %2361 = vmatprep.subr.bf16.mxu1 %v2360_v2 }
 0x185   :  { %v2663_v4 = vpop.eup %2662 }
 0x186   :  { %v2665_v6 = vpop.eup %2664  ;;  %v244_v7 = vmul.f32 %v2663_v4, %v1597_v3  ;;  %v497_v3 = vld [vmem:[#allocation7 + $0x110] sm:$0xff]  ;;  %v498_v4 = vld [vmem:[#allocation7 + $0x118] sm:$0xff] }
 0x187   :  { %v242_v8 = vmul.f32 %v2665_v6, %v1596_v5  ;;  %v2364_v5 = vpack.c.bf16 %v498_v4, %v497_v3  ;;  %v499_v6 = vld [vmem:[#allocation7 + $0x120] sm:$0xff]  ;;  %v626_v4 = vld [vmem:[#allocation7 + $0x1d0] sm:$0xff] }
 0x188   :  { %v248_v9 = vmul.f32 %v244_v7, %v224_v52  ;;  %v500_v7 = vld [vmem:[#allocation7 + $0x128] sm:$0xff] }
 0x189   :  { %v247_v10 = vmul.f32 %v242_v8, %v219_v54  ;;  %v2368_v8 = vpack.c.bf16 %v500_v7, %v499_v6  ;;  %v628_v7 = vld [vmem:[#allocation7 + $0x1e0] sm:$0xff] }
 0x18a   :  { %v3127_v12 = vsel %vm246_vm1, %v224_v52, %v248_v9  ;;  %v501_v9 = vld [vmem:[#allocation7 + $0x130] sm:$0xff] }
 0x18b   :  { %v3124_v11 = vsel %vm245_vm0, %v219_v54, %v247_v10  ;;  %v502_v10 = vld [vmem:[#allocation7 + $0x138] sm:$0xff] }
 0x18c   :  { %1911 = vmatprep.mubr.f32.mxu1 %v3124_v11  ;;  %v2372_v13 = vpack.c.bf16 %v502_v10, %v501_v9  ;;  %v630_v10 = vld [vmem:[#allocation7 + $0x1f0] sm:$0xff] }
 0x18d   :  { %1912 = vmatmul.mubr.f32.vlgmr.msra.gmra.mrb[0].mxu1 %v3127_v12 }
 0x18e   :  { %2363 = vmatpush3.bf16.msra.mxu1 %v2360_v2  ;;  %v625_v2 = vld [vmem:[#allocation7 + $0x1c8] sm:$0xff] }
 0x18f   :  { %2365 = vmatprep.subr.bf16.mxu1 %v2364_v5  ;;  %v2408_v3 = vpack.c.bf16 %v625_v2, %v624_v1  ;;  %v847_v2 = vld [vmem:[#allocation10] sm:$0xff] }
 0x192   :  { %2367 = vmatpush3.bf16.msra.mxu1 %v2364_v5  ;;  %v627_v5 = vld [vmem:[#allocation7 + $0x1d8] sm:$0xff] }
 0x193   :  { %2369 = vmatprep.subr.bf16.mxu1 %v2368_v8  ;;  %v2412_v6 = vpack.c.bf16 %v627_v5, %v626_v4  ;;  %v849_v4 = vld [vmem:[#allocation10 + $0x10] sm:$0xff] }
 0x196   :  { %2371 = vmatpush3.bf16.msra.mxu1 %v2368_v8  ;;  %v629_v8 = vld [vmem:[#allocation7 + $0x1e8] sm:$0xff] }
 0x197   :  { %2373 = vmatprep.subr.bf16.mxu1 %v2372_v13  ;;  %v2416_v9 = vpack.c.bf16 %v629_v8, %v628_v7  ;;  %v851_v8 = vld [vmem:[#allocation10 + $0x20] sm:$0xff] }
 0x19a   :  { %2375 = vmatpush3.bf16.msra.mxu1 %v2372_v13  ;;  %v631_v13 = vld [vmem:[#allocation7 + $0x1f8] sm:$0xff] }
 0x19b   :  { %2377 = vmatprep.subr.bf16.mxu1 %v2376_v16  ;;  %v2420_v14 = vpack.c.bf16 %v631_v13, %v630_v10  ;;  %v853_v13 = vld [vmem:[#allocation10 + $0x30] sm:$0xff] }
 0x19e   :  { %2379 = vmatpush3.bf16.msra.mxu1 %v2376_v16 }
 0x19f   :  { %2381 = vmatprep.subr.bf16.mxu1 %v2380_v19 }
 0x1a2   :  { %2383 = vmatpush3.bf16.msra.mxu1 %v2380_v19 }
 0x1a3   :  { %2385 = vmatprep.subr.bf16.mxu1 %v2384_v22 }
 0x1a6   :  { %2387 = vmatpush3.bf16.msra.mxu1 %v2384_v22 }
 0x1a7   :  { %2389 = vmatprep.subr.bf16.mxu1 %v2388_v25 }
 0x1aa   :  { %2391 = vmatpush3.bf16.msra.mxu1 %v2388_v25 }
 0x260   :  { %v1913_v38 = vpop.f32.mrb[0].mxu1 }
 0x261   :  { %v344_v39 = vadd.f32 %v1913_v38, %v1598_v37  ;;  %v338_v40 = vpop.f32.mrb[1].mxu1 }
 0x262   :  { %v339_v41 = vadd.f32 %v1598_v37, %v338_v40 }
 0x263   :  { %v348_v42 = vmin.f32 %v344_v39, 20.0  ;;  %vm366_vm3 = vcmp.gt.f32.partialorder %v344_v39, 20.0 }
 0x264   :  { %v347_v43 = vmin.f32 %v339_v41, 20.0  ;;  %vm365_vm2 = vcmp.gt.f32.partialorder %v339_v41, 20.0 }
 0x265   :  { %v351_v44 = vmul.f32 1.442695, %v348_v42 }
 0x266   :  { %v349_v45 = vmul.f32 1.442695, %v347_v43 }
 0x267   :  { %2666 = vpow2.f32 %v351_v44 }
 0x268   :  { %2668 = vpow2.f32 %v349_v45 }
 0x271   :  { %v2667_v46 = vpop.eup %2666 }
 0x272   :  { %v2669_v47 = vpop.eup %2668  ;;  %v354_v48 = vadd.f32 1.0, %v2667_v46 }
 0x273   :  { %v353_v49 = vadd.f32 1.0, %v2669_v47 }
 0x274   :  { %v356_v50 = vmul.f32 %v354_v48, %v354_v48 }
 0x275   :  { %v355_v51 = vmul.f32 %v353_v49, %v353_v49 }
 0x276   :  { %v360_v52 = vadd.f32 1.0, %v356_v50  ;;  %v1600_v54 = vadd.f32 -1.0, %v356_v50 }
 0x277   :  { %v359_v53 = vadd.f32 1.0, %v355_v51  ;;  %v1599_v56 = vadd.f32 -1.0, %v355_v51 }
 0x278   :  { %2670 = vrcp.f32 %v360_v52 }
 0x279   :  { %2672 = vrcp.f32 %v359_v53 }
 0x282   :  { %v2671_v55 = vpop.eup %2670 }
 0x283   :  { %v2673_v57 = vpop.eup %2672  ;;  %v364_v58 = vmul.f32 %v2671_v55, %v1600_v54  ;;  %v616_v55 = vld [vmem:[#allocation7 + $0x180] sm:$0xff] }
 0x284   :  { %v362_v59 = vmul.f32 %v2673_v57, %v1599_v56  ;;  %v617_v56 = vld [vmem:[#allocation7 + $0x188] sm:$0xff] }
 0x285   :  { %v368_v60 = vmul.f32 %v364_v58, %v344_v39  ;;  %v2392_v57 = vpack.c.bf16 %v617_v56, %v616_v55  ;;  %v618_v58 = vld [vmem:[#allocation7 + $0x190] sm:$0xff]  ;;  %v746_v56 = vld [vmem:[#allocation8 + $0x40] sm:$0xff] }
 0x286   :  { %v367_v61 = vmul.f32 %v362_v59, %v339_v41  ;;  %v619_v59 = vld [vmem:[#allocation7 + $0x198] sm:$0xff] }
 0x287   :  { %v370_v63 = vsel %vm366_vm3, %v344_v39, %v368_v60  ;;  %2393 = vmatprep.subr.bf16.mxu0 %v2392_v57  ;;  %v2396_v60 = vpack.c.bf16 %v619_v59, %v618_v58  ;;  %v748_v59 = vld [vmem:[#allocation8 + $0x50] sm:$0xff] }
 0x288   :  { %v369_v62 = vsel %vm365_vm2, %v339_v41, %v367_v61  ;;  %v620_v61 = vld [vmem:[#allocation7 + $0x1a0] sm:$0xff] }
 0x289   :  { %1946 = vmatprep.mubr.f32.mxu0 %v369_v62 }
 0x28a   :  { %1947 = vmatmul.mubr.f32.vlgmr.msra.gmra.mrb[2].mxu0 %v370_v63  ;;  %v623_v63 = vld [vmem:[#allocation7 + $0x1b8] sm:$0xff] }
 0x28b   :  { %2395 = vmatpush3.bf16.msra.mxu0 %v2392_v57  ;;  %v747_v57 = vld [vmem:[#allocation8 + $0x48] sm:$0xff] }
 0x28c   :  { %2397 = vmatprep.subr.bf16.mxu0 %v2396_v60  ;;  %v2440_v58 = vpack.c.bf16 %v747_v57, %v746_v56  ;;  %v861_v56 = vld [vmem:[#allocation10 + $0x70] sm:$0xff]  ;;  %v862_v57 = vld [vmem:[#allocation10 + $0x78] sm:$0xff] }
 0x28f   :  { %2399 = vmatpush3.bf16.msra.mxu0 %v2396_v60  ;;  %v749_v60 = vld [vmem:[#allocation8 + $0x58] sm:$0xff] }
 0x35d   :  { %v1948_v27 = vpop.f32.mrb[2].mxu0 }
 0x35e   :  { %v465_v28 = vadd.f32 %v1948_v27, %v1601_v26  ;;  %v459_v29 = vpop.f32.mrb[3].mxu0 }
 0x35f   :  { %v460_v30 = vadd.f32 %v1601_v26, %v459_v29 }
 0x360   :  { %v469_v31 = vmin.f32 %v465_v28, 20.0  ;;  %vm487_vm4 = vcmp.gt.f32.partialorder %v465_v28, 20.0 }
 0x361   :  { %v468_v32 = vmin.f32 %v460_v30, 20.0  ;;  %vm486_vm5 = vcmp.gt.f32.partialorder %v460_v30, 20.0 }
 0x362   :  { %v472_v33 = vmul.f32 1.442695, %v469_v31 }
 0x363   :  { %v470_v34 = vmul.f32 1.442695, %v468_v32 }
 0x364   :  { %2674 = vpow2.f32 %v472_v33 }
 0x365   :  { %2676 = vpow2.f32 %v470_v34 }
 0x36e   :  { %v2675_v35 = vpop.eup %2674 }
 0x36f   :  { %v2677_v36 = vpop.eup %2676  ;;  %v475_v37 = vadd.f32 1.0, %v2675_v35 }
 0x370   :  { %v474_v38 = vadd.f32 1.0, %v2677_v36 }
 0x371   :  { %v477_v39 = vmul.f32 %v475_v37, %v475_v37 }
 0x372   :  { %v476_v40 = vmul.f32 %v474_v38, %v474_v38 }
 0x373   :  { %v481_v41 = vadd.f32 1.0, %v477_v39  ;;  %v1603_v43 = vadd.f32 -1.0, %v477_v39 }
 0x374   :  { %v480_v42 = vadd.f32 1.0, %v476_v40  ;;  %v1602_v45 = vadd.f32 -1.0, %v476_v40 }
 0x375   :  { %2678 = vrcp.f32 %v481_v41 }
 0x376   :  { %2680 = vrcp.f32 %v480_v42  ;;  %v738_v42 = vld [vmem:[#allocation8] sm:$0xff] }
 0x37f   :  { %v2679_v44 = vpop.eup %2678 }
 0x380   :  { %v2681_v46 = vpop.eup %2680  ;;  %v485_v47 = vmul.f32 %v2679_v44, %v1603_v43  ;;  %v739_v43 = vld [vmem:[#allocation8 + $0x8] sm:$0xff] }
 0x381   :  { %v483_v48 = vmul.f32 %v2681_v46, %v1602_v45  ;;  %v2424_v44 = vpack.c.bf16 %v739_v43, %v738_v42  ;;  %v740_v45 = vld [vmem:[#allocation8 + $0x10] sm:$0xff]  ;;  %v741_v46 = vld [vmem:[#allocation8 + $0x18] sm:$0xff] }
 0x382   :  { %v489_v49 = vmul.f32 %v485_v47, %v465_v28  ;;  %v2428_v47 = vpack.c.bf16 %v741_v46, %v740_v45 }
 0x383   :  { %v488_v50 = vmul.f32 %v483_v48, %v460_v30  ;;  %2425 = vmatprep.subr.bf16.mxu1 %v2424_v44  ;;  %v742_v48 = vld [vmem:[#allocation8 + $0x20] sm:$0xff] }
 0x384   :  { %v491_v51 = vsel %vm487_vm4, %v465_v28, %v489_v49  ;;  %v743_v49 = vld [vmem:[#allocation8 + $0x28] sm:$0xff] }
 0x385   :  { %v490_v52 = vsel %vm486_vm5, %v460_v30, %v488_v50  ;;  %v3140_v54 = vadd.f32 %v491_v51, %v3127_v12  ;;  %v622_v12 = vld [vmem:[#allocation7 + $0x1b0] sm:$0xff]  ;;  %v2432_v50 = vpack.c.bf16 %v743_v49, %v742_v48 }
 0x386   :  { %v3137_v53 = vadd.f32 %v490_v52, %v3124_v11  ;;  %v621_v11 = vld [vmem:[#allocation7 + $0x1a8] sm:$0xff]  ;;  %v2404_v0 = vpack.c.bf16 %v623_v63, %v622_v12  ;;  %v744_v51 = vld [vmem:[#allocation8 + $0x30] sm:$0xff]  ;;  %v745_v52 = vld [vmem:[#allocation8 + $0x38] sm:$0xff] }
 0x387   :  { %v2400_v62 = vpack.c.bf16 %v621_v11, %v620_v61  ;;  %v2436_v55 = vpack.c.bf16 %v745_v52, %v744_v51  ;;  %v2444_v61 = vpack.c.bf16 %v749_v60, %v748_v59  ;;  %v750_v11 = vld [vmem:[#allocation8 + $0x60] sm:$0xff]  ;;  %v752_v63 = vld [vmem:[#allocation8 + $0x70] sm:$0xff] }
 0x388   :  { %1981 = vmatprep.mubr.f32.mxu1 %v3137_v53  ;;  %v1610_v59 = vld [vmem:[%s3229_s7] ss:$0 sm:$0xff] }
 0x389   :  { %1982 = vmatmul.mubr.f32.vlgmr.msra.gmra.mrb[2].mxu1 %v3140_v54  ;;  %2401 = vmatprep.subr.bf16.mxu0 %v2400_v62 }
 0x38a   :  { %2403 = vmatpush3.bf16.msra.mxu0 %v2400_v62  ;;  %2427 = vmatpush3.bf16.msra.mxu1 %v2424_v44  ;;  %v751_v62 = vld [vmem:[#allocation8 + $0x68] sm:$0xff] }
 0x38b   :  { %2405 = vmatprep.subr.bf16.mxu0 %v2404_v0  ;;  %2429 = vmatprep.subr.bf16.mxu1 %v2428_v47  ;;  %v2448_v12 = vpack.c.bf16 %v751_v62, %v750_v11 }
 0x38e   :  { %2407 = vmatpush3.bf16.msra.mxu0 %v2404_v0  ;;  %2431 = vmatpush3.bf16.msra.mxu1 %v2428_v47  ;;  %v753_v0 = vld [vmem:[#allocation8 + $0x78] sm:$0xff] }
 0x38f   :  { %2409 = vmatprep.subr.bf16.mxu0 %v2408_v3  ;;  %2433 = vmatprep.subr.bf16.mxu1 %v2432_v50  ;;  %v2452_v1 = vpack.c.bf16 %v753_v0, %v752_v63  ;;  %v970_v63 = vld [vmem:[#allocation7 + $0x200] sm:$0xff]  ;;  %v971_v0 = vld [vmem:[#allocation7 + $0x208] sm:$0xff] }
 0x392   :  { %2411 = vmatpush3.bf16.msra.mxu0 %v2408_v3  ;;  %2435 = vmatpush3.bf16.msra.mxu1 %v2432_v50  ;;  %v848_v3 = vld [vmem:[#allocation10 + $0x8] sm:$0xff] }
 0x393   :  { %2413 = vmatprep.subr.bf16.mxu0 %v2412_v6  ;;  %2437 = vmatprep.subr.bf16.mxu1 %v2436_v55  ;;  %v2456_v5 = vpack.c.bf16 %v848_v3, %v847_v2  ;;  %v972_v2 = vld [vmem:[#allocation7 + $0x210] sm:$0xff]  ;;  %v973_v3 = vld [vmem:[#allocation7 + $0x218] sm:$0xff] }
 0x396   :  { %2415 = vmatpush3.bf16.msra.mxu0 %v2412_v6  ;;  %2439 = vmatpush3.bf16.msra.mxu1 %v2436_v55  ;;  %v850_v6 = vld [vmem:[#allocation10 + $0x18] sm:$0xff] }
 0x397   :  { %2417 = vmatprep.subr.bf16.mxu0 %v2416_v9  ;;  %2441 = vmatprep.subr.bf16.mxu1 %v2440_v58  ;;  %v2460_v7 = vpack.c.bf16 %v850_v6, %v849_v4  ;;  %v2492_v4 = vpack.c.bf16 %v973_v3, %v972_v2  ;;  %v975_v6 = vld [vmem:[#allocation7 + $0x228] sm:$0xff]  ;;  %v1102_v2 = vld [vmem:[#allocation7 + $0x2d8] sm:$0xff] }
 0x39a   :  { %2419 = vmatpush3.bf16.msra.mxu0 %v2416_v9  ;;  %2443 = vmatpush3.bf16.msra.mxu1 %v2440_v58  ;;  %v852_v9 = vld [vmem:[#allocation10 + $0x28] sm:$0xff]  ;;  %v2484_v58 = vpack.c.bf16 %v862_v57, %v861_v56  ;;  %v1093_v57 = vld [vmem:[#allocation7 + $0x290] sm:$0xff] }
 0x39b   :  { %2421 = vmatprep.subr.bf16.mxu0 %v2420_v14  ;;  %2445 = vmatprep.subr.bf16.mxu1 %v2444_v61  ;;  %v2464_v10 = vpack.c.bf16 %v852_v9, %v851_v8  ;;  %v976_v8 = vld [vmem:[#allocation7 + $0x230] sm:$0xff]  ;;  %v977_v9 = vld [vmem:[#allocation7 + $0x238] sm:$0xff] }
 0x39e   :  { %2423 = vmatpush3.bf16.msra.mxu0 %v2420_v14  ;;  %2447 = vmatpush3.bf16.msra.mxu1 %v2444_v61  ;;  %v854_v14 = vld [vmem:[#allocation10 + $0x38] sm:$0xff]  ;;  %v1611_v61 = vld [vmem:[%s3223_s1] ss:$0 sm:$0xff] }
 0x39f   :  { %2449 = vmatprep.subr.bf16.mxu1 %v2448_v12  ;;  %2457 = vmatprep.subr.bf16.mxu0 %v2456_v5 }
 0x3a2   :  { %2451 = vmatpush3.bf16.msra.mxu1 %v2448_v12 }
 0x3a3   :  { %2453 = vmatprep.subr.bf16.mxu1 %v2452_v1 }
 0x3a6   :  { %2455 = vmatpush3.bf16.msra.mxu1 %v2452_v1  ;;  %v2488_v1 = vpack.c.bf16 %v971_v0, %v970_v63  ;;  %v1100_v63 = vld [vmem:[#allocation7 + $0x2c8] sm:$0xff] }
 0x3a8   :  { %2489 = vmatprep.subr.bf16.mxu1 %v2488_v1 }
 0x45c   :  { %v1983_v16 = vpop.f32.mrb[2].mxu1 }
 0x45d   :  { %v588_v17 = vadd.f32 %v1983_v16, %v1604_v15  ;;  %v582_v18 = vpop.f32.mrb[3].mxu1  ;;  %v855_v16 = vld [vmem:[#allocation10 + $0x40] sm:$0xff] }
 0x45e   :  { %v583_v19 = vadd.f32 %v1604_v15, %v582_v18  ;;  %v2468_v15 = vpack.c.bf16 %v854_v14, %v853_v13  ;;  %v978_v13 = vld [vmem:[#allocation7 + $0x240] sm:$0xff]  ;;  %v979_v14 = vld [vmem:[#allocation7 + $0x248] sm:$0xff] }
 0x45f   :  { %v592_v20 = vmin.f32 %v588_v17, 20.0  ;;  %vm610_vm7 = vcmp.gt.f32.partialorder %v588_v17, 20.0 }
 0x460   :  { %v591_v21 = vmin.f32 %v583_v19, 20.0  ;;  %vm609_vm6 = vcmp.gt.f32.partialorder %v583_v19, 20.0 }
 0x461   :  { %v595_v22 = vmul.f32 1.442695, %v592_v20  ;;  %v858_v20 = vld [vmem:[#allocation10 + $0x58] sm:$0xff] }
 0x462   :  { %v593_v23 = vmul.f32 1.442695, %v591_v21 }
 0x463   :  { %2682 = vpow2.f32 %v595_v22  ;;  %v859_v22 = vld [vmem:[#allocation10 + $0x60] sm:$0xff] }
 0x464   :  { %2684 = vpow2.f32 %v593_v23  ;;  %v860_v23 = vld [vmem:[#allocation10 + $0x68] sm:$0xff] }
 0x46d   :  { %v2683_v24 = vpop.eup %2682 }
 0x46e   :  { %v2685_v25 = vpop.eup %2684  ;;  %v598_v26 = vadd.f32 1.0, %v2683_v24  ;;  %v2480_v24 = vpack.c.bf16 %v860_v23, %v859_v22  ;;  %v984_v22 = vld [vmem:[#allocation7 + $0x270] sm:$0xff]  ;;  %v985_v23 = vld [vmem:[#allocation7 + $0x278] sm:$0xff] }
 0x46f   :  { %v597_v27 = vadd.f32 1.0, %v2685_v25  ;;  %v1607_v25 = vld [vmem:[%s3227_s5 + $0x3] ss:$0 sm:$0xff] }
 0x470   :  { %v600_v28 = vmul.f32 %v598_v26, %v598_v26 }
 0x471   :  { %v599_v29 = vmul.f32 %v597_v27, %v597_v27 }
 0x472   :  { %v604_v30 = vadd.f32 1.0, %v600_v28  ;;  %v1606_v32 = vadd.f32 -1.0, %v600_v28 }
 0x473   :  { %v603_v31 = vadd.f32 1.0, %v599_v29  ;;  %v1605_v34 = vadd.f32 -1.0, %v599_v29 }
 0x474   :  { %2686 = vrcp.f32 %v604_v30 }
 0x475   :  { %2688 = vrcp.f32 %v603_v31 }
 0x47e   :  { %v2687_v33 = vpop.eup %2686 }
 0x47f   :  { %v2689_v35 = vpop.eup %2688  ;;  %v608_v36 = vmul.f32 %v2687_v33, %v1606_v32 }
 0x480   :  { %v606_v37 = vmul.f32 %v2689_v35, %v1605_v34 }
 0x481   :  { %v612_v38 = vmul.f32 %v608_v36, %v588_v17 }
 0x482   :  { %v611_v39 = vmul.f32 %v606_v37, %v583_v19 }
 0x483   :  { %v614_v41 = vsel %vm610_vm7, %v588_v17, %v612_v38  ;;  %v856_v17 = vld [vmem:[#allocation10 + $0x48] sm:$0xff] }
 0x484   :  { %v613_v40 = vsel %vm609_vm6, %v583_v19, %v611_v39  ;;  %v2472_v18 = vpack.c.bf16 %v856_v17, %v855_v16  ;;  %v857_v19 = vld [vmem:[#allocation10 + $0x50] sm:$0xff]  ;;  %v981_v17 = vld [vmem:[#allocation7 + $0x258] sm:$0xff] }
 0x485   :  { %2016 = vmatprep.mubr.f32.mxu0 %v613_v40  ;;  %v2476_v21 = vpack.c.bf16 %v858_v20, %v857_v19  ;;  %v980_v16 = vld [vmem:[#allocation7 + $0x250] sm:$0xff]  ;;  %v982_v19 = vld [vmem:[#allocation7 + $0x260] sm:$0xff]  ;;  %v983_v20 = vld [vmem:[#allocation7 + $0x268] sm:$0xff] }
 0x486   :  { %2017 = vmatmul.mubr.f32.vlgmr.msra.gmra.mrb[4].mxu0 %v614_v41 }
 0x487   :  { %2459 = vmatpush3.bf16.msra.mxu0 %v2456_v5  ;;  %v974_v5 = vld [vmem:[#allocation7 + $0x220] sm:$0xff] }
 0x488   :  { %2461 = vmatprep.subr.bf16.mxu0 %v2460_v7 }
 0x48b   :  { %2463 = vmatpush3.bf16.msra.mxu0 %v2460_v7  ;;  %v2496_v7 = vpack.c.bf16 %v975_v6, %v974_v5  ;;  %v1104_v5 = vld [vmem:[#allocation7 + $0x2e8] sm:$0xff] }
 0x48c   :  { %2465 = vmatprep.subr.bf16.mxu0 %v2464_v10 }
 0x48f   :  { %2467 = vmatpush3.bf16.msra.mxu0 %v2464_v10  ;;  %v2500_v10 = vpack.c.bf16 %v977_v9, %v976_v8  ;;  %v1106_v8 = vld [vmem:[#allocation7 + $0x2f8] sm:$0xff] }
 0x490   :  { %2469 = vmatprep.subr.bf16.mxu0 %v2468_v15 }
 0x493   :  { %2471 = vmatpush3.bf16.msra.mxu0 %v2468_v15  ;;  %v2504_v15 = vpack.c.bf16 %v979_v14, %v978_v13 }
 0x494   :  { %2473 = vmatprep.subr.bf16.mxu0 %v2472_v18 }
 0x497   :  { %2475 = vmatpush3.bf16.msra.mxu0 %v2472_v18  ;;  %v2508_v18 = vpack.c.bf16 %v981_v17, %v980_v16 }
 0x498   :  { %2477 = vmatprep.subr.bf16.mxu0 %v2476_v21 }
 0x49b   :  { %2479 = vmatpush3.bf16.msra.mxu0 %v2476_v21  ;;  %v2512_v21 = vpack.c.bf16 %v983_v20, %v982_v19 }
 0x49c   :  { %2481 = vmatprep.subr.bf16.mxu0 %v2480_v24 }
 0x49f   :  { %2483 = vmatpush3.bf16.msra.mxu0 %v2480_v24  ;;  %v2516_v24 = vpack.c.bf16 %v985_v23, %v984_v22 }
 0x4a0   :  { %2485 = vmatprep.subr.bf16.mxu0 %v2484_v58 }
 0x4a3   :  { %2487 = vmatpush3.bf16.msra.mxu0 %v2484_v58  ;;  %v1094_v58 = vld [vmem:[#allocation7 + $0x298] sm:$0xff] }
 0x559   :  { %v2018_v26 = vpop.f32.mrb[4].mxu0 }
 0x55a   :  { %v709_v27 = vadd.f32 %v2018_v26, %v1607_v25  ;;  %v703_v28 = vpop.f32.mrb[5].mxu0 }
 0x55b   :  { %v704_v29 = vadd.f32 %v1607_v25, %v703_v28  ;;  %v1612_v25 = vld [vmem:[%s3231_s9] ss:$0 sm:$0xff] }
 0x55c   :  { %v713_v30 = vmin.f32 %v709_v27, 20.0  ;;  %vm731_vm8 = vcmp.gt.f32.partialorder %v709_v27, 20.0 }
 0x55d   :  { %v712_v31 = vmin.f32 %v704_v29, 20.0  ;;  %vm730_vm9 = vcmp.gt.f32.partialorder %v704_v29, 20.0 }
 0x55e   :  { %v716_v32 = vmul.f32 1.442695, %v713_v30 }
 0x55f   :  { %v714_v33 = vmul.f32 1.442695, %v712_v31 }
 0x560   :  { %2690 = vpow2.f32 %v716_v32 }
 0x561   :  { %2692 = vpow2.f32 %v714_v33 }
 0x56a   :  { %v2691_v34 = vpop.eup %2690 }
 0x56b   :  { %v2693_v35 = vpop.eup %2692  ;;  %v719_v36 = vadd.f32 1.0, %v2691_v34 }
 0x56c   :  { %v718_v37 = vadd.f32 1.0, %v2693_v35 }
 0x56d   :  { %v721_v38 = vmul.f32 %v719_v36, %v719_v36 }
 0x56e   :  { %v720_v39 = vmul.f32 %v718_v37, %v718_v37 }
 0x56f   :  { %v725_v40 = vadd.f32 1.0, %v721_v38  ;;  %v1609_v42 = vadd.f32 -1.0, %v721_v38 }
 0x570   :  { %v724_v41 = vadd.f32 1.0, %v720_v39  ;;  %v1608_v44 = vadd.f32 -1.0, %v720_v39 }
 0x571   :  { %2694 = vrcp.f32 %v725_v40 }
 0x572   :  { %2696 = vrcp.f32 %v724_v41 }
 0x57b   :  { %v2695_v43 = vpop.eup %2694 }
 0x57c   :  { %v2697_v45 = vpop.eup %2696  ;;  %v729_v46 = vmul.f32 %v2695_v43, %v1609_v42 }
 0x57d   :  { %v727_v47 = vmul.f32 %v2697_v45, %v1608_v44 }
 0x57e   :  { %v733_v48 = vmul.f32 %v729_v46, %v709_v27 }
 0x57f   :  { %v732_v49 = vmul.f32 %v727_v47, %v704_v29 }
 0x580   :  { %v735_v50 = vsel %vm731_vm8, %v709_v27, %v733_v48 }
 0x581   :  { %v734_v51 = vsel %vm730_vm9, %v704_v29, %v732_v49  ;;  %v737_v55 = vadd.f32 %v735_v50, %v3140_v54 }
 0x582   :  { %v736_v52 = vadd.f32 %v734_v51, %v3137_v53 }
 0x584   :  { %2051 = vmatprep.mubr.f32.mxu1 %v736_v52  ;;  %v1091_v52 = vld [vmem:[#allocation7 + $0x280] sm:$0xff] }
 0x585   :  { %2052 = vmatmul.mubr.f32.vlgmr.msra.gmra.mrb[4].mxu1 %v737_v55  ;;  %v1092_v55 = vld [vmem:[#allocation7 + $0x288] sm:$0xff] }
 0x586   :  { %2491 = vmatpush3.bf16.msra.mxu1 %v2488_v1  ;;  %v2520_v56 = vpack.c.bf16 %v1092_v55, %v1091_v52  ;;  %v1101_v1 = vld [vmem:[#allocation7 + $0x2d0] sm:$0xff]  ;;  %v1222_v55 = vld [vmem:[#allocation7 + $0x340] sm:$0xff] }
 0x587   :  { %2493 = vmatprep.subr.bf16.mxu1 %v2492_v4  ;;  %v2540_v3 = vpack.c.bf16 %v1102_v2, %v1101_v1 }
 0x588   :  { %2521 = vmatprep.subr.bf16.mxu0 %v2520_v56 }
 0x58a   :  { %2495 = vmatpush3.bf16.msra.mxu1 %v2492_v4  ;;  %v1103_v4 = vld [vmem:[#allocation7 + $0x2e0] sm:$0xff] }
 0x58b   :  { %2497 = vmatprep.subr.bf16.mxu1 %v2496_v7  ;;  %v2544_v6 = vpack.c.bf16 %v1104_v5, %v1103_v4 }
 0x58e   :  { %2499 = vmatpush3.bf16.msra.mxu1 %v2496_v7  ;;  %v1105_v7 = vld [vmem:[#allocation7 + $0x2f0] sm:$0xff] }
 0x58f   :  { %2501 = vmatprep.subr.bf16.mxu1 %v2500_v10  ;;  %v2548_v9 = vpack.c.bf16 %v1106_v8, %v1105_v7 }
 0x592   :  { %2503 = vmatpush3.bf16.msra.mxu1 %v2500_v10  ;;  %v1615_v10 = vld [vmem:[%s3227_s5 + $0x4] ss:$0 sm:$0xff] }
 0x593   :  { %2505 = vmatprep.subr.bf16.mxu1 %v2504_v15 }
 0x596   :  { %2507 = vmatpush3.bf16.msra.mxu1 %v2504_v15 }
 0x597   :  { %2509 = vmatprep.subr.bf16.mxu1 %v2508_v18 }
 0x59a   :  { %2511 = vmatpush3.bf16.msra.mxu1 %v2508_v18 }
 0x59b   :  { %2513 = vmatprep.subr.bf16.mxu1 %v2512_v21 }
 0x59e   :  { %2515 = vmatpush3.bf16.msra.mxu1 %v2512_v21 }
 0x59f   :  { %2517 = vmatprep.subr.bf16.mxu1 %v2516_v24 }
 0x5a2   :  { %2519 = vmatpush3.bf16.msra.mxu1 %v2516_v24 }
 0x658   :  { %v2053_v60 = vpop.f32.mrb[4].mxu1 }
 0x659   :  { %v833_v11 = vadd.f32 %v2053_v60, %v1610_v59  ;;  %v827_v53 = vpop.f32.mrb[5].mxu1  ;;  %v1095_v60 = vld [vmem:[#allocation7 + $0x2a0] sm:$0xff] }
 0x65a   :  { %v828_v62 = vadd.f32 %v1610_v59, %v827_v53  ;;  %v2524_v59 = vpack.c.bf16 %v1094_v58, %v1093_v57  ;;  %v1097_v53 = vld [vmem:[#allocation7 + $0x2b0] sm:$0xff] }
 0x65b   :  { %v844_v54 = vmin.f32 %v833_v11, %v1611_v61  ;;  %v1224_v58 = vld [vmem:[#allocation7 + $0x350] sm:$0xff] }
 0x65c   :  { %v843_v12 = vmin.f32 %v828_v62, %v1611_v61  ;;  %2086 = vmatprep.mubr.f32.mxu0 %v828_v62  ;;  %v1096_v61 = vld [vmem:[#allocation7 + $0x2a8] sm:$0xff]  ;;  %v1098_v62 = vld [vmem:[#allocation7 + $0x2b8] sm:$0xff] }
 0x65d   :  { %846 = vst [vmem:[#allocation14 + $0x8] sm:$0xff] %v844_v54  ;;  %2087 = vmatmul.mubr.f32.vlgmr.msra.gmra.mrb[6].mxu0 %v833_v11  ;;  %v2528_v11 = vpack.c.bf16 %v1096_v61, %v1095_v60  ;;  %v2532_v54 = vpack.c.bf16 %v1098_v62, %v1097_v53  ;;  %v1226_v61 = vld [vmem:[#allocation7 + $0x360] sm:$0xff]  ;;  %v1228_v62 = vld [vmem:[#allocation7 + $0x370] sm:$0xff] }
 0x65e   :  { %845 = vst [vmem:[#allocation14] sm:$0xff] %v843_v12  ;;  %2523 = vmatpush3.bf16.msra.mxu0 %v2520_v56  ;;  %v1099_v12 = vld [vmem:[#allocation7 + $0x2c0] sm:$0xff]  ;;  %v1223_v56 = vld [vmem:[#allocation7 + $0x348] sm:$0xff] }
 0x65f   :  { %2525 = vmatprep.subr.bf16.mxu0 %v2524_v59  ;;  %v2536_v0 = vpack.c.bf16 %v1100_v63, %v1099_v12  ;;  %v2568_v57 = vpack.c.bf16 %v1223_v56, %v1222_v55  ;;  %v1618_v63 = vld [vmem:[%s3227_s5 + $0x5] ss:$0 sm:$0xff]  ;;  %v1621_v56 = vld [vmem:[%s3227_s5 + $0x6] ss:$0 sm:$0xff] }
 0x662   :  { %2527 = vmatpush3.bf16.msra.mxu0 %v2524_v59  ;;  %v1225_v59 = vld [vmem:[#allocation7 + $0x358] sm:$0xff] }
 0x663   :  { %2529 = vmatprep.subr.bf16.mxu0 %v2528_v11  ;;  %v2572_v60 = vpack.c.bf16 %v1225_v59, %v1224_v58 }
 0x666   :  { %2531 = vmatpush3.bf16.msra.mxu0 %v2528_v11  ;;  %v1227_v11 = vld [vmem:[#allocation7 + $0x368] sm:$0xff] }
 0x667   :  { %2533 = vmatprep.subr.bf16.mxu0 %v2532_v54  ;;  %v2576_v53 = vpack.c.bf16 %v1227_v11, %v1226_v61 }
 0x66a   :  { %2535 = vmatpush3.bf16.msra.mxu0 %v2532_v54  ;;  %v1229_v54 = vld [vmem:[#allocation7 + $0x378] sm:$0xff] }
 0x66b   :  { %2537 = vmatprep.subr.bf16.mxu0 %v2536_v0  ;;  %v2580_v12 = vpack.c.bf16 %v1229_v54, %v1228_v62 }
 0x66e   :  { %2539 = vmatpush3.bf16.msra.mxu0 %v2536_v0 }
 0x66f   :  { %2541 = vmatprep.subr.bf16.mxu0 %v2540_v3 }
 0x672   :  { %2543 = vmatpush3.bf16.msra.mxu0 %v2540_v3 }
 0x673   :  { %2545 = vmatprep.subr.bf16.mxu0 %v2544_v6 }
 0x676   :  { %2547 = vmatpush3.bf16.msra.mxu0 %v2544_v6 }
 0x677   :  { %2549 = vmatprep.subr.bf16.mxu0 %v2548_v9 }
 0x67a   :  { %2551 = vmatpush3.bf16.msra.mxu0 %v2548_v9 }
 0x730   :  { %v2088_v26 = vpop.f32.mrb[6].mxu0 }
 0x731   :  { %v942_v27 = vadd.f32 %v2088_v26, %v1612_v25  ;;  %v936_v28 = vpop.f32.mrb[7].mxu0 }
 0x732   :  { %v937_v29 = vadd.f32 %v1612_v25, %v936_v28 }
 0x733   :  { %v946_v30 = vmin.f32 %v942_v27, 20.0  ;;  %vm964_vm11 = vcmp.gt.f32.partialorder %v942_v27, 20.0 }
 0x734   :  { %v945_v31 = vmin.f32 %v937_v29, 20.0  ;;  %vm963_vm10 = vcmp.gt.f32.partialorder %v937_v29, 20.0 }
 0x735   :  { %v949_v32 = vmul.f32 1.442695, %v946_v30 }
 0x736   :  { %v947_v33 = vmul.f32 1.442695, %v945_v31 }
 0x737   :  { %2698 = vpow2.f32 %v949_v32 }
 0x738   :  { %2700 = vpow2.f32 %v947_v33 }
 0x741   :  { %v2699_v34 = vpop.eup %2698 }
 0x742   :  { %v2701_v35 = vpop.eup %2700  ;;  %v952_v36 = vadd.f32 1.0, %v2699_v34 }
 0x743   :  { %v951_v37 = vadd.f32 1.0, %v2701_v35 }
 0x744   :  { %v954_v38 = vmul.f32 %v952_v36, %v952_v36 }
 0x745   :  { %v953_v39 = vmul.f32 %v951_v37, %v951_v37 }
 0x746   :  { %v958_v40 = vadd.f32 1.0, %v954_v38  ;;  %v1614_v42 = vadd.f32 -1.0, %v954_v38 }
 0x747   :  { %v957_v41 = vadd.f32 1.0, %v953_v39  ;;  %v1613_v44 = vadd.f32 -1.0, %v953_v39  ;;  %v1214_v39 = vld [vmem:[#allocation7 + $0x300] sm:$0xff] }
 0x748   :  { %2702 = vrcp.f32 %v958_v40  ;;  %v1215_v40 = vld [vmem:[#allocation7 + $0x308] sm:$0xff] }
 0x749   :  { %2704 = vrcp.f32 %v957_v41  ;;  %v2552_v41 = vpack.c.bf16 %v1215_v40, %v1214_v39  ;;  %v1343_v40 = vld [vmem:[#allocation7 + $0x3c0] sm:$0xff] }
 0x74b   :  { %2553 = vmatprep.subr.bf16.mxu1 %v2552_v41 }
 0x752   :  { %v2703_v43 = vpop.eup %2702 }
 0x753   :  { %v2705_v45 = vpop.eup %2704  ;;  %v962_v46 = vmul.f32 %v2703_v43, %v1614_v42  ;;  %v1216_v42 = vld [vmem:[#allocation7 + $0x310] sm:$0xff]  ;;  %v1217_v43 = vld [vmem:[#allocation7 + $0x318] sm:$0xff] }
 0x754   :  { %v960_v47 = vmul.f32 %v2705_v45, %v1613_v44  ;;  %v2556_v44 = vpack.c.bf16 %v1217_v43, %v1216_v42  ;;  %v1218_v45 = vld [vmem:[#allocation7 + $0x320] sm:$0xff]  ;;  %v1345_v43 = vld [vmem:[#allocation7 + $0x3d0] sm:$0xff] }
 0x755   :  { %v966_v48 = vmul.f32 %v962_v46, %v942_v27  ;;  %v1219_v46 = vld [vmem:[#allocation7 + $0x328] sm:$0xff] }
 0x756   :  { %v965_v49 = vmul.f32 %v960_v47, %v937_v29  ;;  %v2560_v47 = vpack.c.bf16 %v1219_v46, %v1218_v45  ;;  %v1347_v46 = vld [vmem:[#allocation7 + $0x3e0] sm:$0xff] }
 0x757   :  { %v3164_v51 = vsel %vm964_vm11, %v942_v27, %v966_v48  ;;  %v1220_v48 = vld [vmem:[#allocation7 + $0x330] sm:$0xff] }
 0x758   :  { %v3161_v50 = vsel %vm963_vm10, %v937_v29, %v965_v49  ;;  %v1221_v49 = vld [vmem:[#allocation7 + $0x338] sm:$0xff] }
 0x759   :  { %2121 = vmatprep.mubr.f32.mxu1 %v3161_v50  ;;  %v2564_v52 = vpack.c.bf16 %v1221_v49, %v1220_v48  ;;  %v1349_v49 = vld [vmem:[#allocation7 + $0x3f0] sm:$0xff] }
 0x75a   :  { %2122 = vmatmul.mubr.f32.vlgmr.msra.gmra.mrb[6].mxu1 %v3164_v51 }
 0x75b   :  { %2555 = vmatpush3.bf16.msra.mxu1 %v2552_v41  ;;  %v1344_v41 = vld [vmem:[#allocation7 + $0x3c8] sm:$0xff] }
 0x75c   :  { %2557 = vmatprep.subr.bf16.mxu1 %v2556_v44  ;;  %v2600_v42 = vpack.c.bf16 %v1344_v41, %v1343_v40  ;;  %v1624_v41 = vld [vmem:[%s3227_s5 + $0x7] ss:$0 sm:$0xff]  ;;  %s2938_s5 = smov [#allocation14]  }
 0x75d   :  { %s1576_s29 = sshll.u32 %s2938_s5, 4  ;;  %s1577_s29 = int_to_ptr.vmem [resolvable:$true] %s1576_s29 }
 0x75e   :  { %s2874_s10 = scalar_lea.vmem %s1577_s29, 256  ;;  %p2879_p7 = scmp.lt.s32.totalorder %s1577_s29, %s1577_s29 }
 0x75f   :  { %2559 = vmatpush3.bf16.msra.mxu1 %v2556_v44  ;;  %v1346_v44 = vld [vmem:[#allocation7 + $0x3d8] sm:$0xff]  ;;  %p2875_p6 = scmp.ne.s32.totalorder %s1577_s29, %s2874_s10  ;;  %p2880_p8 = scmp.lt.s32.totalorder %s2874_s10, %s2874_s10 }
 0x760   :  { %2561 = vmatprep.subr.bf16.mxu1 %v2560_v47  ;;  %v2604_v45 = vpack.c.bf16 %v1346_v44, %v1345_v43 }
 0x761   :  { %p2881_p9 = por %p2880_p8, %p2879_p7 }
 0x763   :  { %2563 = vmatpush3.bf16.msra.mxu1 %v2560_v47  ;;  %v1348_v47 = vld [vmem:[#allocation7 + $0x3e8] sm:$0xff]  ;;  %p2882_p10 = pnand %p2881_p9, %p2875_p6 }
 0x764   :  { %2565 = vmatprep.subr.bf16.mxu1 %v2564_v52  ;;  %v2608_v48 = vpack.c.bf16 %v1348_v47, %v1347_v46 }
 0x767   :  { %2567 = vmatpush3.bf16.msra.mxu1 %v2564_v52  ;;  %v1350_v52 = vld [vmem:[#allocation7 + $0x3f8] sm:$0xff] }
 0x768   :  { %2569 = vmatprep.subr.bf16.mxu1 %v2568_v57  ;;  %v2612_v55 = vpack.c.bf16 %v1350_v52, %v1349_v49 }
 0x76b   :  { %2571 = vmatpush3.bf16.msra.mxu1 %v2568_v57 }
 0x76c   :  { %2573 = vmatprep.subr.bf16.mxu1 %v2572_v60 }
 0x76f   :  { %2575 = vmatpush3.bf16.msra.mxu1 %v2572_v60 }
 0x770   :  { %2577 = vmatprep.subr.bf16.mxu1 %v2576_v53 }
 0x773   :  { %2579 = vmatpush3.bf16.msra.mxu1 %v2576_v53 }
 0x774   :  { %2581 = vmatprep.subr.bf16.mxu1 %v2580_v12 }
 0x777   :  { %2583 = vmatpush3.bf16.msra.mxu1 %v2580_v12 }
 0x82d   :  { %v2123_v13 = vpop.f32.mrb[6].mxu1 }
 0x82e   :  { %v1063_v14 = vadd.f32 %v2123_v13, %v1615_v10  ;;  %v1057_v15 = vpop.f32.mrb[7].mxu1 }
 0x82f   :  { %v1058_v16 = vadd.f32 %v1615_v10, %v1057_v15 }
 0x830   :  { %v1067_v17 = vmin.f32 %v1063_v14, 20.0  ;;  %vm1085_vm13 = vcmp.gt.f32.partialorder %v1063_v14, 20.0 }
 0x831   :  { %v1066_v18 = vmin.f32 %v1058_v16, 20.0  ;;  %vm1084_vm12 = vcmp.gt.f32.partialorder %v1058_v16, 20.0 }
 0x832   :  { %v1070_v19 = vmul.f32 1.442695, %v1067_v17 }
 0x833   :  { %v1068_v20 = vmul.f32 1.442695, %v1066_v18 }
 0x834   :  { %2706 = vpow2.f32 %v1070_v19 }
 0x835   :  { %2708 = vpow2.f32 %v1068_v20 }
 0x83e   :  { %v2707_v21 = vpop.eup %2706 }
 0x83f   :  { %v2709_v22 = vpop.eup %2708  ;;  %v1073_v23 = vadd.f32 1.0, %v2707_v21 }
 0x840   :  { %v1072_v24 = vadd.f32 1.0, %v2709_v22 }
 0x841   :  { %v1075_v25 = vmul.f32 %v1073_v23, %v1073_v23 }
 0x842   :  { %v1074_v26 = vmul.f32 %v1072_v24, %v1072_v24 }
 0x843   :  { %v1079_v27 = vadd.f32 1.0, %v1075_v25  ;;  %v1617_v29 = vadd.f32 -1.0, %v1075_v25 }
 0x844   :  { %v1078_v28 = vadd.f32 1.0, %v1074_v26  ;;  %v1616_v31 = vadd.f32 -1.0, %v1074_v26 }
 0x845   :  { %2710 = vrcp.f32 %v1079_v27 }
 0x846   :  { %2712 = vrcp.f32 %v1078_v28 }
 0x84f   :  { %v2711_v30 = vpop.eup %2710 }
 0x850   :  { %v2713_v32 = vpop.eup %2712  ;;  %v1083_v33 = vmul.f32 %v2711_v30, %v1617_v29  ;;  %v1335_v30 = vld [vmem:[#allocation7 + $0x380] sm:$0xff] }
 0x851   :  { %v1081_v34 = vmul.f32 %v2713_v32, %v1616_v31  ;;  %v1336_v31 = vld [vmem:[#allocation7 + $0x388] sm:$0xff] }
 0x852   :  { %v1087_v35 = vmul.f32 %v1083_v33, %v1063_v14  ;;  %v2584_v32 = vpack.c.bf16 %v1336_v31, %v1335_v30  ;;  %v1337_v33 = vld [vmem:[#allocation7 + $0x390] sm:$0xff]  ;;  %v1465_v31 = vld [vmem:[#allocation11 + $0x40] sm:$0xff] }
 0x853   :  { %v1086_v36 = vmul.f32 %v1081_v34, %v1058_v16  ;;  %v1338_v34 = vld [vmem:[#allocation7 + $0x398] sm:$0xff] }
 0x854   :  { %v1089_v38 = vsel %vm1085_vm13, %v1063_v14, %v1087_v35  ;;  %2585 = vmatprep.subr.bf16.mxu0 %v2584_v32  ;;  %v2588_v35 = vpack.c.bf16 %v1338_v34, %v1337_v33  ;;  %v1467_v34 = vld [vmem:[#allocation11 + $0x50] sm:$0xff] }
 0x855   :  { %v1088_v37 = vsel %vm1084_vm12, %v1058_v16, %v1086_v36  ;;  %v1339_v36 = vld [vmem:[#allocation7 + $0x3a0] sm:$0xff] }
 0x856   :  { %2156 = vmatprep.mubr.f32.mxu0 %v1088_v37 }
 0x857   :  { %2157 = vmatmul.mubr.f32.vlgmr.msra.gmra.mrb[8].mxu0 %v1089_v38  ;;  %v1342_v38 = vld [vmem:[#allocation7 + $0x3b8] sm:$0xff] }
 0x858   :  { %2587 = vmatpush3.bf16.msra.mxu0 %v2584_v32  ;;  %v1466_v32 = vld [vmem:[#allocation11 + $0x48] sm:$0xff] }
 0x859   :  { %2589 = vmatprep.subr.bf16.mxu0 %v2588_v35  ;;  %v2632_v33 = vpack.c.bf16 %v1466_v32, %v1465_v31 }
 0x85c   :  { %2591 = vmatpush3.bf16.msra.mxu0 %v2588_v35  ;;  %v1468_v35 = vld [vmem:[#allocation11 + $0x58] sm:$0xff] }
 0x92a   :  { %v2158_v0 = vpop.f32.mrb[8].mxu0 }
 0x92b   :  { %v1184_v1 = vadd.f32 %v2158_v0, %v1618_v63  ;;  %v1178_v2 = vpop.f32.mrb[9].mxu0 }
 0x92c   :  { %v1179_v3 = vadd.f32 %v1618_v63, %v1178_v2 }
 0x92d   :  { %v1188_v4 = vmin.f32 %v1184_v1, 20.0  ;;  %vm1206_vm14 = vcmp.gt.f32.partialorder %v1184_v1, 20.0 }
 0x92e   :  { %v1187_v5 = vmin.f32 %v1179_v3, 20.0  ;;  %vm1205_vm15 = vcmp.gt.f32.partialorder %v1179_v3, 20.0 }
 0x92f   :  { %v1191_v6 = vmul.f32 1.442695, %v1188_v4 }
 0x930   :  { %v1189_v7 = vmul.f32 1.442695, %v1187_v5 }
 0x931   :  { %2714 = vpow2.f32 %v1191_v6 }
 0x932   :  { %2716 = vpow2.f32 %v1189_v7 }
 0x93b   :  { %v2715_v8 = vpop.eup %2714 }
 0x93c   :  { %v2717_v9 = vpop.eup %2716  ;;  %v1194_v10 = vadd.f32 1.0, %v2715_v8 }
 0x93d   :  { %v1193_v13 = vadd.f32 1.0, %v2717_v9 }
 0x93e   :  { %v1196_v14 = vmul.f32 %v1194_v10, %v1194_v10 }
 0x93f   :  { %v1195_v15 = vmul.f32 %v1193_v13, %v1193_v13 }
 0x940   :  { %v1200_v16 = vadd.f32 1.0, %v1196_v14  ;;  %v1620_v18 = vadd.f32 -1.0, %v1196_v14 }
 0x941   :  { %v1199_v17 = vadd.f32 1.0, %v1195_v15  ;;  %v1619_v20 = vadd.f32 -1.0, %v1195_v15 }
 0x942   :  { %2718 = vrcp.f32 %v1200_v16 }
 0x943   :  { %2720 = vrcp.f32 %v1199_v17  ;;  %v1457_v17 = vld [vmem:[#allocation11] sm:$0xff] }
 0x94c   :  { %v2719_v19 = vpop.eup %2718 }
 0x94d   :  { %v2721_v21 = vpop.eup %2720  ;;  %v1204_v22 = vmul.f32 %v2719_v19, %v1620_v18  ;;  %v1458_v18 = vld [vmem:[#allocation11 + $0x8] sm:$0xff] }
 0x94e   :  { %v1202_v23 = vmul.f32 %v2721_v21, %v1619_v20  ;;  %v2616_v19 = vpack.c.bf16 %v1458_v18, %v1457_v17  ;;  %v1459_v20 = vld [vmem:[#allocation11 + $0x10] sm:$0xff]  ;;  %v1460_v21 = vld [vmem:[#allocation11 + $0x18] sm:$0xff] }
 0x94f   :  { %v1208_v24 = vmul.f32 %v1204_v22, %v1184_v1  ;;  %v2620_v22 = vpack.c.bf16 %v1460_v21, %v1459_v20 }
 0x950   :  { %v1207_v25 = vmul.f32 %v1202_v23, %v1179_v3  ;;  %2617 = vmatprep.subr.bf16.mxu1 %v2616_v19  ;;  %v1461_v23 = vld [vmem:[#allocation11 + $0x20] sm:$0xff] }
 0x951   :  { %v1210_v26 = vsel %vm1206_vm14, %v1184_v1, %v1208_v24  ;;  %v1462_v24 = vld [vmem:[#allocation11 + $0x28] sm:$0xff] }
 0x952   :  { %v1209_v27 = vsel %vm1205_vm15, %v1179_v3, %v1207_v25  ;;  %v3177_v29 = vadd.f32 %v1210_v26, %v3164_v51  ;;  %v1341_v51 = vld [vmem:[#allocation7 + $0x3b0] sm:$0xff]  ;;  %v2624_v25 = vpack.c.bf16 %v1462_v24, %v1461_v23 }
 0x953   :  { %v3174_v28 = vadd.f32 %v1209_v27, %v3161_v50  ;;  %v1340_v50 = vld [vmem:[#allocation7 + $0x3a8] sm:$0xff]  ;;  %v2596_v39 = vpack.c.bf16 %v1342_v38, %v1341_v51  ;;  %v1463_v26 = vld [vmem:[#allocation11 + $0x30] sm:$0xff]  ;;  %v1464_v27 = vld [vmem:[#allocation11 + $0x38] sm:$0xff] }
 0x954   :  { %v2592_v37 = vpack.c.bf16 %v1340_v50, %v1339_v36  ;;  %v2628_v30 = vpack.c.bf16 %v1464_v27, %v1463_v26  ;;  %v2636_v36 = vpack.c.bf16 %v1468_v35, %v1467_v34  ;;  %v1469_v50 = vld [vmem:[#allocation11 + $0x60] sm:$0xff]  ;;  %v1471_v38 = vld [vmem:[#allocation11 + $0x70] sm:$0xff] }
 0x955   :  { %2191 = vmatprep.mubr.f32.mxu1 %v3174_v28 }
 0x956   :  { %2192 = vmatmul.mubr.f32.vlgmr.msra.gmra.mrb[8].mxu1 %v3177_v29  ;;  %2593 = vmatprep.subr.bf16.mxu0 %v2592_v37 }
 0x957   :  { %2595 = vmatpush3.bf16.msra.mxu0 %v2592_v37  ;;  %2619 = vmatpush3.bf16.msra.mxu1 %v2616_v19  ;;  %v1470_v37 = vld [vmem:[#allocation11 + $0x68] sm:$0xff] }
 0x958   :  { %2597 = vmatprep.subr.bf16.mxu0 %v2596_v39  ;;  %2621 = vmatprep.subr.bf16.mxu1 %v2620_v22  ;;  %v2640_v51 = vpack.c.bf16 %v1470_v37, %v1469_v50 }
 0x95b   :  { %2599 = vmatpush3.bf16.msra.mxu0 %v2596_v39  ;;  %2623 = vmatpush3.bf16.msra.mxu1 %v2620_v22  ;;  %v1472_v39 = vld [vmem:[#allocation11 + $0x78] sm:$0xff] }
 0x95c   :  { %2601 = vmatprep.subr.bf16.mxu0 %v2600_v42  ;;  %2625 = vmatprep.subr.bf16.mxu1 %v2624_v25  ;;  %v2644_v40 = vpack.c.bf16 %v1472_v39, %v1471_v38 }
 0x95f   :  { %2603 = vmatpush3.bf16.msra.mxu0 %v2600_v42  ;;  %2627 = vmatpush3.bf16.msra.mxu1 %v2624_v25 }
 0x960   :  { %2605 = vmatprep.subr.bf16.mxu0 %v2604_v45  ;;  %2629 = vmatprep.subr.bf16.mxu1 %v2628_v30 }
 0x963   :  { %2607 = vmatpush3.bf16.msra.mxu0 %v2604_v45  ;;  %2631 = vmatpush3.bf16.msra.mxu1 %v2628_v30 }
 0x964   :  { %2609 = vmatprep.subr.bf16.mxu0 %v2608_v48  ;;  %2633 = vmatprep.subr.bf16.mxu1 %v2632_v33 }
 0x967   :  { %2611 = vmatpush3.bf16.msra.mxu0 %v2608_v48  ;;  %2635 = vmatpush3.bf16.msra.mxu1 %v2632_v33 }
 0x968   :  { %2613 = vmatprep.subr.bf16.mxu0 %v2612_v55  ;;  %2637 = vmatprep.subr.bf16.mxu1 %v2636_v36 }
 0x96b   :  { %2615 = vmatpush3.bf16.msra.mxu0 %v2612_v55  ;;  %2639 = vmatpush3.bf16.msra.mxu1 %v2636_v36 }
 0x96c   :  { %2641 = vmatprep.subr.bf16.mxu1 %v2640_v51 }
 0x96f   :  { %2643 = vmatpush3.bf16.msra.mxu1 %v2640_v51 }
 0x970   :  { %2645 = vmatprep.subr.bf16.mxu1 %v2644_v40 }
 0x973   :  { %2647 = vmatpush3.bf16.msra.mxu1 %v2644_v40 }
 0xa29   :  { %v2193_v57 = vpop.f32.mrb[8].mxu1 }
 0xa2a   :  { %v1307_v58 = vadd.f32 %v2193_v57, %v1621_v56  ;;  %v1301_v59 = vpop.f32.mrb[9].mxu1 }
 0xa2b   :  { %v1302_v60 = vadd.f32 %v1621_v56, %v1301_v59 }
 0xa2c   :  { %v1311_v61 = vmin.f32 %v1307_v58, 20.0  ;;  %vm1329_vm1 = vcmp.gt.f32.partialorder %v1307_v58, 20.0 }
 0xa2d   :  { %v1310_v11 = vmin.f32 %v1302_v60, 20.0  ;;  %vm1328_vm0 = vcmp.gt.f32.partialorder %v1302_v60, 20.0 }
 0xa2e   :  { %v1314_v53 = vmul.f32 1.442695, %v1311_v61 }
 0xa2f   :  { %v1312_v62 = vmul.f32 1.442695, %v1310_v11 }
 0xa30   :  { %2722 = vpow2.f32 %v1314_v53 }
 0xa31   :  { %2724 = vpow2.f32 %v1312_v62 }
 0xa3a   :  { %v2723_v54 = vpop.eup %2722 }
 0xa3b   :  { %v2725_v12 = vpop.eup %2724  ;;  %v1317_v63 = vadd.f32 1.0, %v2723_v54 }
 0xa3c   :  { %v1316_v0 = vadd.f32 1.0, %v2725_v12 }
 0xa3d   :  { %v1319_v1 = vmul.f32 %v1317_v63, %v1317_v63 }
 0xa3e   :  { %v1318_v2 = vmul.f32 %v1316_v0, %v1316_v0 }
 0xa3f   :  { %v1323_v3 = vadd.f32 1.0, %v1319_v1  ;;  %v1623_v5 = vadd.f32 -1.0, %v1319_v1 }
 0xa40   :  { %v1322_v4 = vadd.f32 1.0, %v1318_v2  ;;  %v1622_v7 = vadd.f32 -1.0, %v1318_v2 }
 0xa41   :  { %2726 = vrcp.f32 %v1323_v3 }
 0xa42   :  { %2728 = vrcp.f32 %v1322_v4 }
 0xa4b   :  { %v2727_v6 = vpop.eup %2726 }
 0xa4c   :  { %v2729_v8 = vpop.eup %2728  ;;  %v1327_v9 = vmul.f32 %v2727_v6, %v1623_v5 }
 0xa4d   :  { %v1325_v10 = vmul.f32 %v2729_v8, %v1622_v7 }
 0xa4e   :  { %v1331_v13 = vmul.f32 %v1327_v9, %v1307_v58 }
 0xa4f   :  { %v1330_v14 = vmul.f32 %v1325_v10, %v1302_v60 }
 0xa50   :  { %v1333_v16 = vsel %vm1329_vm1, %v1307_v58, %v1331_v13 }
 0xa51   :  { %v1332_v15 = vsel %vm1328_vm0, %v1302_v60, %v1330_v14 }
 0xa52   :  { %2226 = vmatprep.mubr.f32.mxu0 %v1332_v15 }
 0xa53   :  { %2227 = vmatmul.mubr.f32.vlgmr.msra.gmra.mrb[10].mxu0 %v1333_v16 }
 0xb26   :  { %v2228_v42 = vpop.f32.mrb[10].mxu0 }
 0xb27   :  { %v1428_v43 = vadd.f32 %v2228_v42, %v1624_v41  ;;  %v1422_v44 = vpop.f32.mrb[11].mxu0 }
 0xb28   :  { %v1423_v45 = vadd.f32 %v1624_v41, %v1422_v44 }
 0xb29   :  { %v1432_v46 = vmin.f32 %v1428_v43, 20.0  ;;  %vm1450_vm2 = vcmp.gt.f32.partialorder %v1428_v43, 20.0 }
 0xb2a   :  { %v1431_v47 = vmin.f32 %v1423_v45, 20.0  ;;  %vm1449_vm3 = vcmp.gt.f32.partialorder %v1423_v45, 20.0 }
 0xb2b   :  { %v1435_v48 = vmul.f32 1.442695, %v1432_v46 }
 0xb2c   :  { %v1433_v49 = vmul.f32 1.442695, %v1431_v47 }
 0xb2d   :  { %2730 = vpow2.f32 %v1435_v48 }
 0xb2e   :  { %2732 = vpow2.f32 %v1433_v49 }
 0xb37   :  { %v2731_v52 = vpop.eup %2730 }
 0xb38   :  { %v2733_v55 = vpop.eup %2732  ;;  %v1438_v56 = vadd.f32 1.0, %v2731_v52 }
 0xb39   :  { %v1437_v57 = vadd.f32 1.0, %v2733_v55 }
 0xb3a   :  { %v1440_v58 = vmul.f32 %v1438_v56, %v1438_v56 }
 0xb3b   :  { %v1439_v59 = vmul.f32 %v1437_v57, %v1437_v57 }
 0xb3c   :  { %v1444_v60 = vadd.f32 1.0, %v1440_v58  ;;  %v1626_v11 = vadd.f32 -1.0, %v1440_v58 }
 0xb3d   :  { %v1443_v61 = vadd.f32 1.0, %v1439_v59  ;;  %v1625_v62 = vadd.f32 -1.0, %v1439_v59 }
 0xb3e   :  { %2734 = vrcp.f32 %v1444_v60 }
 0xb3f   :  { %2736 = vrcp.f32 %v1443_v61 }
 0xb48   :  { %v2735_v53 = vpop.eup %2734 }
 0xb49   :  { %v2737_v54 = vpop.eup %2736  ;;  %v1448_v12 = vmul.f32 %v2735_v53, %v1626_v11 }
 0xb4a   :  { %v1446_v63 = vmul.f32 %v2737_v54, %v1625_v62 }
 0xb4b   :  { %v1452_v0 = vmul.f32 %v1448_v12, %v1428_v43 }
 0xb4c   :  { %v1451_v1 = vmul.f32 %v1446_v63, %v1423_v45 }
 0xb4d   :  { %v1454_v2 = vsel %vm1450_vm2, %v1428_v43, %v1452_v0 }
 0xb4e   :  { %v1453_v3 = vsel %vm1449_vm3, %v1423_v45, %v1451_v1  ;;  %v1456_v5 = vadd.f32 %v1454_v2, %v3177_v29 }
 0xb4f   :  { %v1455_v4 = vadd.f32 %v1453_v3, %v3174_v28 }
 0xb51   :  { %2261 = vmatprep.mubr.f32.mxu1 %v1455_v4 }
 0xb52   :  { %2262 = vmatmul.mubr.f32.vlgmr.msra.gmra.mrb[10].mxu1 %v1456_v5 }
 0xb53   :  { %2885 = shalt.err (!%p2882_p10)
}
 0xb54   :  { %s2886_s28 = scalar_lea.hbm %s3235_s13, 256 }
 0xb55   :  { %p2887_p11 = scmp.ne.s32.totalorder %s3235_s13, %s2886_s28  ;;  %p2890_p12 = scmp.lt.u32.totalorder %s2886_s28, %s3235_s13 }
 0xb57   :  { %p2892_p13 = pnand %p2890_p12, %p2887_p11 }
 0xb59   :  { %2895 = shalt.err (!%p2892_p13)
}
 0xb5a   :  { %1582 = dma.vmem_to_hbm [thread:$0]  %s1577_s29, 256, %s3235_s13, [#allocation15], %s2932_s20, %s2932_s20, %s2933_s21  }
 0xb5b   :  { %v1627_v28 = vld [vmem:[%s3233_s11] ss:$0 sm:$0xff]  ;;  %s2939_s23 = smov [#allocation13]  }
 0xb5c   :  { %s1564_s24 = sshll.u32 %s2939_s23, 4  ;;  %s1565_s24 = int_to_ptr.vmem [resolvable:$true] %s1564_s24 }
 0xb5d   :  { %s2896_s1 = scalar_lea.vmem %s1565_s24, 256  ;;  %p2901_p1 = scmp.lt.s32.totalorder %s1565_s24, %s1565_s24 }
 0xb5e   :  { %p2897_p0 = scmp.ne.s32.totalorder %s1565_s24, %s2896_s1  ;;  %p2902_p2 = scmp.lt.s32.totalorder %s2896_s1, %s2896_s1 }
 0xb60   :  { %p2903_p3 = por %p2902_p2, %p2901_p1 }
 0xb62   :  { %p2904_p4 = pnand %p2903_p3, %p2897_p0 }
 0xc25   :  { %v2263_v29 = vpop.f32.mrb[10].mxu1 }
 0xc26   :  { %v1552_v6 = vadd.f32 %v2263_v29, %v1627_v28  ;;  %v1546_v7 = vpop.f32.mrb[11].mxu1 }
 0xc27   :  { %v1547_v8 = vadd.f32 %v1627_v28, %v1546_v7 }
 0xc28   :  { %2738 = vtanh.f32 %v1552_v6 }
 0xc29   :  { %2740 = vtanh.f32 %v1547_v8 }
 0xc32   :  { %v2739_v9 = vpop.eup %2738 }
 0xc33   :  { %v2741_v10 = vpop.eup %2740  ;;  %1558 = vst [vmem:[#allocation13 + $0x8] sm:$0xff] %v2739_v9 }
 0xc34   :  { %1557 = vst [vmem:[#allocation13] sm:$0xff] %v2741_v10 }
 0xc35   :  { %2907 = shalt.err (!%p2904_p4)
}
 0xc36   :  { %s2908_s7 = scalar_lea.hbm %s3234_s12, 256 }
 0xc37   :  { %p2909_p5 = scmp.ne.s32.totalorder %s3234_s12, %s2908_s7  ;;  %p2912_p6 = scmp.lt.u32.totalorder %s2908_s7, %s3234_s12 }
 0xc39   :  { %p2914_p7 = pnand %p2912_p6, %p2909_p5 }
 0xc3b   :  { %2917 = shalt.err (!%p2914_p7)
}
 0xc3c   :  { %1570 = dma.vmem_to_hbm [thread:$0]  %s1565_s24, 256, %s3234_s12, [#allocation4], %s2932_s20, %s2932_s20, %s2933_s21  }
 0xc3d   :  { %2926 = dma.done.wait [#allocation4], 256  }
 0xc3e   :  { %2927 = vsyncadd [#allocation4], 4294967040 }
 0xc3f   :  { %2928 = dma.done.wait [#allocation15], 256  }
 0xc40   :  { %2929 = vsyncadd [#allocation15], 4294967040 }
 0xc41   :  { %1589 = vsyncpa [#allocation3], 1 }
 0xc42   :  { %1590 = vsyncpa [#allocation6], 1 }
 0xc43   :  { %1591 = vsyncpa [#allocation9], 1 }
 0xc44   :  { %1592 = vsyncpa [#allocation12], 1 }
 0xc45   :  { %1593 = vsyncpa [#allocation4], 1 }
 0xc46   :  { %1594 = vsyncpa [#allocation15], 1 }

</bundles_post_ra>
